<compile_context>
chip_gen: v7x
topology: tpu7x:2x2x1
jax: 0.10.0
libtpu: 0.0.40
codegen_flags: <defaults>
</compile_context>

<pallas_src>
import math
import jax
import jax.numpy as jnp
from jax.experimental import pallas as pl
from jax.experimental.pallas import tpu as pltpu

# ------------------------- small synthetic config ---------------------------
IMG, PATCH, C_IN = 16, 8, 3
N_PATCH = (IMG // PATCH) ** 2                  # 4
VIT_D, VIT_LAYERS, VIT_HEADS, VIT_FF = 32, 2, 4, 64
VIT_SEQ = N_PATCH + 1                          # 5 (CLS + patches)
VIT_PAD = 8                                    # padded to a full sublane tile
GPT_D, GPT_LAYERS, GPT_HEADS, GPT_FF = 32, 2, 4, 128
VOCAB, T_CAP = 64, 8
VOCAB_PAD = 128                                # lane-dense LM-head output
NEG_INF = -1e9


# ========================= in-kernel building blocks ========================

def _ln(x, g, b, eps):
    """LayerNorm over last dim. x: (S, D) f32; g, b: (1, D) f32."""
    mu = jnp.mean(x, axis=-1, keepdims=True)
    var = jnp.mean(jnp.square(x - mu), axis=-1, keepdims=True)
    return (x - mu) * jax.lax.rsqrt(var + eps) * g + b


def _gelu(x):
    """tanh-approx GELU (GPT2 'gelu_new'), f32 math."""
    return 0.5 * x * (1.0 + jnp.tanh(0.7978845608028654 * (x + 0.044715 * x * x * x)))


def _bdot(a, b):
    """bf16-operand MXU matmul with f32 accumulation (fast on v6e/v7x, safe on v5e)."""
    return jnp.dot(a.astype(jnp.bfloat16), b.astype(jnp.bfloat16),
                   preferred_element_type=jnp.float32)


def _attn(q, k, v, wo, bo, num_heads, mask):
    """Multi-head attention fused with the output projection.

    q/k/v: (S, D) f32; wo: (D, D) bf16; bo: (1, D) f32; mask: additive (S, S) or None.
    Each head's (S, d_head) output is pushed straight through its Wo row-block
    into a full-width f32 accumulator -> no per-head lane concatenate.
    """
    Sq, D = q.shape
    d_head = D // num_heads
    scale = 1.0 / math.sqrt(d_head)
    acc = jnp.zeros((Sq, D), jnp.float32)
    for h in range(num_heads):
        sl = slice(h * d_head, (h + 1) * d_head)
        s = jax.lax.dot_general(
            q[:, sl].astype(jnp.bfloat16), k[:, sl].astype(jnp.bfloat16),
            (((1,), (1,)), ((), ())), preferred_element_type=jnp.float32) * scale
        if mask is not None:
            s = s + mask
        s = s - jnp.max(s, axis=-1, keepdims=True)
        p = jnp.exp(s)
        p = p * pl.reciprocal(jnp.sum(p, axis=-1, keepdims=True), approx=True)
        oh = jnp.dot(p.astype(jnp.bfloat16), v[:, sl].astype(jnp.bfloat16),
                     preferred_element_type=jnp.float32)            # (S, d_head)
        acc = acc + jnp.dot(oh.astype(jnp.bfloat16), wo[sl, :],
                            preferred_element_type=jnp.float32)     # (S, D)
    return acc + bo


# =================== fully fused ViT + bridge + GPT2 kernel =================
# vector slab layouts (per layer, f32):
#   ViT  v_vec[l]: [ln1_g, ln1_b, bq, bk, bv, bo, ln2_g, ln2_b, b2]          (9)
#   GPT2 g_vec[l]: [ln1_g, ln1_b, bq, bk, bv, bo, bv_c, bo_c, ln2_g, ln2_b, b2] (11)

def _captioner_kernel(patches_ref, ids_ref, amask_ref,
                      v_patch_w, v_pos, v_attn_w, v_vec, v_w1, v_b1, v_w2,
                      v_lnf, bridge,
                      g_wte, g_wpe, g_attn_w, g_cross_w, g_vec, g_w1, g_b1,
                      g_w2, g_lnf, lm_w,
                      logits_ref):
    # ---------------- ViT encoder (sequence padded 5 -> 8 rows) -------------
    patches = patches_ref[0]                                 # (N_PATCH, C*P*P)
    px = _bdot(patches, v_patch_w[...])                      # (N_PATCH, D)
    x = jnp.concatenate(
        [jnp.zeros((1, VIT_D), jnp.float32), px,
         jnp.zeros((VIT_PAD - 1 - N_PATCH, VIT_D), jnp.float32)], axis=0)
    x = x + v_pos[...]            # cls token, pos-emb and patch bias prefolded

    # padded key columns (>= VIT_SEQ) are never attended; generated in-kernel
    col = jax.lax.broadcasted_iota(jnp.int32, (VIT_PAD, VIT_PAD), 1)
    vit_mask = jnp.where(col < VIT_SEQ, 0.0, NEG_INF).astype(jnp.float32)

    for l in range(VIT_LAYERS):
        aw = v_attn_w[l]                                     # (4, D, D) bf16
        vec = v_vec[l]                                       # (9, 1, D) f32
        h = _ln(x, vec[0], vec[1], 1e-12)
        q = _bdot(h, aw[0]) + vec[2]
        k = _bdot(h, aw[1]) + vec[3]
        v = _bdot(h, aw[2]) + vec[4]
        x = x + _attn(q, k, v, aw[3], vec[5], VIT_HEADS, vit_mask)
        h = _ln(x, vec[6], vec[7], 1e-12)
        ff = _gelu(_bdot(h, v_w1[l]) + v_b1[l])
        x = x + _bdot(ff, v_w2[l]) + vec[8]

    x = _ln(x, v_lnf[0], v_lnf[1], 1e-12)

    # ---------------- bridge: CLS token -> decoder width --------------------
    br = bridge[...]                                         # (D+1, GPT_D) f32
    enc = _bdot(x[0:1, :], br[:VIT_D]) + br[VIT_D:VIT_D + 1]  # (1, GPT_D)

    # ---------------- GPT2 decoder ------------------------------------------
    ids = ids_ref[0]                                         # (T, 1) int32
    am = amask_ref[0]                                        # (1, T) f32
    T = ids.shape[0]

    # token embedding as a one-hot MXU matmul (no JAX-side gather / HBM trip)
    vcol = jax.lax.broadcasted_iota(jnp.int32, (T, VOCAB), 1)
    onehot = (ids == vcol).astype(jnp.bfloat16)              # (T, VOCAB)
    x = jnp.dot(onehot, g_wte[...], preferred_element_type=jnp.float32) + g_wpe[...]

    # causal + padding additive mask, generated in-kernel
    row = jax.lax.broadcasted_iota(jnp.int32, (T, T), 0)
    colm = jax.lax.broadcasted_iota(jnp.int32, (T, T), 1)
    causal = jnp.where(row >= colm, 0.0, NEG_INF).astype(jnp.float32)
    self_mask = causal + (1.0 - am) * jnp.float32(NEG_INF)   # (T, T)

    for l in range(GPT_LAYERS):
        aw = g_attn_w[l]                                     # (4, D, D) bf16
        cw = g_cross_w[l]                                    # (2, D, D) bf16
        vec = g_vec[l]                                       # (11, 1, D) f32

        # masked causal self-attention
        h = _ln(x, vec[0], vec[1], 1e-5)
        q = _bdot(h, aw[0]) + vec[2]
        k = _bdot(h, aw[1]) + vec[3]
        v = _bdot(h, aw[2]) + vec[4]
        x = x + _attn(q, k, v, aw[3], vec[5], GPT_HEADS, self_mask)

        # cross-attention to a single (Sk=1) visual token: softmax over one key
        # is identically 1, so the block is exactly broadcast(V projection);
        # ln_cross / Wq_c / Wk_c cannot influence the output and are dropped.
        vc = _bdot(enc, cw[0]) + vec[6]                      # (1, D)
        x = x + _bdot(vc, cw[1]) + vec[7]                    # broadcast along T

        # MLP
        h = _ln(x, vec[8], vec[9], 1e-5)
        ff = _gelu(_bdot(h, g_w1[l]) + g_b1[l])
        x = x + _bdot(ff, g_w2[l]) + vec[10]

    x = _ln(x, g_lnf[0], g_lnf[1], 1e-5)
    # tied LM head, pre-transposed & zero-padded to 128 lanes -> unmasked store
    logits_ref[0] = jnp.dot(x.astype(jnp.bfloat16), lm_w[...],
                            preferred_element_type=jnp.float32)


# ============================ pallas_call wrapper ===========================

def _rep_spec(a):
    """Full-array weight spec, replicated across the batch grid."""
    zeros = (0,) * a.ndim
    return pl.BlockSpec(a.shape, lambda b, _z=zeros: _z)


def _bat_spec(a):
    """Per-batch-element data spec: (1, ...) block indexed by grid position."""
    tail = (0,) * (a.ndim - 1)
    return pl.BlockSpec((1,) + a.shape[1:], lambda b, _t=tail: (b,) + _t)


def vit_gpt2_captioner(params, pixel_values, captions, attention_mask=None):
    """pixel_values (B,C,H,W) NCHW, captions (B,T) int -> logits (B,T,VOCAB)."""
    B = pixel_values.shape[0]
    T = captions.shape[1]
    if attention_mask is None:
        attention_mask = jnp.ones((B, T), jnp.float32)

    # patchify (equivalent to conv2d with kernel=stride=P) -- pure layout glue
    P = PATCH
    x = pixel_values.reshape(B, C_IN, IMG // P, P, IMG // P, P)
    x = x.transpose(0, 2, 4, 1, 3, 5).reshape(B, N_PATCH, C_IN * P * P)

    ids = captions.astype(jnp.int32).reshape(B, T, 1)        # (B, T, 1)
    am = attention_mask.astype(jnp.float32).reshape(B, 1, T)  # (B, 1, T)

    w = params
    weights = (w["v_patch_w"], w["v_pos"], w["v_attn_w"], w["v_vec"], w["v_w1"],
               w["v_b1"], w["v_w2"], w["v_lnf"], w["bridge"],
               w["g_wte"], w["g_wpe"], w["g_attn_w"], w["g_cross_w"], w["g_vec"],
               w["g_w1"], w["g_b1"], w["g_w2"], w["g_lnf"], w["lm_w"])

    logits_padded = pl.pallas_call(
        _captioner_kernel,
        out_shape=jax.ShapeDtypeStruct((B, T, VOCAB_PAD), jnp.float32),
        grid=(B,),
        in_specs=[_bat_spec(x), _bat_spec(ids), _bat_spec(am)]
                 + [_rep_spec(v) for v in weights],
        out_specs=pl.BlockSpec((1, T, VOCAB_PAD), lambda b: (b, 0, 0)),
        compiler_params=pltpu.CompilerParams(dimension_semantics=("parallel",)),
    )(x, ids, am, *weights)

    # Lane-dense 128-wide logits kept end-to-end inside the kernel; trim to the
    # true vocab only here at the API boundary (known, accepted XLA copy).
    return logits_padded[:, :, :VOCAB]


# ============================ parameter init ================================

class KeyGen:
    def __init__(self, key):
        self.key = key

    def __call__(self):
        self.key, sub = jax.random.split(self.key)
        return sub


def init_params(key):
    kg = KeyGen(key)
    f32, bf16 = jnp.float32, jnp.bfloat16

    def rnd(shape, dtype=f32):
        return (jax.random.normal(kg(), shape, f32) * 0.02).astype(dtype)

    def ones(shape):
        return jnp.ones(shape, f32)

    def zeros(shape):
        return jnp.zeros(shape, f32)

    L, D = VIT_LAYERS, VIT_D
    # ViT prefix: cls token + positional embedding + patch-proj bias, prefolded
    cls, pos, patch_b = rnd((1, D)), rnd((VIT_SEQ, D)), rnd((1, D))
    v_pos = jnp.concatenate(
        [cls + pos[0:1], pos[1:VIT_SEQ] + patch_b,
         jnp.zeros((VIT_PAD - VIT_SEQ, D), f32)], axis=0)            # (8, D)

    v_attn_w = jnp.stack([rnd((L, D, D), bf16) for _ in range(4)], axis=1)
    v_bq, v_bk, v_bv, v_bo, v_b2 = (rnd((L, 1, D)) for _ in range(5))
    v_vec = jnp.stack([ones((L, 1, D)), zeros((L, 1, D)), v_bq, v_bk, v_bv, v_bo,
                       ones((L, 1, D)), zeros((L, 1, D)), v_b2], axis=1)  # (L,9,1,D)
    v_w1 = rnd((L, D, VIT_FF), bf16)
    v_b1 = rnd((L, 1, VIT_FF))
    v_w2 = rnd((L, VIT_FF, D), bf16)
    v_lnf = jnp.stack([ones((1, D)), zeros((1, D))], axis=0)         # (2,1,D)

    bridge = jnp.concatenate([rnd((D, GPT_D)), rnd((1, GPT_D))], axis=0)  # (D+1,Dg)

    Lg, Dg = GPT_LAYERS, GPT_D
    wte = rnd((VOCAB, Dg), bf16)
    g_wpe = rnd((T_CAP, Dg))
    g_attn_w = jnp.stack([rnd((Lg, Dg, Dg), bf16) for _ in range(4)], axis=1)
    g_cross_w = jnp.stack([rnd((Lg, Dg, Dg), bf16) for _ in range(2)], axis=1)
    g_bq, g_bk, g_bv, g_bo, g_bvc, g_boc, g_b2 = (rnd((Lg, 1, Dg)) for _ in range(7))
    g_vec = jnp.stack([ones((Lg, 1, Dg)), zeros((Lg, 1, Dg)), g_bq, g_bk, g_bv,
                       g_bo, g_bvc, g_boc, ones((Lg, 1, Dg)), zeros((Lg, 1, Dg)),
                       g_b2], axis=1)                                 # (Lg,11,1,Dg)
    g_w1 = rnd((Lg, Dg, GPT_FF), bf16)
    g_b1 = rnd((Lg, 1, GPT_FF))
    g_w2 = rnd((Lg, GPT_FF, Dg), bf16)
    g_lnf = jnp.stack([ones((1, Dg)), zeros((1, Dg))], axis=0)        # (2,1,Dg)
    # tied LM head: precomputed transpose, zero-padded to 128 lanes
    lm_w = jnp.pad(wte, ((0, VOCAB_PAD - VOCAB), (0, 0))).T           # (Dg, 128) bf16

    return dict(
        v_patch_w=rnd((C_IN * PATCH * PATCH, D), bf16), v_pos=v_pos,
        v_attn_w=v_attn_w, v_vec=v_vec, v_w1=v_w1, v_b1=v_b1, v_w2=v_w2,
        v_lnf=v_lnf, bridge=bridge,
        g_wte=wte, g_wpe=g_wpe, g_attn_w=g_attn_w, g_cross_w=g_cross_w,
        g_vec=g_vec, g_w1=g_w1, g_b1=g_b1, g_w2=g_w2, g_lnf=g_lnf, lm_w=lm_w)


# ================================ main ======================================

if __name__ == "__main__":
    key = jax.random.PRNGKey(0)
    k_img, k_cap, k_param = jax.random.split(key, 3)

    B = 2
    pixel_values = jax.random.normal(k_img, (B, C_IN, IMG, IMG), jnp.float32)  # NCHW
    captions = jax.random.randint(k_cap, (B, T_CAP), 0, VOCAB, jnp.int32)
    attention_mask = jnp.ones((B, T_CAP), jnp.float32)

    params = init_params(k_param)

    forward = jax.jit(vit_gpt2_captioner)
    logits = forward(params, pixel_values, captions, attention_mask)
    logits = jax.block_until_ready(logits)

    assert logits.shape == (B, T_CAP, VOCAB), logits.shape
    assert logits.dtype == jnp.float32
    assert bool(jnp.all(jnp.isfinite(logits)))
    print("KERNEL_OK")
</pallas_src>

<mosaic_0001>
module attributes {stable_mosaic.version = 11 : i64} {
  func.func @_captioner_kernel(%arg0: i32, %arg1: memref<1x4x192xf32, #tpu.memory_space<vmem>>, %arg2: memref<1x8x1xi32, #tpu.memory_space<vmem>>, %arg3: memref<1x1x8xf32, #tpu.memory_space<vmem>>, %arg4: memref<192x32xbf16, #tpu.memory_space<vmem>>, %arg5: memref<8x32xf32, #tpu.memory_space<vmem>>, %arg6: memref<2x4x32x32xbf16, #tpu.memory_space<vmem>>, %arg7: memref<2x9x1x32xf32, #tpu.memory_space<vmem>>, %arg8: memref<2x32x64xbf16, #tpu.memory_space<vmem>>, %arg9: memref<2x1x64xf32, #tpu.memory_space<vmem>>, %arg10: memref<2x64x32xbf16, #tpu.memory_space<vmem>>, %arg11: memref<2x1x32xf32, #tpu.memory_space<vmem>>, %arg12: memref<33x32xf32, #tpu.memory_space<vmem>>, %arg13: memref<64x32xbf16, #tpu.memory_space<vmem>>, %arg14: memref<8x32xf32, #tpu.memory_space<vmem>>, %arg15: memref<2x4x32x32xbf16, #tpu.memory_space<vmem>>, %arg16: memref<2x2x32x32xbf16, #tpu.memory_space<vmem>>, %arg17: memref<2x11x1x32xf32, #tpu.memory_space<vmem>>, %arg18: memref<2x32x128xbf16, #tpu.memory_space<vmem>>, %arg19: memref<2x1x128xf32, #tpu.memory_space<vmem>>, %arg20: memref<2x128x32xbf16, #tpu.memory_space<vmem>>, %arg21: memref<2x1x32xf32, #tpu.memory_space<vmem>>, %arg22: memref<32x128xbf16, #tpu.memory_space<vmem>>, %arg23: memref<1x8x128xf32, #tpu.memory_space<vmem>>) attributes {dimension_semantics = [#tpu.dimension_semantics<parallel>], iteration_bounds = array<i64: 2>, scalar_prefetch = 0 : i64, scratch_operands = 0 : i64, tpu.core_type = #tpu.core_type<tc>, window_params = [{transform_indices = @transform_0, window_bounds = array<i64: 1, 4, 192>}, {transform_indices = @transform_1, window_bounds = array<i64: 1, 8, 1>}, {transform_indices = @transform_2, window_bounds = array<i64: 1, 1, 8>}, {pipeline_mode = #tpu.pipeline_mode<synchronous>, transform_indices = @transform_3, window_bounds = array<i64: 192, 32>}, {pipeline_mode = #tpu.pipeline_mode<synchronous>, transform_indices = @transform_4, window_bounds = array<i64: 8, 32>}, {pipeline_mode = #tpu.pipeline_mode<synchronous>, transform_indices = @transform_5, window_bounds = array<i64: 2, 4, 32, 32>}, {pipeline_mode = #tpu.pipeline_mode<synchronous>, transform_indices = @transform_6, window_bounds = array<i64: 2, 9, 1, 32>}, {pipeline_mode = #tpu.pipeline_mode<synchronous>, transform_indices = @transform_7, window_bounds = array<i64: 2, 32, 64>}, {pipeline_mode = #tpu.pipeline_mode<synchronous>, transform_indices = @transform_8, window_bounds = array<i64: 2, 1, 64>}, {pipeline_mode = #tpu.pipeline_mode<synchronous>, transform_indices = @transform_9, window_bounds = array<i64: 2, 64, 32>}, {pipeline_mode = #tpu.pipeline_mode<synchronous>, transform_indices = @transform_10, window_bounds = array<i64: 2, 1, 32>}, {pipeline_mode = #tpu.pipeline_mode<synchronous>, transform_indices = @transform_11, window_bounds = array<i64: 33, 32>}, {pipeline_mode = #tpu.pipeline_mode<synchronous>, transform_indices = @transform_12, window_bounds = array<i64: 64, 32>}, {pipeline_mode = #tpu.pipeline_mode<synchronous>, transform_indices = @transform_13, window_bounds = array<i64: 8, 32>}, {pipeline_mode = #tpu.pipeline_mode<synchronous>, transform_indices = @transform_14, window_bounds = array<i64: 2, 4, 32, 32>}, {pipeline_mode = #tpu.pipeline_mode<synchronous>, transform_indices = @transform_15, window_bounds = array<i64: 2, 2, 32, 32>}, {pipeline_mode = #tpu.pipeline_mode<synchronous>, transform_indices = @transform_16, window_bounds = array<i64: 2, 11, 1, 32>}, {pipeline_mode = #tpu.pipeline_mode<synchronous>, transform_indices = @transform_17, window_bounds = array<i64: 2, 32, 128>}, {pipeline_mode = #tpu.pipeline_mode<synchronous>, transform_indices = @transform_18, window_bounds = array<i64: 2, 1, 128>}, {pipeline_mode = #tpu.pipeline_mode<synchronous>, transform_indices = @transform_19, window_bounds = array<i64: 2, 128, 32>}, {pipeline_mode = #tpu.pipeline_mode<synchronous>, transform_indices = @transform_20, window_bounds = array<i64: 2, 1, 32>}, {pipeline_mode = #tpu.pipeline_mode<synchronous>, transform_indices = @transform_21, window_bounds = array<i64: 32, 128>}, {transform_indices = @transform_22, window_bounds = array<i64: 1, 8, 128>}]} {
    %c0 = arith.constant 0 : index
    %c0_0 = arith.constant 0 : index
    %c0_1 = arith.constant 0 : index
    %0 = vector.load %arg1[%c0, %c0_0, %c0_1] : memref<1x4x192xf32, #tpu.memory_space<vmem>>, vector<1x4x192xf32>
    %1 = vector.shape_cast %0 : vector<1x4x192xf32> to vector<4x192xf32>
    %c0_2 = arith.constant 0 : index
    %c0_3 = arith.constant 0 : index
    %2 = vector.load %arg4[%c0_2, %c0_3] : memref<192x32xbf16, #tpu.memory_space<vmem>>, vector<192x32xbf16>
    %3 = arith.truncf %1 : vector<4x192xf32> to vector<4x192xbf16>
    %cst = arith.constant dense<0.000000e+00> : vector<4x32xf32>
    %4 = tpu.matmul %3, %2, %cst {dimension_numbers = #tpu.dot_dimension_numbers<[1], [0], [0], [1], [0, 0, 1, 1], [], []>} : vector<4x192xbf16>, vector<192x32xbf16>, vector<4x32xf32> -> vector<4x32xf32>
    %cst_4 = arith.constant 0.000000e+00 : f32
    %5 = vector.broadcast %cst_4 : f32 to vector<1x32xf32>
    %cst_5 = arith.constant 0.000000e+00 : f32
    %6 = vector.broadcast %cst_5 : f32 to vector<3x32xf32>
    %7 = tpu.concatenate %5, %4, %6 in 0 : vector<1x32xf32>, vector<4x32xf32>, vector<3x32xf32> -> vector<8x32xf32>
    %c0_6 = arith.constant 0 : index
    %c0_7 = arith.constant 0 : index
    %8 = vector.load %arg5[%c0_6, %c0_7] : memref<8x32xf32, #tpu.memory_space<vmem>>, vector<8x32xf32>
    %9 = arith.addf %7, %8 : vector<8x32xf32>
    %10 = tpu.iota {dimensions = array<i32: 1>} : vector<8x8xi32>
    %c5_i32 = arith.constant 5 : i32
    %11 = vector.broadcast %c5_i32 : i32 to vector<8x8xi32>
    %12 = arith.cmpi slt, %10, %11 : vector<8x8xi32>
    %cst_8 = arith.constant 0.000000e+00 : f32
    %cst_9 = arith.constant -1.000000e+09 : f32
    %13 = vector.broadcast %cst_8 : f32 to vector<8x8xf32>
    %14 = vector.broadcast %cst_9 : f32 to vector<8x8xf32>
    %15 = arith.select %12, %13, %14 : vector<8x8xi1>, vector<8x8xf32>
    %c0_10 = arith.constant 0 : index
    %c0_11 = arith.constant 0 : index
    %c0_12 = arith.constant 0 : index
    %c0_13 = arith.constant 0 : index
    %16 = vector.load %arg6[%c0_10, %c0_11, %c0_12, %c0_13] : memref<2x4x32x32xbf16, #tpu.memory_space<vmem>>, vector<1x4x32x32xbf16>
    %17 = vector.shape_cast %16 : vector<1x4x32x32xbf16> to vector<4x32x32xbf16>
    %c0_14 = arith.constant 0 : index
    %c0_15 = arith.constant 0 : index
    %c0_16 = arith.constant 0 : index
    %c0_17 = arith.constant 0 : index
    %18 = vector.load %arg7[%c0_14, %c0_15, %c0_16, %c0_17] : memref<2x9x1x32xf32, #tpu.memory_space<vmem>>, vector<1x9x1x32xf32>
    %19 = vector.shape_cast %18 : vector<1x9x1x32xf32> to vector<9x1x32xf32>
    %20 = vector.extract_strided_slice %19 {offsets = [0, 0, 0], sizes = [1, 1, 32], strides = [1, 1, 1]} : vector<9x1x32xf32> to vector<1x1x32xf32>
    %21 = vector.shape_cast %20 : vector<1x1x32xf32> to vector<1x32xf32>
    %22 = vector.extract_strided_slice %19 {offsets = [1, 0, 0], sizes = [1, 1, 32], strides = [1, 1, 1]} : vector<9x1x32xf32> to vector<1x1x32xf32>
    %23 = vector.shape_cast %22 : vector<1x1x32xf32> to vector<1x32xf32>
    %cst_18 = arith.constant dense<0.000000e+00> : vector<8xf32>
    %24 = vector.multi_reduction <add>, %9, %cst_18 [1] : vector<8x32xf32> to vector<8xf32>
    %25 = vector.shape_cast %24 : vector<8xf32> to vector<8x1xf32>
    %cst_19 = arith.constant 3.200000e+01 : f32
    %26 = vector.broadcast %cst_19 : f32 to vector<8x1xf32>
    %27 = arith.divf %25, %26 : vector<8x1xf32>
    %28 = vector.broadcast %27 : vector<8x1xf32> to vector<8x32xf32>
    %29 = arith.subf %9, %28 : vector<8x32xf32>
    %30 = arith.mulf %29, %29 : vector<8x32xf32>
    %cst_20 = arith.constant dense<0.000000e+00> : vector<8xf32>
    %31 = vector.multi_reduction <add>, %30, %cst_20 [1] : vector<8x32xf32> to vector<8xf32>
    %32 = vector.shape_cast %31 : vector<8xf32> to vector<8x1xf32>
    %cst_21 = arith.constant 3.200000e+01 : f32
    %33 = vector.broadcast %cst_21 : f32 to vector<8x1xf32>
    %34 = arith.divf %32, %33 : vector<8x1xf32>
    %35 = vector.broadcast %27 : vector<8x1xf32> to vector<8x32xf32>
    %36 = arith.subf %9, %35 : vector<8x32xf32>
    %cst_22 = arith.constant 9.99999996E-13 : f32
    %37 = vector.broadcast %cst_22 : f32 to vector<8x1xf32>
    %38 = arith.addf %34, %37 : vector<8x1xf32>
    %39 = math.rsqrt %38 : vector<8x1xf32>
    %40 = vector.broadcast %39 : vector<8x1xf32> to vector<8x32xf32>
    %41 = arith.mulf %36, %40 : vector<8x32xf32>
    %42 = vector.broadcast %21 : vector<1x32xf32> to vector<8x32xf32>
    %43 = arith.mulf %41, %42 : vector<8x32xf32>
    %44 = vector.broadcast %23 : vector<1x32xf32> to vector<8x32xf32>
    %45 = arith.addf %43, %44 : vector<8x32xf32>
    %46 = vector.extract_strided_slice %17 {offsets = [0, 0, 0], sizes = [1, 32, 32], strides = [1, 1, 1]} : vector<4x32x32xbf16> to vector<1x32x32xbf16>
    %47 = vector.shape_cast %46 : vector<1x32x32xbf16> to vector<32x32xbf16>
    %48 = arith.truncf %45 : vector<8x32xf32> to vector<8x32xbf16>
    %cst_23 = arith.constant dense<0.000000e+00> : vector<8x32xf32>
    %49 = tpu.matmul %48, %47, %cst_23 {dimension_numbers = #tpu.dot_dimension_numbers<[1], [0], [0], [1], [0, 0, 1, 1], [], []>} : vector<8x32xbf16>, vector<32x32xbf16>, vector<8x32xf32> -> vector<8x32xf32>
    %50 = vector.extract_strided_slice %19 {offsets = [2, 0, 0], sizes = [1, 1, 32], strides = [1, 1, 1]} : vector<9x1x32xf32> to vector<1x1x32xf32>
    %51 = vector.shape_cast %50 : vector<1x1x32xf32> to vector<1x32xf32>
    %52 = vector.broadcast %51 : vector<1x32xf32> to vector<8x32xf32>
    %53 = arith.addf %49, %52 : vector<8x32xf32>
    %54 = vector.extract_strided_slice %17 {offsets = [1, 0, 0], sizes = [1, 32, 32], strides = [1, 1, 1]} : vector<4x32x32xbf16> to vector<1x32x32xbf16>
    %55 = vector.shape_cast %54 : vector<1x32x32xbf16> to vector<32x32xbf16>
    %56 = arith.truncf %45 : vector<8x32xf32> to vector<8x32xbf16>
    %cst_24 = arith.constant dense<0.000000e+00> : vector<8x32xf32>
    %57 = tpu.matmul %56, %55, %cst_24 {dimension_numbers = #tpu.dot_dimension_numbers<[1], [0], [0], [1], [0, 0, 1, 1], [], []>} : vector<8x32xbf16>, vector<32x32xbf16>, vector<8x32xf32> -> vector<8x32xf32>
    %58 = vector.extract_strided_slice %19 {offsets = [3, 0, 0], sizes = [1, 1, 32], strides = [1, 1, 1]} : vector<9x1x32xf32> to vector<1x1x32xf32>
    %59 = vector.shape_cast %58 : vector<1x1x32xf32> to vector<1x32xf32>
    %60 = vector.broadcast %59 : vector<1x32xf32> to vector<8x32xf32>
    %61 = arith.addf %57, %60 : vector<8x32xf32>
    %62 = vector.extract_strided_slice %17 {offsets = [2, 0, 0], sizes = [1, 32, 32], strides = [1, 1, 1]} : vector<4x32x32xbf16> to vector<1x32x32xbf16>
    %63 = vector.shape_cast %62 : vector<1x32x32xbf16> to vector<32x32xbf16>
    %64 = arith.truncf %45 : vector<8x32xf32> to vector<8x32xbf16>
    %cst_25 = arith.constant dense<0.000000e+00> : vector<8x32xf32>
    %65 = tpu.matmul %64, %63, %cst_25 {dimension_numbers = #tpu.dot_dimension_numbers<[1], [0], [0], [1], [0, 0, 1, 1], [], []>} : vector<8x32xbf16>, vector<32x32xbf16>, vector<8x32xf32> -> vector<8x32xf32>
    %66 = vector.extract_strided_slice %19 {offsets = [4, 0, 0], sizes = [1, 1, 32], strides = [1, 1, 1]} : vector<9x1x32xf32> to vector<1x1x32xf32>
    %67 = vector.shape_cast %66 : vector<1x1x32xf32> to vector<1x32xf32>
    %68 = vector.broadcast %67 : vector<1x32xf32> to vector<8x32xf32>
    %69 = arith.addf %65, %68 : vector<8x32xf32>
    %70 = vector.extract_strided_slice %17 {offsets = [3, 0, 0], sizes = [1, 32, 32], strides = [1, 1, 1]} : vector<4x32x32xbf16> to vector<1x32x32xbf16>
    %71 = vector.shape_cast %70 : vector<1x32x32xbf16> to vector<32x32xbf16>
    %72 = vector.extract_strided_slice %19 {offsets = [5, 0, 0], sizes = [1, 1, 32], strides = [1, 1, 1]} : vector<9x1x32xf32> to vector<1x1x32xf32>
    %73 = vector.shape_cast %72 : vector<1x1x32xf32> to vector<1x32xf32>
    %cst_26 = arith.constant 0.000000e+00 : f32
    %74 = vector.broadcast %cst_26 : f32 to vector<8x32xf32>
    %75 = vector.extract_strided_slice %53 {offsets = [0, 0], sizes = [8, 8], strides = [1, 1]} : vector<8x32xf32> to vector<8x8xf32>
    %76 = arith.truncf %75 : vector<8x8xf32> to vector<8x8xbf16>
    %77 = vector.extract_strided_slice %61 {offsets = [0, 0], sizes = [8, 8], strides = [1, 1]} : vector<8x32xf32> to vector<8x8xf32>
    %78 = arith.truncf %77 : vector<8x8xf32> to vector<8x8xbf16>
    %cst_27 = arith.constant dense<0.000000e+00> : vector<8x8xf32>
    %79 = tpu.matmul %76, %78, %cst_27 {dimension_numbers = #tpu.dot_dimension_numbers<[1], [1], [0], [0], [0, 0, 1, 0], [], []>} : vector<8x8xbf16>, vector<8x8xbf16>, vector<8x8xf32> -> vector<8x8xf32>
    %cst_28 = arith.constant 0.353553385 : f32
    %80 = vector.broadcast %cst_28 : f32 to vector<8x8xf32>
    %81 = arith.mulf %79, %80 : vector<8x8xf32>
    %82 = arith.addf %81, %15 : vector<8x8xf32>
    %cst_29 = arith.constant dense<0xFF800000> : vector<8xf32>
    %83 = vector.multi_reduction <maximumf>, %82, %cst_29 [1] : vector<8x8xf32> to vector<8xf32>
    %84 = vector.shape_cast %83 : vector<8xf32> to vector<8x1xf32>
    %85 = vector.broadcast %84 : vector<8x1xf32> to vector<8x8xf32>
    %86 = arith.subf %82, %85 : vector<8x8xf32>
    %87 = math.exp %86 : vector<8x8xf32>
    %cst_30 = arith.constant dense<0.000000e+00> : vector<8xf32>
    %88 = vector.multi_reduction <add>, %87, %cst_30 [1] : vector<8x8xf32> to vector<8xf32>
    %89 = vector.shape_cast %88 : vector<8xf32> to vector<8x1xf32>
    %90 = tpu.reciprocal %89 {approx = true} : vector<8x1xf32> -> vector<8x1xf32>
    %91 = vector.broadcast %90 : vector<8x1xf32> to vector<8x8xf32>
    %92 = arith.mulf %87, %91 : vector<8x8xf32>
    %93 = arith.truncf %92 : vector<8x8xf32> to vector<8x8xbf16>
    %94 = vector.extract_strided_slice %69 {offsets = [0, 0], sizes = [8, 8], strides = [1, 1]} : vector<8x32xf32> to vector<8x8xf32>
    %95 = arith.truncf %94 : vector<8x8xf32> to vector<8x8xbf16>
    %cst_31 = arith.constant dense<0.000000e+00> : vector<8x8xf32>
    %96 = tpu.matmul %93, %95, %cst_31 {dimension_numbers = #tpu.dot_dimension_numbers<[1], [0], [0], [1], [0, 0, 1, 1], [], []>} : vector<8x8xbf16>, vector<8x8xbf16>, vector<8x8xf32> -> vector<8x8xf32>
    %97 = arith.truncf %96 : vector<8x8xf32> to vector<8x8xbf16>
    %98 = vector.extract_strided_slice %71 {offsets = [0, 0], sizes = [8, 32], strides = [1, 1]} : vector<32x32xbf16> to vector<8x32xbf16>
    %cst_32 = arith.constant dense<0.000000e+00> : vector<8x32xf32>
    %99 = tpu.matmul %97, %98, %cst_32 {dimension_numbers = #tpu.dot_dimension_numbers<[1], [0], [0], [1], [0, 0, 1, 1], [], []>} : vector<8x8xbf16>, vector<8x32xbf16>, vector<8x32xf32> -> vector<8x32xf32>
    %100 = arith.addf %74, %99 : vector<8x32xf32>
    %101 = vector.extract_strided_slice %53 {offsets = [0, 8], sizes = [8, 8], strides = [1, 1]} : vector<8x32xf32> to vector<8x8xf32>
    %102 = arith.truncf %101 : vector<8x8xf32> to vector<8x8xbf16>
    %103 = vector.extract_strided_slice %61 {offsets = [0, 8], sizes = [8, 8], strides = [1, 1]} : vector<8x32xf32> to vector<8x8xf32>
    %104 = arith.truncf %103 : vector<8x8xf32> to vector<8x8xbf16>
    %cst_33 = arith.constant dense<0.000000e+00> : vector<8x8xf32>
    %105 = tpu.matmul %102, %104, %cst_33 {dimension_numbers = #tpu.dot_dimension_numbers<[1], [1], [0], [0], [0, 0, 1, 0], [], []>} : vector<8x8xbf16>, vector<8x8xbf16>, vector<8x8xf32> -> vector<8x8xf32>
    %cst_34 = arith.constant 0.353553385 : f32
    %106 = vector.broadcast %cst_34 : f32 to vector<8x8xf32>
    %107 = arith.mulf %105, %106 : vector<8x8xf32>
    %108 = arith.addf %107, %15 : vector<8x8xf32>
    %cst_35 = arith.constant dense<0xFF800000> : vector<8xf32>
    %109 = vector.multi_reduction <maximumf>, %108, %cst_35 [1] : vector<8x8xf32> to vector<8xf32>
    %110 = vector.shape_cast %109 : vector<8xf32> to vector<8x1xf32>
    %111 = vector.broadcast %110 : vector<8x1xf32> to vector<8x8xf32>
    %112 = arith.subf %108, %111 : vector<8x8xf32>
    %113 = math.exp %112 : vector<8x8xf32>
    %cst_36 = arith.constant dense<0.000000e+00> : vector<8xf32>
    %114 = vector.multi_reduction <add>, %113, %cst_36 [1] : vector<8x8xf32> to vector<8xf32>
    %115 = vector.shape_cast %114 : vector<8xf32> to vector<8x1xf32>
    %116 = tpu.reciprocal %115 {approx = true} : vector<8x1xf32> -> vector<8x1xf32>
    %117 = vector.broadcast %116 : vector<8x1xf32> to vector<8x8xf32>
    %118 = arith.mulf %113, %117 : vector<8x8xf32>
    %119 = arith.truncf %118 : vector<8x8xf32> to vector<8x8xbf16>
    %120 = vector.extract_strided_slice %69 {offsets = [0, 8], sizes = [8, 8], strides = [1, 1]} : vector<8x32xf32> to vector<8x8xf32>
    %121 = arith.truncf %120 : vector<8x8xf32> to vector<8x8xbf16>
    %cst_37 = arith.constant dense<0.000000e+00> : vector<8x8xf32>
    %122 = tpu.matmul %119, %121, %cst_37 {dimension_numbers = #tpu.dot_dimension_numbers<[1], [0], [0], [1], [0, 0, 1, 1], [], []>} : vector<8x8xbf16>, vector<8x8xbf16>, vector<8x8xf32> -> vector<8x8xf32>
    %123 = arith.truncf %122 : vector<8x8xf32> to vector<8x8xbf16>
    %124 = vector.extract_strided_slice %71 {offsets = [8, 0], sizes = [8, 32], strides = [1, 1]} : vector<32x32xbf16> to vector<8x32xbf16>
    %cst_38 = arith.constant dense<0.000000e+00> : vector<8x32xf32>
    %125 = tpu.matmul %123, %124, %cst_38 {dimension_numbers = #tpu.dot_dimension_numbers<[1], [0], [0], [1], [0, 0, 1, 1], [], []>} : vector<8x8xbf16>, vector<8x32xbf16>, vector<8x32xf32> -> vector<8x32xf32>
    %126 = arith.addf %100, %125 : vector<8x32xf32>
    %127 = vector.extract_strided_slice %53 {offsets = [0, 16], sizes = [8, 8], strides = [1, 1]} : vector<8x32xf32> to vector<8x8xf32>
    %128 = arith.truncf %127 : vector<8x8xf32> to vector<8x8xbf16>
    %129 = vector.extract_strided_slice %61 {offsets = [0, 16], sizes = [8, 8], strides = [1, 1]} : vector<8x32xf32> to vector<8x8xf32>
    %130 = arith.truncf %129 : vector<8x8xf32> to vector<8x8xbf16>
    %cst_39 = arith.constant dense<0.000000e+00> : vector<8x8xf32>
    %131 = tpu.matmul %128, %130, %cst_39 {dimension_numbers = #tpu.dot_dimension_numbers<[1], [1], [0], [0], [0, 0, 1, 0], [], []>} : vector<8x8xbf16>, vector<8x8xbf16>, vector<8x8xf32> -> vector<8x8xf32>
    %cst_40 = arith.constant 0.353553385 : f32
    %132 = vector.broadcast %cst_40 : f32 to vector<8x8xf32>
    %133 = arith.mulf %131, %132 : vector<8x8xf32>
    %134 = arith.addf %133, %15 : vector<8x8xf32>
    %cst_41 = arith.constant dense<0xFF800000> : vector<8xf32>
    %135 = vector.multi_reduction <maximumf>, %134, %cst_41 [1] : vector<8x8xf32> to vector<8xf32>
    %136 = vector.shape_cast %135 : vector<8xf32> to vector<8x1xf32>
    %137 = vector.broadcast %136 : vector<8x1xf32> to vector<8x8xf32>
    %138 = arith.subf %134, %137 : vector<8x8xf32>
    %139 = math.exp %138 : vector<8x8xf32>
    %cst_42 = arith.constant dense<0.000000e+00> : vector<8xf32>
    %140 = vector.multi_reduction <add>, %139, %cst_42 [1] : vector<8x8xf32> to vector<8xf32>
    %141 = vector.shape_cast %140 : vector<8xf32> to vector<8x1xf32>
    %142 = tpu.reciprocal %141 {approx = true} : vector<8x1xf32> -> vector<8x1xf32>
    %143 = vector.broadcast %142 : vector<8x1xf32> to vector<8x8xf32>
    %144 = arith.mulf %139, %143 : vector<8x8xf32>
    %145 = arith.truncf %144 : vector<8x8xf32> to vector<8x8xbf16>
    %146 = vector.extract_strided_slice %69 {offsets = [0, 16], sizes = [8, 8], strides = [1, 1]} : vector<8x32xf32> to vector<8x8xf32>
    %147 = arith.truncf %146 : vector<8x8xf32> to vector<8x8xbf16>
    %cst_43 = arith.constant dense<0.000000e+00> : vector<8x8xf32>
    %148 = tpu.matmul %145, %147, %cst_43 {dimension_numbers = #tpu.dot_dimension_numbers<[1], [0], [0], [1], [0, 0, 1, 1], [], []>} : vector<8x8xbf16>, vector<8x8xbf16>, vector<8x8xf32> -> vector<8x8xf32>
    %149 = arith.truncf %148 : vector<8x8xf32> to vector<8x8xbf16>
    %150 = vector.extract_strided_slice %71 {offsets = [16, 0], sizes = [8, 32], strides = [1, 1]} : vector<32x32xbf16> to vector<8x32xbf16>
    %cst_44 = arith.constant dense<0.000000e+00> : vector<8x32xf32>
    %151 = tpu.matmul %149, %150, %cst_44 {dimension_numbers = #tpu.dot_dimension_numbers<[1], [0], [0], [1], [0, 0, 1, 1], [], []>} : vector<8x8xbf16>, vector<8x32xbf16>, vector<8x32xf32> -> vector<8x32xf32>
    %152 = arith.addf %126, %151 : vector<8x32xf32>
    %153 = vector.extract_strided_slice %53 {offsets = [0, 24], sizes = [8, 8], strides = [1, 1]} : vector<8x32xf32> to vector<8x8xf32>
    %154 = arith.truncf %153 : vector<8x8xf32> to vector<8x8xbf16>
    %155 = vector.extract_strided_slice %61 {offsets = [0, 24], sizes = [8, 8], strides = [1, 1]} : vector<8x32xf32> to vector<8x8xf32>
    %156 = arith.truncf %155 : vector<8x8xf32> to vector<8x8xbf16>
    %cst_45 = arith.constant dense<0.000000e+00> : vector<8x8xf32>
    %157 = tpu.matmul %154, %156, %cst_45 {dimension_numbers = #tpu.dot_dimension_numbers<[1], [1], [0], [0], [0, 0, 1, 0], [], []>} : vector<8x8xbf16>, vector<8x8xbf16>, vector<8x8xf32> -> vector<8x8xf32>
    %cst_46 = arith.constant 0.353553385 : f32
    %158 = vector.broadcast %cst_46 : f32 to vector<8x8xf32>
    %159 = arith.mulf %157, %158 : vector<8x8xf32>
    %160 = arith.addf %159, %15 : vector<8x8xf32>
    %cst_47 = arith.constant dense<0xFF800000> : vector<8xf32>
    %161 = vector.multi_reduction <maximumf>, %160, %cst_47 [1] : vector<8x8xf32> to vector<8xf32>
    %162 = vector.shape_cast %161 : vector<8xf32> to vector<8x1xf32>
    %163 = vector.broadcast %162 : vector<8x1xf32> to vector<8x8xf32>
    %164 = arith.subf %160, %163 : vector<8x8xf32>
    %165 = math.exp %164 : vector<8x8xf32>
    %cst_48 = arith.constant dense<0.000000e+00> : vector<8xf32>
    %166 = vector.multi_reduction <add>, %165, %cst_48 [1] : vector<8x8xf32> to vector<8xf32>
    %167 = vector.shape_cast %166 : vector<8xf32> to vector<8x1xf32>
    %168 = tpu.reciprocal %167 {approx = true} : vector<8x1xf32> -> vector<8x1xf32>
    %169 = vector.broadcast %168 : vector<8x1xf32> to vector<8x8xf32>
    %170 = arith.mulf %165, %169 : vector<8x8xf32>
    %171 = arith.truncf %170 : vector<8x8xf32> to vector<8x8xbf16>
    %172 = vector.extract_strided_slice %69 {offsets = [0, 24], sizes = [8, 8], strides = [1, 1]} : vector<8x32xf32> to vector<8x8xf32>
    %173 = arith.truncf %172 : vector<8x8xf32> to vector<8x8xbf16>
    %cst_49 = arith.constant dense<0.000000e+00> : vector<8x8xf32>
    %174 = tpu.matmul %171, %173, %cst_49 {dimension_numbers = #tpu.dot_dimension_numbers<[1], [0], [0], [1], [0, 0, 1, 1], [], []>} : vector<8x8xbf16>, vector<8x8xbf16>, vector<8x8xf32> -> vector<8x8xf32>
    %175 = arith.truncf %174 : vector<8x8xf32> to vector<8x8xbf16>
    %176 = vector.extract_strided_slice %71 {offsets = [24, 0], sizes = [8, 32], strides = [1, 1]} : vector<32x32xbf16> to vector<8x32xbf16>
    %cst_50 = arith.constant dense<0.000000e+00> : vector<8x32xf32>
    %177 = tpu.matmul %175, %176, %cst_50 {dimension_numbers = #tpu.dot_dimension_numbers<[1], [0], [0], [1], [0, 0, 1, 1], [], []>} : vector<8x8xbf16>, vector<8x32xbf16>, vector<8x32xf32> -> vector<8x32xf32>
    %178 = arith.addf %152, %177 : vector<8x32xf32>
    %179 = vector.broadcast %73 : vector<1x32xf32> to vector<8x32xf32>
    %180 = arith.addf %178, %179 : vector<8x32xf32>
    %181 = arith.addf %9, %180 : vector<8x32xf32>
    %182 = vector.extract_strided_slice %19 {offsets = [6, 0, 0], sizes = [1, 1, 32], strides = [1, 1, 1]} : vector<9x1x32xf32> to vector<1x1x32xf32>
    %183 = vector.shape_cast %182 : vector<1x1x32xf32> to vector<1x32xf32>
    %184 = vector.extract_strided_slice %19 {offsets = [7, 0, 0], sizes = [1, 1, 32], strides = [1, 1, 1]} : vector<9x1x32xf32> to vector<1x1x32xf32>
    %185 = vector.shape_cast %184 : vector<1x1x32xf32> to vector<1x32xf32>
    %cst_51 = arith.constant dense<0.000000e+00> : vector<8xf32>
    %186 = vector.multi_reduction <add>, %181, %cst_51 [1] : vector<8x32xf32> to vector<8xf32>
    %187 = vector.shape_cast %186 : vector<8xf32> to vector<8x1xf32>
    %cst_52 = arith.constant 3.200000e+01 : f32
    %188 = vector.broadcast %cst_52 : f32 to vector<8x1xf32>
    %189 = arith.divf %187, %188 : vector<8x1xf32>
    %190 = vector.broadcast %189 : vector<8x1xf32> to vector<8x32xf32>
    %191 = arith.subf %181, %190 : vector<8x32xf32>
    %192 = arith.mulf %191, %191 : vector<8x32xf32>
    %cst_53 = arith.constant dense<0.000000e+00> : vector<8xf32>
    %193 = vector.multi_reduction <add>, %192, %cst_53 [1] : vector<8x32xf32> to vector<8xf32>
    %194 = vector.shape_cast %193 : vector<8xf32> to vector<8x1xf32>
    %cst_54 = arith.constant 3.200000e+01 : f32
    %195 = vector.broadcast %cst_54 : f32 to vector<8x1xf32>
    %196 = arith.divf %194, %195 : vector<8x1xf32>
    %197 = vector.broadcast %189 : vector<8x1xf32> to vector<8x32xf32>
    %198 = arith.subf %181, %197 : vector<8x32xf32>
    %cst_55 = arith.constant 9.99999996E-13 : f32
    %199 = vector.broadcast %cst_55 : f32 to vector<8x1xf32>
    %200 = arith.addf %196, %199 : vector<8x1xf32>
    %201 = math.rsqrt %200 : vector<8x1xf32>
    %202 = vector.broadcast %201 : vector<8x1xf32> to vector<8x32xf32>
    %203 = arith.mulf %198, %202 : vector<8x32xf32>
    %204 = vector.broadcast %183 : vector<1x32xf32> to vector<8x32xf32>
    %205 = arith.mulf %203, %204 : vector<8x32xf32>
    %206 = vector.broadcast %185 : vector<1x32xf32> to vector<8x32xf32>
    %207 = arith.addf %205, %206 : vector<8x32xf32>
    %c0_56 = arith.constant 0 : index
    %c0_57 = arith.constant 0 : index
    %c0_58 = arith.constant 0 : index
    %208 = vector.load %arg8[%c0_56, %c0_57, %c0_58] : memref<2x32x64xbf16, #tpu.memory_space<vmem>>, vector<1x32x64xbf16>
    %209 = vector.shape_cast %208 : vector<1x32x64xbf16> to vector<32x64xbf16>
    %210 = arith.truncf %207 : vector<8x32xf32> to vector<8x32xbf16>
    %cst_59 = arith.constant dense<0.000000e+00> : vector<8x64xf32>
    %211 = tpu.matmul %210, %209, %cst_59 {dimension_numbers = #tpu.dot_dimension_numbers<[1], [0], [0], [1], [0, 0, 1, 1], [], []>} : vector<8x32xbf16>, vector<32x64xbf16>, vector<8x64xf32> -> vector<8x64xf32>
    %c0_60 = arith.constant 0 : index
    %c0_61 = arith.constant 0 : index
    %c0_62 = arith.constant 0 : index
    %212 = vector.load %arg9[%c0_60, %c0_61, %c0_62] : memref<2x1x64xf32, #tpu.memory_space<vmem>>, vector<1x1x64xf32>
    %213 = vector.shape_cast %212 : vector<1x1x64xf32> to vector<1x64xf32>
    %214 = vector.broadcast %213 : vector<1x64xf32> to vector<8x64xf32>
    %215 = arith.addf %211, %214 : vector<8x64xf32>
    %cst_63 = arith.constant 5.000000e-01 : f32
    %216 = vector.broadcast %cst_63 : f32 to vector<8x64xf32>
    %217 = arith.mulf %216, %215 : vector<8x64xf32>
    %cst_64 = arith.constant 4.471500e-02 : f32
    %218 = vector.broadcast %cst_64 : f32 to vector<8x64xf32>
    %219 = arith.mulf %218, %215 : vector<8x64xf32>
    %220 = arith.mulf %219, %215 : vector<8x64xf32>
    %221 = arith.mulf %220, %215 : vector<8x64xf32>
    %222 = arith.addf %215, %221 : vector<8x64xf32>
    %cst_65 = arith.constant 0.797884583 : f32
    %223 = vector.broadcast %cst_65 : f32 to vector<8x64xf32>
    %224 = arith.mulf %223, %222 : vector<8x64xf32>
    %225 = math.tanh %224 : vector<8x64xf32>
    %cst_66 = arith.constant 1.000000e+00 : f32
    %226 = vector.broadcast %cst_66 : f32 to vector<8x64xf32>
    %227 = arith.addf %226, %225 : vector<8x64xf32>
    %228 = arith.mulf %217, %227 : vector<8x64xf32>
    %c0_67 = arith.constant 0 : index
    %c0_68 = arith.constant 0 : index
    %c0_69 = arith.constant 0 : index
    %229 = vector.load %arg10[%c0_67, %c0_68, %c0_69] : memref<2x64x32xbf16, #tpu.memory_space<vmem>>, vector<1x64x32xbf16>
    %230 = vector.shape_cast %229 : vector<1x64x32xbf16> to vector<64x32xbf16>
    %231 = arith.truncf %228 : vector<8x64xf32> to vector<8x64xbf16>
    %cst_70 = arith.constant dense<0.000000e+00> : vector<8x32xf32>
    %232 = tpu.matmul %231, %230, %cst_70 {dimension_numbers = #tpu.dot_dimension_numbers<[1], [0], [0], [1], [0, 0, 1, 1], [], []>} : vector<8x64xbf16>, vector<64x32xbf16>, vector<8x32xf32> -> vector<8x32xf32>
    %233 = arith.addf %181, %232 : vector<8x32xf32>
    %234 = vector.extract_strided_slice %19 {offsets = [8, 0, 0], sizes = [1, 1, 32], strides = [1, 1, 1]} : vector<9x1x32xf32> to vector<1x1x32xf32>
    %235 = vector.shape_cast %234 : vector<1x1x32xf32> to vector<1x32xf32>
    %236 = vector.broadcast %235 : vector<1x32xf32> to vector<8x32xf32>
    %237 = arith.addf %233, %236 : vector<8x32xf32>
    %c1 = arith.constant 1 : index
    %c0_71 = arith.constant 0 : index
    %c0_72 = arith.constant 0 : index
    %c0_73 = arith.constant 0 : index
    %238 = vector.load %arg6[%c1, %c0_71, %c0_72, %c0_73] : memref<2x4x32x32xbf16, #tpu.memory_space<vmem>>, vector<1x4x32x32xbf16>
    %239 = vector.shape_cast %238 : vector<1x4x32x32xbf16> to vector<4x32x32xbf16>
    %c1_74 = arith.constant 1 : index
    %c0_75 = arith.constant 0 : index
    %c0_76 = arith.constant 0 : index
    %c0_77 = arith.constant 0 : index
    %240 = vector.load %arg7[%c1_74, %c0_75, %c0_76, %c0_77] : memref<2x9x1x32xf32, #tpu.memory_space<vmem>>, vector<1x9x1x32xf32>
    %241 = vector.shape_cast %240 : vector<1x9x1x32xf32> to vector<9x1x32xf32>
    %242 = vector.extract_strided_slice %241 {offsets = [0, 0, 0], sizes = [1, 1, 32], strides = [1, 1, 1]} : vector<9x1x32xf32> to vector<1x1x32xf32>
    %243 = vector.shape_cast %242 : vector<1x1x32xf32> to vector<1x32xf32>
    %244 = vector.extract_strided_slice %241 {offsets = [1, 0, 0], sizes = [1, 1, 32], strides = [1, 1, 1]} : vector<9x1x32xf32> to vector<1x1x32xf32>
    %245 = vector.shape_cast %244 : vector<1x1x32xf32> to vector<1x32xf32>
    %cst_78 = arith.constant dense<0.000000e+00> : vector<8xf32>
    %246 = vector.multi_reduction <add>, %237, %cst_78 [1] : vector<8x32xf32> to vector<8xf32>
    %247 = vector.shape_cast %246 : vector<8xf32> to vector<8x1xf32>
    %cst_79 = arith.constant 3.200000e+01 : f32
    %248 = vector.broadcast %cst_79 : f32 to vector<8x1xf32>
    %249 = arith.divf %247, %248 : vector<8x1xf32>
    %250 = vector.broadcast %249 : vector<8x1xf32> to vector<8x32xf32>
    %251 = arith.subf %237, %250 : vector<8x32xf32>
    %252 = arith.mulf %251, %251 : vector<8x32xf32>
    %cst_80 = arith.constant dense<0.000000e+00> : vector<8xf32>
    %253 = vector.multi_reduction <add>, %252, %cst_80 [1] : vector<8x32xf32> to vector<8xf32>
    %254 = vector.shape_cast %253 : vector<8xf32> to vector<8x1xf32>
    %cst_81 = arith.constant 3.200000e+01 : f32
    %255 = vector.broadcast %cst_81 : f32 to vector<8x1xf32>
    %256 = arith.divf %254, %255 : vector<8x1xf32>
    %257 = vector.broadcast %249 : vector<8x1xf32> to vector<8x32xf32>
    %258 = arith.subf %237, %257 : vector<8x32xf32>
    %cst_82 = arith.constant 9.99999996E-13 : f32
    %259 = vector.broadcast %cst_82 : f32 to vector<8x1xf32>
    %260 = arith.addf %256, %259 : vector<8x1xf32>
    %261 = math.rsqrt %260 : vector<8x1xf32>
    %262 = vector.broadcast %261 : vector<8x1xf32> to vector<8x32xf32>
    %263 = arith.mulf %258, %262 : vector<8x32xf32>
    %264 = vector.broadcast %243 : vector<1x32xf32> to vector<8x32xf32>
    %265 = arith.mulf %263, %264 : vector<8x32xf32>
    %266 = vector.broadcast %245 : vector<1x32xf32> to vector<8x32xf32>
    %267 = arith.addf %265, %266 : vector<8x32xf32>
    %268 = vector.extract_strided_slice %239 {offsets = [0, 0, 0], sizes = [1, 32, 32], strides = [1, 1, 1]} : vector<4x32x32xbf16> to vector<1x32x32xbf16>
    %269 = vector.shape_cast %268 : vector<1x32x32xbf16> to vector<32x32xbf16>
    %270 = arith.truncf %267 : vector<8x32xf32> to vector<8x32xbf16>
    %cst_83 = arith.constant dense<0.000000e+00> : vector<8x32xf32>
    %271 = tpu.matmul %270, %269, %cst_83 {dimension_numbers = #tpu.dot_dimension_numbers<[1], [0], [0], [1], [0, 0, 1, 1], [], []>} : vector<8x32xbf16>, vector<32x32xbf16>, vector<8x32xf32> -> vector<8x32xf32>
    %272 = vector.extract_strided_slice %241 {offsets = [2, 0, 0], sizes = [1, 1, 32], strides = [1, 1, 1]} : vector<9x1x32xf32> to vector<1x1x32xf32>
    %273 = vector.shape_cast %272 : vector<1x1x32xf32> to vector<1x32xf32>
    %274 = vector.broadcast %273 : vector<1x32xf32> to vector<8x32xf32>
    %275 = arith.addf %271, %274 : vector<8x32xf32>
    %276 = vector.extract_strided_slice %239 {offsets = [1, 0, 0], sizes = [1, 32, 32], strides = [1, 1, 1]} : vector<4x32x32xbf16> to vector<1x32x32xbf16>
    %277 = vector.shape_cast %276 : vector<1x32x32xbf16> to vector<32x32xbf16>
    %278 = arith.truncf %267 : vector<8x32xf32> to vector<8x32xbf16>
    %cst_84 = arith.constant dense<0.000000e+00> : vector<8x32xf32>
    %279 = tpu.matmul %278, %277, %cst_84 {dimension_numbers = #tpu.dot_dimension_numbers<[1], [0], [0], [1], [0, 0, 1, 1], [], []>} : vector<8x32xbf16>, vector<32x32xbf16>, vector<8x32xf32> -> vector<8x32xf32>
    %280 = vector.extract_strided_slice %241 {offsets = [3, 0, 0], sizes = [1, 1, 32], strides = [1, 1, 1]} : vector<9x1x32xf32> to vector<1x1x32xf32>
    %281 = vector.shape_cast %280 : vector<1x1x32xf32> to vector<1x32xf32>
    %282 = vector.broadcast %281 : vector<1x32xf32> to vector<8x32xf32>
    %283 = arith.addf %279, %282 : vector<8x32xf32>
    %284 = vector.extract_strided_slice %239 {offsets = [2, 0, 0], sizes = [1, 32, 32], strides = [1, 1, 1]} : vector<4x32x32xbf16> to vector<1x32x32xbf16>
    %285 = vector.shape_cast %284 : vector<1x32x32xbf16> to vector<32x32xbf16>
    %286 = arith.truncf %267 : vector<8x32xf32> to vector<8x32xbf16>
    %cst_85 = arith.constant dense<0.000000e+00> : vector<8x32xf32>
    %287 = tpu.matmul %286, %285, %cst_85 {dimension_numbers = #tpu.dot_dimension_numbers<[1], [0], [0], [1], [0, 0, 1, 1], [], []>} : vector<8x32xbf16>, vector<32x32xbf16>, vector<8x32xf32> -> vector<8x32xf32>
    %288 = vector.extract_strided_slice %241 {offsets = [4, 0, 0], sizes = [1, 1, 32], strides = [1, 1, 1]} : vector<9x1x32xf32> to vector<1x1x32xf32>
    %289 = vector.shape_cast %288 : vector<1x1x32xf32> to vector<1x32xf32>
    %290 = vector.broadcast %289 : vector<1x32xf32> to vector<8x32xf32>
    %291 = arith.addf %287, %290 : vector<8x32xf32>
    %292 = vector.extract_strided_slice %239 {offsets = [3, 0, 0], sizes = [1, 32, 32], strides = [1, 1, 1]} : vector<4x32x32xbf16> to vector<1x32x32xbf16>
    %293 = vector.shape_cast %292 : vector<1x32x32xbf16> to vector<32x32xbf16>
    %294 = vector.extract_strided_slice %241 {offsets = [5, 0, 0], sizes = [1, 1, 32], strides = [1, 1, 1]} : vector<9x1x32xf32> to vector<1x1x32xf32>
    %295 = vector.shape_cast %294 : vector<1x1x32xf32> to vector<1x32xf32>
    %cst_86 = arith.constant 0.000000e+00 : f32
    %296 = vector.broadcast %cst_86 : f32 to vector<8x32xf32>
    %297 = vector.extract_strided_slice %275 {offsets = [0, 0], sizes = [8, 8], strides = [1, 1]} : vector<8x32xf32> to vector<8x8xf32>
    %298 = arith.truncf %297 : vector<8x8xf32> to vector<8x8xbf16>
    %299 = vector.extract_strided_slice %283 {offsets = [0, 0], sizes = [8, 8], strides = [1, 1]} : vector<8x32xf32> to vector<8x8xf32>
    %300 = arith.truncf %299 : vector<8x8xf32> to vector<8x8xbf16>
    %cst_87 = arith.constant dense<0.000000e+00> : vector<8x8xf32>
    %301 = tpu.matmul %298, %300, %cst_87 {dimension_numbers = #tpu.dot_dimension_numbers<[1], [1], [0], [0], [0, 0, 1, 0], [], []>} : vector<8x8xbf16>, vector<8x8xbf16>, vector<8x8xf32> -> vector<8x8xf32>
    %cst_88 = arith.constant 0.353553385 : f32
    %302 = vector.broadcast %cst_88 : f32 to vector<8x8xf32>
    %303 = arith.mulf %301, %302 : vector<8x8xf32>
    %304 = arith.addf %303, %15 : vector<8x8xf32>
    %cst_89 = arith.constant dense<0xFF800000> : vector<8xf32>
    %305 = vector.multi_reduction <maximumf>, %304, %cst_89 [1] : vector<8x8xf32> to vector<8xf32>
    %306 = vector.shape_cast %305 : vector<8xf32> to vector<8x1xf32>
    %307 = vector.broadcast %306 : vector<8x1xf32> to vector<8x8xf32>
    %308 = arith.subf %304, %307 : vector<8x8xf32>
    %309 = math.exp %308 : vector<8x8xf32>
    %cst_90 = arith.constant dense<0.000000e+00> : vector<8xf32>
    %310 = vector.multi_reduction <add>, %309, %cst_90 [1] : vector<8x8xf32> to vector<8xf32>
    %311 = vector.shape_cast %310 : vector<8xf32> to vector<8x1xf32>
    %312 = tpu.reciprocal %311 {approx = true} : vector<8x1xf32> -> vector<8x1xf32>
    %313 = vector.broadcast %312 : vector<8x1xf32> to vector<8x8xf32>
    %314 = arith.mulf %309, %313 : vector<8x8xf32>
    %315 = arith.truncf %314 : vector<8x8xf32> to vector<8x8xbf16>
    %316 = vector.extract_strided_slice %291 {offsets = [0, 0], sizes = [8, 8], strides = [1, 1]} : vector<8x32xf32> to vector<8x8xf32>
    %317 = arith.truncf %316 : vector<8x8xf32> to vector<8x8xbf16>
    %cst_91 = arith.constant dense<0.000000e+00> : vector<8x8xf32>
    %318 = tpu.matmul %315, %317, %cst_91 {dimension_numbers = #tpu.dot_dimension_numbers<[1], [0], [0], [1], [0, 0, 1, 1], [], []>} : vector<8x8xbf16>, vector<8x8xbf16>, vector<8x8xf32> -> vector<8x8xf32>
    %319 = arith.truncf %318 : vector<8x8xf32> to vector<8x8xbf16>
    %320 = vector.extract_strided_slice %293 {offsets = [0, 0], sizes = [8, 32], strides = [1, 1]} : vector<32x32xbf16> to vector<8x32xbf16>
    %cst_92 = arith.constant dense<0.000000e+00> : vector<8x32xf32>
    %321 = tpu.matmul %319, %320, %cst_92 {dimension_numbers = #tpu.dot_dimension_numbers<[1], [0], [0], [1], [0, 0, 1, 1], [], []>} : vector<8x8xbf16>, vector<8x32xbf16>, vector<8x32xf32> -> vector<8x32xf32>
    %322 = arith.addf %296, %321 : vector<8x32xf32>
    %323 = vector.extract_strided_slice %275 {offsets = [0, 8], sizes = [8, 8], strides = [1, 1]} : vector<8x32xf32> to vector<8x8xf32>
    %324 = arith.truncf %323 : vector<8x8xf32> to vector<8x8xbf16>
    %325 = vector.extract_strided_slice %283 {offsets = [0, 8], sizes = [8, 8], strides = [1, 1]} : vector<8x32xf32> to vector<8x8xf32>
    %326 = arith.truncf %325 : vector<8x8xf32> to vector<8x8xbf16>
    %cst_93 = arith.constant dense<0.000000e+00> : vector<8x8xf32>
    %327 = tpu.matmul %324, %326, %cst_93 {dimension_numbers = #tpu.dot_dimension_numbers<[1], [1], [0], [0], [0, 0, 1, 0], [], []>} : vector<8x8xbf16>, vector<8x8xbf16>, vector<8x8xf32> -> vector<8x8xf32>
    %cst_94 = arith.constant 0.353553385 : f32
    %328 = vector.broadcast %cst_94 : f32 to vector<8x8xf32>
    %329 = arith.mulf %327, %328 : vector<8x8xf32>
    %330 = arith.addf %329, %15 : vector<8x8xf32>
    %cst_95 = arith.constant dense<0xFF800000> : vector<8xf32>
    %331 = vector.multi_reduction <maximumf>, %330, %cst_95 [1] : vector<8x8xf32> to vector<8xf32>
    %332 = vector.shape_cast %331 : vector<8xf32> to vector<8x1xf32>
    %333 = vector.broadcast %332 : vector<8x1xf32> to vector<8x8xf32>
    %334 = arith.subf %330, %333 : vector<8x8xf32>
    %335 = math.exp %334 : vector<8x8xf32>
    %cst_96 = arith.constant dense<0.000000e+00> : vector<8xf32>
    %336 = vector.multi_reduction <add>, %335, %cst_96 [1] : vector<8x8xf32> to vector<8xf32>
    %337 = vector.shape_cast %336 : vector<8xf32> to vector<8x1xf32>
    %338 = tpu.reciprocal %337 {approx = true} : vector<8x1xf32> -> vector<8x1xf32>
    %339 = vector.broadcast %338 : vector<8x1xf32> to vector<8x8xf32>
    %340 = arith.mulf %335, %339 : vector<8x8xf32>
    %341 = arith.truncf %340 : vector<8x8xf32> to vector<8x8xbf16>
    %342 = vector.extract_strided_slice %291 {offsets = [0, 8], sizes = [8, 8], strides = [1, 1]} : vector<8x32xf32> to vector<8x8xf32>
    %343 = arith.truncf %342 : vector<8x8xf32> to vector<8x8xbf16>
    %cst_97 = arith.constant dense<0.000000e+00> : vector<8x8xf32>
    %344 = tpu.matmul %341, %343, %cst_97 {dimension_numbers = #tpu.dot_dimension_numbers<[1], [0], [0], [1], [0, 0, 1, 1], [], []>} : vector<8x8xbf16>, vector<8x8xbf16>, vector<8x8xf32> -> vector<8x8xf32>
    %345 = arith.truncf %344 : vector<8x8xf32> to vector<8x8xbf16>
    %346 = vector.extract_strided_slice %293 {offsets = [8, 0], sizes = [8, 32], strides = [1, 1]} : vector<32x32xbf16> to vector<8x32xbf16>
    %cst_98 = arith.constant dense<0.000000e+00> : vector<8x32xf32>
    %347 = tpu.matmul %345, %346, %cst_98 {dimension_numbers = #tpu.dot_dimension_numbers<[1], [0], [0], [1], [0, 0, 1, 1], [], []>} : vector<8x8xbf16>, vector<8x32xbf16>, vector<8x32xf32> -> vector<8x32xf32>
    %348 = arith.addf %322, %347 : vector<8x32xf32>
    %349 = vector.extract_strided_slice %275 {offsets = [0, 16], sizes = [8, 8], strides = [1, 1]} : vector<8x32xf32> to vector<8x8xf32>
    %350 = arith.truncf %349 : vector<8x8xf32> to vector<8x8xbf16>
    %351 = vector.extract_strided_slice %283 {offsets = [0, 16], sizes = [8, 8], strides = [1, 1]} : vector<8x32xf32> to vector<8x8xf32>
    %352 = arith.truncf %351 : vector<8x8xf32> to vector<8x8xbf16>
    %cst_99 = arith.constant dense<0.000000e+00> : vector<8x8xf32>
    %353 = tpu.matmul %350, %352, %cst_99 {dimension_numbers = #tpu.dot_dimension_numbers<[1], [1], [0], [0], [0, 0, 1, 0], [], []>} : vector<8x8xbf16>, vector<8x8xbf16>, vector<8x8xf32> -> vector<8x8xf32>
    %cst_100 = arith.constant 0.353553385 : f32
    %354 = vector.broadcast %cst_100 : f32 to vector<8x8xf32>
    %355 = arith.mulf %353, %354 : vector<8x8xf32>
    %356 = arith.addf %355, %15 : vector<8x8xf32>
    %cst_101 = arith.constant dense<0xFF800000> : vector<8xf32>
    %357 = vector.multi_reduction <maximumf>, %356, %cst_101 [1] : vector<8x8xf32> to vector<8xf32>
    %358 = vector.shape_cast %357 : vector<8xf32> to vector<8x1xf32>
    %359 = vector.broadcast %358 : vector<8x1xf32> to vector<8x8xf32>
    %360 = arith.subf %356, %359 : vector<8x8xf32>
    %361 = math.exp %360 : vector<8x8xf32>
    %cst_102 = arith.constant dense<0.000000e+00> : vector<8xf32>
    %362 = vector.multi_reduction <add>, %361, %cst_102 [1] : vector<8x8xf32> to vector<8xf32>
    %363 = vector.shape_cast %362 : vector<8xf32> to vector<8x1xf32>
    %364 = tpu.reciprocal %363 {approx = true} : vector<8x1xf32> -> vector<8x1xf32>
    %365 = vector.broadcast %364 : vector<8x1xf32> to vector<8x8xf32>
    %366 = arith.mulf %361, %365 : vector<8x8xf32>
    %367 = arith.truncf %366 : vector<8x8xf32> to vector<8x8xbf16>
    %368 = vector.extract_strided_slice %291 {offsets = [0, 16], sizes = [8, 8], strides = [1, 1]} : vector<8x32xf32> to vector<8x8xf32>
    %369 = arith.truncf %368 : vector<8x8xf32> to vector<8x8xbf16>
    %cst_103 = arith.constant dense<0.000000e+00> : vector<8x8xf32>
    %370 = tpu.matmul %367, %369, %cst_103 {dimension_numbers = #tpu.dot_dimension_numbers<[1], [0], [0], [1], [0, 0, 1, 1], [], []>} : vector<8x8xbf16>, vector<8x8xbf16>, vector<8x8xf32> -> vector<8x8xf32>
    %371 = arith.truncf %370 : vector<8x8xf32> to vector<8x8xbf16>
    %372 = vector.extract_strided_slice %293 {offsets = [16, 0], sizes = [8, 32], strides = [1, 1]} : vector<32x32xbf16> to vector<8x32xbf16>
    %cst_104 = arith.constant dense<0.000000e+00> : vector<8x32xf32>
    %373 = tpu.matmul %371, %372, %cst_104 {dimension_numbers = #tpu.dot_dimension_numbers<[1], [0], [0], [1], [0, 0, 1, 1], [], []>} : vector<8x8xbf16>, vector<8x32xbf16>, vector<8x32xf32> -> vector<8x32xf32>
    %374 = arith.addf %348, %373 : vector<8x32xf32>
    %375 = vector.extract_strided_slice %275 {offsets = [0, 24], sizes = [8, 8], strides = [1, 1]} : vector<8x32xf32> to vector<8x8xf32>
    %376 = arith.truncf %375 : vector<8x8xf32> to vector<8x8xbf16>
    %377 = vector.extract_strided_slice %283 {offsets = [0, 24], sizes = [8, 8], strides = [1, 1]} : vector<8x32xf32> to vector<8x8xf32>
    %378 = arith.truncf %377 : vector<8x8xf32> to vector<8x8xbf16>
    %cst_105 = arith.constant dense<0.000000e+00> : vector<8x8xf32>
    %379 = tpu.matmul %376, %378, %cst_105 {dimension_numbers = #tpu.dot_dimension_numbers<[1], [1], [0], [0], [0, 0, 1, 0], [], []>} : vector<8x8xbf16>, vector<8x8xbf16>, vector<8x8xf32> -> vector<8x8xf32>
    %cst_106 = arith.constant 0.353553385 : f32
    %380 = vector.broadcast %cst_106 : f32 to vector<8x8xf32>
    %381 = arith.mulf %379, %380 : vector<8x8xf32>
    %382 = arith.addf %381, %15 : vector<8x8xf32>
    %cst_107 = arith.constant dense<0xFF800000> : vector<8xf32>
    %383 = vector.multi_reduction <maximumf>, %382, %cst_107 [1] : vector<8x8xf32> to vector<8xf32>
    %384 = vector.shape_cast %383 : vector<8xf32> to vector<8x1xf32>
    %385 = vector.broadcast %384 : vector<8x1xf32> to vector<8x8xf32>
    %386 = arith.subf %382, %385 : vector<8x8xf32>
    %387 = math.exp %386 : vector<8x8xf32>
    %cst_108 = arith.constant dense<0.000000e+00> : vector<8xf32>
    %388 = vector.multi_reduction <add>, %387, %cst_108 [1] : vector<8x8xf32> to vector<8xf32>
    %389 = vector.shape_cast %388 : vector<8xf32> to vector<8x1xf32>
    %390 = tpu.reciprocal %389 {approx = true} : vector<8x1xf32> -> vector<8x1xf32>
    %391 = vector.broadcast %390 : vector<8x1xf32> to vector<8x8xf32>
    %392 = arith.mulf %387, %391 : vector<8x8xf32>
    %393 = arith.truncf %392 : vector<8x8xf32> to vector<8x8xbf16>
    %394 = vector.extract_strided_slice %291 {offsets = [0, 24], sizes = [8, 8], strides = [1, 1]} : vector<8x32xf32> to vector<8x8xf32>
    %395 = arith.truncf %394 : vector<8x8xf32> to vector<8x8xbf16>
    %cst_109 = arith.constant dense<0.000000e+00> : vector<8x8xf32>
    %396 = tpu.matmul %393, %395, %cst_109 {dimension_numbers = #tpu.dot_dimension_numbers<[1], [0], [0], [1], [0, 0, 1, 1], [], []>} : vector<8x8xbf16>, vector<8x8xbf16>, vector<8x8xf32> -> vector<8x8xf32>
    %397 = arith.truncf %396 : vector<8x8xf32> to vector<8x8xbf16>
    %398 = vector.extract_strided_slice %293 {offsets = [24, 0], sizes = [8, 32], strides = [1, 1]} : vector<32x32xbf16> to vector<8x32xbf16>
    %cst_110 = arith.constant dense<0.000000e+00> : vector<8x32xf32>
    %399 = tpu.matmul %397, %398, %cst_110 {dimension_numbers = #tpu.dot_dimension_numbers<[1], [0], [0], [1], [0, 0, 1, 1], [], []>} : vector<8x8xbf16>, vector<8x32xbf16>, vector<8x32xf32> -> vector<8x32xf32>
    %400 = arith.addf %374, %399 : vector<8x32xf32>
    %401 = vector.broadcast %295 : vector<1x32xf32> to vector<8x32xf32>
    %402 = arith.addf %400, %401 : vector<8x32xf32>
    %403 = arith.addf %237, %402 : vector<8x32xf32>
    %404 = vector.extract_strided_slice %241 {offsets = [6, 0, 0], sizes = [1, 1, 32], strides = [1, 1, 1]} : vector<9x1x32xf32> to vector<1x1x32xf32>
    %405 = vector.shape_cast %404 : vector<1x1x32xf32> to vector<1x32xf32>
    %406 = vector.extract_strided_slice %241 {offsets = [7, 0, 0], sizes = [1, 1, 32], strides = [1, 1, 1]} : vector<9x1x32xf32> to vector<1x1x32xf32>
    %407 = vector.shape_cast %406 : vector<1x1x32xf32> to vector<1x32xf32>
    %cst_111 = arith.constant dense<0.000000e+00> : vector<8xf32>
    %408 = vector.multi_reduction <add>, %403, %cst_111 [1] : vector<8x32xf32> to vector<8xf32>
    %409 = vector.shape_cast %408 : vector<8xf32> to vector<8x1xf32>
    %cst_112 = arith.constant 3.200000e+01 : f32
    %410 = vector.broadcast %cst_112 : f32 to vector<8x1xf32>
    %411 = arith.divf %409, %410 : vector<8x1xf32>
    %412 = vector.broadcast %411 : vector<8x1xf32> to vector<8x32xf32>
    %413 = arith.subf %403, %412 : vector<8x32xf32>
    %414 = arith.mulf %413, %413 : vector<8x32xf32>
    %cst_113 = arith.constant dense<0.000000e+00> : vector<8xf32>
    %415 = vector.multi_reduction <add>, %414, %cst_113 [1] : vector<8x32xf32> to vector<8xf32>
    %416 = vector.shape_cast %415 : vector<8xf32> to vector<8x1xf32>
    %cst_114 = arith.constant 3.200000e+01 : f32
    %417 = vector.broadcast %cst_114 : f32 to vector<8x1xf32>
    %418 = arith.divf %416, %417 : vector<8x1xf32>
    %419 = vector.broadcast %411 : vector<8x1xf32> to vector<8x32xf32>
    %420 = arith.subf %403, %419 : vector<8x32xf32>
    %cst_115 = arith.constant 9.99999996E-13 : f32
    %421 = vector.broadcast %cst_115 : f32 to vector<8x1xf32>
    %422 = arith.addf %418, %421 : vector<8x1xf32>
    %423 = math.rsqrt %422 : vector<8x1xf32>
    %424 = vector.broadcast %423 : vector<8x1xf32> to vector<8x32xf32>
    %425 = arith.mulf %420, %424 : vector<8x32xf32>
    %426 = vector.broadcast %405 : vector<1x32xf32> to vector<8x32xf32>
    %427 = arith.mulf %425, %426 : vector<8x32xf32>
    %428 = vector.broadcast %407 : vector<1x32xf32> to vector<8x32xf32>
    %429 = arith.addf %427, %428 : vector<8x32xf32>
    %c1_116 = arith.constant 1 : index
    %c0_117 = arith.constant 0 : index
    %c0_118 = arith.constant 0 : index
    %430 = vector.load %arg8[%c1_116, %c0_117, %c0_118] : memref<2x32x64xbf16, #tpu.memory_space<vmem>>, vector<1x32x64xbf16>
    %431 = vector.shape_cast %430 : vector<1x32x64xbf16> to vector<32x64xbf16>
    %432 = arith.truncf %429 : vector<8x32xf32> to vector<8x32xbf16>
    %cst_119 = arith.constant dense<0.000000e+00> : vector<8x64xf32>
    %433 = tpu.matmul %432, %431, %cst_119 {dimension_numbers = #tpu.dot_dimension_numbers<[1], [0], [0], [1], [0, 0, 1, 1], [], []>} : vector<8x32xbf16>, vector<32x64xbf16>, vector<8x64xf32> -> vector<8x64xf32>
    %c1_120 = arith.constant 1 : index
    %c0_121 = arith.constant 0 : index
    %c0_122 = arith.constant 0 : index
    %434 = vector.load %arg9[%c1_120, %c0_121, %c0_122] : memref<2x1x64xf32, #tpu.memory_space<vmem>>, vector<1x1x64xf32>
    %435 = vector.shape_cast %434 : vector<1x1x64xf32> to vector<1x64xf32>
    %436 = vector.broadcast %435 : vector<1x64xf32> to vector<8x64xf32>
    %437 = arith.addf %433, %436 : vector<8x64xf32>
    %cst_123 = arith.constant 5.000000e-01 : f32
    %438 = vector.broadcast %cst_123 : f32 to vector<8x64xf32>
    %439 = arith.mulf %438, %437 : vector<8x64xf32>
    %cst_124 = arith.constant 4.471500e-02 : f32
    %440 = vector.broadcast %cst_124 : f32 to vector<8x64xf32>
    %441 = arith.mulf %440, %437 : vector<8x64xf32>
    %442 = arith.mulf %441, %437 : vector<8x64xf32>
    %443 = arith.mulf %442, %437 : vector<8x64xf32>
    %444 = arith.addf %437, %443 : vector<8x64xf32>
    %cst_125 = arith.constant 0.797884583 : f32
    %445 = vector.broadcast %cst_125 : f32 to vector<8x64xf32>
    %446 = arith.mulf %445, %444 : vector<8x64xf32>
    %447 = math.tanh %446 : vector<8x64xf32>
    %cst_126 = arith.constant 1.000000e+00 : f32
    %448 = vector.broadcast %cst_126 : f32 to vector<8x64xf32>
    %449 = arith.addf %448, %447 : vector<8x64xf32>
    %450 = arith.mulf %439, %449 : vector<8x64xf32>
    %c1_127 = arith.constant 1 : index
    %c0_128 = arith.constant 0 : index
    %c0_129 = arith.constant 0 : index
    %451 = vector.load %arg10[%c1_127, %c0_128, %c0_129] : memref<2x64x32xbf16, #tpu.memory_space<vmem>>, vector<1x64x32xbf16>
    %452 = vector.shape_cast %451 : vector<1x64x32xbf16> to vector<64x32xbf16>
    %453 = arith.truncf %450 : vector<8x64xf32> to vector<8x64xbf16>
    %cst_130 = arith.constant dense<0.000000e+00> : vector<8x32xf32>
    %454 = tpu.matmul %453, %452, %cst_130 {dimension_numbers = #tpu.dot_dimension_numbers<[1], [0], [0], [1], [0, 0, 1, 1], [], []>} : vector<8x64xbf16>, vector<64x32xbf16>, vector<8x32xf32> -> vector<8x32xf32>
    %455 = arith.addf %403, %454 : vector<8x32xf32>
    %456 = vector.extract_strided_slice %241 {offsets = [8, 0, 0], sizes = [1, 1, 32], strides = [1, 1, 1]} : vector<9x1x32xf32> to vector<1x1x32xf32>
    %457 = vector.shape_cast %456 : vector<1x1x32xf32> to vector<1x32xf32>
    %458 = vector.broadcast %457 : vector<1x32xf32> to vector<8x32xf32>
    %459 = arith.addf %455, %458 : vector<8x32xf32>
    %c0_131 = arith.constant 0 : index
    %c0_132 = arith.constant 0 : index
    %c0_133 = arith.constant 0 : index
    %460 = vector.load %arg11[%c0_131, %c0_132, %c0_133] : memref<2x1x32xf32, #tpu.memory_space<vmem>>, vector<1x1x32xf32>
    %461 = vector.shape_cast %460 : vector<1x1x32xf32> to vector<1x32xf32>
    %c1_134 = arith.constant 1 : index
    %c0_135 = arith.constant 0 : index
    %c0_136 = arith.constant 0 : index
    %462 = vector.load %arg11[%c1_134, %c0_135, %c0_136] : memref<2x1x32xf32, #tpu.memory_space<vmem>>, vector<1x1x32xf32>
    %463 = vector.shape_cast %462 : vector<1x1x32xf32> to vector<1x32xf32>
    %cst_137 = arith.constant dense<0.000000e+00> : vector<8xf32>
    %464 = vector.multi_reduction <add>, %459, %cst_137 [1] : vector<8x32xf32> to vector<8xf32>
    %465 = vector.shape_cast %464 : vector<8xf32> to vector<8x1xf32>
    %cst_138 = arith.constant 3.200000e+01 : f32
    %466 = vector.broadcast %cst_138 : f32 to vector<8x1xf32>
    %467 = arith.divf %465, %466 : vector<8x1xf32>
    %468 = vector.broadcast %467 : vector<8x1xf32> to vector<8x32xf32>
    %469 = arith.subf %459, %468 : vector<8x32xf32>
    %470 = arith.mulf %469, %469 : vector<8x32xf32>
    %cst_139 = arith.constant dense<0.000000e+00> : vector<8xf32>
    %471 = vector.multi_reduction <add>, %470, %cst_139 [1] : vector<8x32xf32> to vector<8xf32>
    %472 = vector.shape_cast %471 : vector<8xf32> to vector<8x1xf32>
    %cst_140 = arith.constant 3.200000e+01 : f32
    %473 = vector.broadcast %cst_140 : f32 to vector<8x1xf32>
    %474 = arith.divf %472, %473 : vector<8x1xf32>
    %475 = vector.broadcast %467 : vector<8x1xf32> to vector<8x32xf32>
    %476 = arith.subf %459, %475 : vector<8x32xf32>
    %cst_141 = arith.constant 9.99999996E-13 : f32
    %477 = vector.broadcast %cst_141 : f32 to vector<8x1xf32>
    %478 = arith.addf %474, %477 : vector<8x1xf32>
    %479 = math.rsqrt %478 : vector<8x1xf32>
    %480 = vector.broadcast %479 : vector<8x1xf32> to vector<8x32xf32>
    %481 = arith.mulf %476, %480 : vector<8x32xf32>
    %482 = vector.broadcast %461 : vector<1x32xf32> to vector<8x32xf32>
    %483 = arith.mulf %481, %482 : vector<8x32xf32>
    %484 = vector.broadcast %463 : vector<1x32xf32> to vector<8x32xf32>
    %485 = arith.addf %483, %484 : vector<8x32xf32>
    %c0_142 = arith.constant 0 : index
    %c0_143 = arith.constant 0 : index
    %486 = vector.load %arg12[%c0_142, %c0_143] : memref<33x32xf32, #tpu.memory_space<vmem>>, vector<33x32xf32>
    %487 = vector.extract_strided_slice %485 {offsets = [0, 0], sizes = [1, 32], strides = [1, 1]} : vector<8x32xf32> to vector<1x32xf32>
    %488 = vector.extract_strided_slice %486 {offsets = [0, 0], sizes = [32, 32], strides = [1, 1]} : vector<33x32xf32> to vector<32x32xf32>
    %489 = arith.truncf %487 : vector<1x32xf32> to vector<1x32xbf16>
    %490 = arith.truncf %488 : vector<32x32xf32> to vector<32x32xbf16>
    %cst_144 = arith.constant dense<0.000000e+00> : vector<1x32xf32>
    %491 = tpu.matmul %489, %490, %cst_144 {dimension_numbers = #tpu.dot_dimension_numbers<[1], [0], [0], [1], [0, 0, 1, 1], [], []>} : vector<1x32xbf16>, vector<32x32xbf16>, vector<1x32xf32> -> vector<1x32xf32>
    %492 = vector.extract_strided_slice %486 {offsets = [32, 0], sizes = [1, 32], strides = [1, 1]} : vector<33x32xf32> to vector<1x32xf32>
    %493 = arith.addf %491, %492 : vector<1x32xf32>
    %c0_145 = arith.constant 0 : index
    %c0_146 = arith.constant 0 : index
    %c0_147 = arith.constant 0 : index
    %494 = vector.load %arg2[%c0_145, %c0_146, %c0_147] : memref<1x8x1xi32, #tpu.memory_space<vmem>>, vector<1x8x1xi32>
    %495 = vector.shape_cast %494 : vector<1x8x1xi32> to vector<8x1xi32>
    %c0_148 = arith.constant 0 : index
    %c0_149 = arith.constant 0 : index
    %c0_150 = arith.constant 0 : index
    %496 = vector.load %arg3[%c0_148, %c0_149, %c0_150] : memref<1x1x8xf32, #tpu.memory_space<vmem>>, vector<1x1x8xf32>
    %497 = vector.shape_cast %496 : vector<1x1x8xf32> to vector<1x8xf32>
    %498 = tpu.iota {dimensions = array<i32: 1>} : vector<8x64xi32>
    %499 = vector.broadcast %495 : vector<8x1xi32> to vector<8x64xi32>
    %500 = arith.cmpi eq, %499, %498 : vector<8x64xi32>
    %501 = arith.extui %500 : vector<8x64xi1> to vector<8x64xi32>
    %502 = arith.sitofp %501 : vector<8x64xi32> to vector<8x64xf32>
    %503 = arith.truncf %502 : vector<8x64xf32> to vector<8x64xbf16>
    %c0_151 = arith.constant 0 : index
    %c0_152 = arith.constant 0 : index
    %504 = vector.load %arg13[%c0_151, %c0_152] : memref<64x32xbf16, #tpu.memory_space<vmem>>, vector<64x32xbf16>
    %cst_153 = arith.constant dense<0.000000e+00> : vector<8x32xf32>
    %505 = tpu.matmul %503, %504, %cst_153 {dimension_numbers = #tpu.dot_dimension_numbers<[1], [0], [0], [1], [0, 0, 1, 1], [], []>} : vector<8x64xbf16>, vector<64x32xbf16>, vector<8x32xf32> -> vector<8x32xf32>
    %c0_154 = arith.constant 0 : index
    %c0_155 = arith.constant 0 : index
    %506 = vector.load %arg14[%c0_154, %c0_155] : memref<8x32xf32, #tpu.memory_space<vmem>>, vector<8x32xf32>
    %507 = arith.addf %505, %506 : vector<8x32xf32>
    %508 = tpu.iota {dimensions = array<i32: 0>} : vector<8x8xi32>
    %509 = tpu.iota {dimensions = array<i32: 1>} : vector<8x8xi32>
    %510 = arith.cmpi sge, %508, %509 : vector<8x8xi32>
    %cst_156 = arith.constant 0.000000e+00 : f32
    %cst_157 = arith.constant -1.000000e+09 : f32
    %511 = vector.broadcast %cst_156 : f32 to vector<8x8xf32>
    %512 = vector.broadcast %cst_157 : f32 to vector<8x8xf32>
    %513 = arith.select %510, %511, %512 : vector<8x8xi1>, vector<8x8xf32>
    %cst_158 = arith.constant 1.000000e+00 : f32
    %514 = vector.broadcast %cst_158 : f32 to vector<1x8xf32>
    %515 = arith.subf %514, %497 : vector<1x8xf32>
    %cst_159 = arith.constant -1.000000e+09 : f32
    %516 = vector.broadcast %cst_159 : f32 to vector<1x8xf32>
    %517 = arith.mulf %515, %516 : vector<1x8xf32>
    %518 = vector.broadcast %517 : vector<1x8xf32> to vector<8x8xf32>
    %519 = arith.addf %513, %518 : vector<8x8xf32>
    %c0_160 = arith.constant 0 : index
    %c0_161 = arith.constant 0 : index
    %c0_162 = arith.constant 0 : index
    %c0_163 = arith.constant 0 : index
    %520 = vector.load %arg15[%c0_160, %c0_161, %c0_162, %c0_163] : memref<2x4x32x32xbf16, #tpu.memory_space<vmem>>, vector<1x4x32x32xbf16>
    %521 = vector.shape_cast %520 : vector<1x4x32x32xbf16> to vector<4x32x32xbf16>
    %c0_164 = arith.constant 0 : index
    %c0_165 = arith.constant 0 : index
    %c0_166 = arith.constant 0 : index
    %c0_167 = arith.constant 0 : index
    %522 = vector.load %arg16[%c0_164, %c0_165, %c0_166, %c0_167] : memref<2x2x32x32xbf16, #tpu.memory_space<vmem>>, vector<1x2x32x32xbf16>
    %523 = vector.shape_cast %522 : vector<1x2x32x32xbf16> to vector<2x32x32xbf16>
    %c0_168 = arith.constant 0 : index
    %c0_169 = arith.constant 0 : index
    %c0_170 = arith.constant 0 : index
    %c0_171 = arith.constant 0 : index
    %524 = vector.load %arg17[%c0_168, %c0_169, %c0_170, %c0_171] : memref<2x11x1x32xf32, #tpu.memory_space<vmem>>, vector<1x11x1x32xf32>
    %525 = vector.shape_cast %524 : vector<1x11x1x32xf32> to vector<11x1x32xf32>
    %526 = vector.extract_strided_slice %525 {offsets = [0, 0, 0], sizes = [1, 1, 32], strides = [1, 1, 1]} : vector<11x1x32xf32> to vector<1x1x32xf32>
    %527 = vector.shape_cast %526 : vector<1x1x32xf32> to vector<1x32xf32>
    %528 = vector.extract_strided_slice %525 {offsets = [1, 0, 0], sizes = [1, 1, 32], strides = [1, 1, 1]} : vector<11x1x32xf32> to vector<1x1x32xf32>
    %529 = vector.shape_cast %528 : vector<1x1x32xf32> to vector<1x32xf32>
    %cst_172 = arith.constant dense<0.000000e+00> : vector<8xf32>
    %530 = vector.multi_reduction <add>, %507, %cst_172 [1] : vector<8x32xf32> to vector<8xf32>
    %531 = vector.shape_cast %530 : vector<8xf32> to vector<8x1xf32>
    %cst_173 = arith.constant 3.200000e+01 : f32
    %532 = vector.broadcast %cst_173 : f32 to vector<8x1xf32>
    %533 = arith.divf %531, %532 : vector<8x1xf32>
    %534 = vector.broadcast %533 : vector<8x1xf32> to vector<8x32xf32>
    %535 = arith.subf %507, %534 : vector<8x32xf32>
    %536 = arith.mulf %535, %535 : vector<8x32xf32>
    %cst_174 = arith.constant dense<0.000000e+00> : vector<8xf32>
    %537 = vector.multi_reduction <add>, %536, %cst_174 [1] : vector<8x32xf32> to vector<8xf32>
    %538 = vector.shape_cast %537 : vector<8xf32> to vector<8x1xf32>
    %cst_175 = arith.constant 3.200000e+01 : f32
    %539 = vector.broadcast %cst_175 : f32 to vector<8x1xf32>
    %540 = arith.divf %538, %539 : vector<8x1xf32>
    %541 = vector.broadcast %533 : vector<8x1xf32> to vector<8x32xf32>
    %542 = arith.subf %507, %541 : vector<8x32xf32>
    %cst_176 = arith.constant 9.99999974E-6 : f32
    %543 = vector.broadcast %cst_176 : f32 to vector<8x1xf32>
    %544 = arith.addf %540, %543 : vector<8x1xf32>
    %545 = math.rsqrt %544 : vector<8x1xf32>
    %546 = vector.broadcast %545 : vector<8x1xf32> to vector<8x32xf32>
    %547 = arith.mulf %542, %546 : vector<8x32xf32>
    %548 = vector.broadcast %527 : vector<1x32xf32> to vector<8x32xf32>
    %549 = arith.mulf %547, %548 : vector<8x32xf32>
    %550 = vector.broadcast %529 : vector<1x32xf32> to vector<8x32xf32>
    %551 = arith.addf %549, %550 : vector<8x32xf32>
    %552 = vector.extract_strided_slice %521 {offsets = [0, 0, 0], sizes = [1, 32, 32], strides = [1, 1, 1]} : vector<4x32x32xbf16> to vector<1x32x32xbf16>
    %553 = vector.shape_cast %552 : vector<1x32x32xbf16> to vector<32x32xbf16>
    %554 = arith.truncf %551 : vector<8x32xf32> to vector<8x32xbf16>
    %cst_177 = arith.constant dense<0.000000e+00> : vector<8x32xf32>
    %555 = tpu.matmul %554, %553, %cst_177 {dimension_numbers = #tpu.dot_dimension_numbers<[1], [0], [0], [1], [0, 0, 1, 1], [], []>} : vector<8x32xbf16>, vector<32x32xbf16>, vector<8x32xf32> -> vector<8x32xf32>
    %556 = vector.extract_strided_slice %525 {offsets = [2, 0, 0], sizes = [1, 1, 32], strides = [1, 1, 1]} : vector<11x1x32xf32> to vector<1x1x32xf32>
    %557 = vector.shape_cast %556 : vector<1x1x32xf32> to vector<1x32xf32>
    %558 = vector.broadcast %557 : vector<1x32xf32> to vector<8x32xf32>
    %559 = arith.addf %555, %558 : vector<8x32xf32>
    %560 = vector.extract_strided_slice %521 {offsets = [1, 0, 0], sizes = [1, 32, 32], strides = [1, 1, 1]} : vector<4x32x32xbf16> to vector<1x32x32xbf16>
    %561 = vector.shape_cast %560 : vector<1x32x32xbf16> to vector<32x32xbf16>
    %562 = arith.truncf %551 : vector<8x32xf32> to vector<8x32xbf16>
    %cst_178 = arith.constant dense<0.000000e+00> : vector<8x32xf32>
    %563 = tpu.matmul %562, %561, %cst_178 {dimension_numbers = #tpu.dot_dimension_numbers<[1], [0], [0], [1], [0, 0, 1, 1], [], []>} : vector<8x32xbf16>, vector<32x32xbf16>, vector<8x32xf32> -> vector<8x32xf32>
    %564 = vector.extract_strided_slice %525 {offsets = [3, 0, 0], sizes = [1, 1, 32], strides = [1, 1, 1]} : vector<11x1x32xf32> to vector<1x1x32xf32>
    %565 = vector.shape_cast %564 : vector<1x1x32xf32> to vector<1x32xf32>
    %566 = vector.broadcast %565 : vector<1x32xf32> to vector<8x32xf32>
    %567 = arith.addf %563, %566 : vector<8x32xf32>
    %568 = vector.extract_strided_slice %521 {offsets = [2, 0, 0], sizes = [1, 32, 32], strides = [1, 1, 1]} : vector<4x32x32xbf16> to vector<1x32x32xbf16>
    %569 = vector.shape_cast %568 : vector<1x32x32xbf16> to vector<32x32xbf16>
    %570 = arith.truncf %551 : vector<8x32xf32> to vector<8x32xbf16>
    %cst_179 = arith.constant dense<0.000000e+00> : vector<8x32xf32>
    %571 = tpu.matmul %570, %569, %cst_179 {dimension_numbers = #tpu.dot_dimension_numbers<[1], [0], [0], [1], [0, 0, 1, 1], [], []>} : vector<8x32xbf16>, vector<32x32xbf16>, vector<8x32xf32> -> vector<8x32xf32>
    %572 = vector.extract_strided_slice %525 {offsets = [4, 0, 0], sizes = [1, 1, 32], strides = [1, 1, 1]} : vector<11x1x32xf32> to vector<1x1x32xf32>
    %573 = vector.shape_cast %572 : vector<1x1x32xf32> to vector<1x32xf32>
    %574 = vector.broadcast %573 : vector<1x32xf32> to vector<8x32xf32>
    %575 = arith.addf %571, %574 : vector<8x32xf32>
    %576 = vector.extract_strided_slice %521 {offsets = [3, 0, 0], sizes = [1, 32, 32], strides = [1, 1, 1]} : vector<4x32x32xbf16> to vector<1x32x32xbf16>
    %577 = vector.shape_cast %576 : vector<1x32x32xbf16> to vector<32x32xbf16>
    %578 = vector.extract_strided_slice %525 {offsets = [5, 0, 0], sizes = [1, 1, 32], strides = [1, 1, 1]} : vector<11x1x32xf32> to vector<1x1x32xf32>
    %579 = vector.shape_cast %578 : vector<1x1x32xf32> to vector<1x32xf32>
    %cst_180 = arith.constant 0.000000e+00 : f32
    %580 = vector.broadcast %cst_180 : f32 to vector<8x32xf32>
    %581 = vector.extract_strided_slice %559 {offsets = [0, 0], sizes = [8, 8], strides = [1, 1]} : vector<8x32xf32> to vector<8x8xf32>
    %582 = arith.truncf %581 : vector<8x8xf32> to vector<8x8xbf16>
    %583 = vector.extract_strided_slice %567 {offsets = [0, 0], sizes = [8, 8], strides = [1, 1]} : vector<8x32xf32> to vector<8x8xf32>
    %584 = arith.truncf %583 : vector<8x8xf32> to vector<8x8xbf16>
    %cst_181 = arith.constant dense<0.000000e+00> : vector<8x8xf32>
    %585 = tpu.matmul %582, %584, %cst_181 {dimension_numbers = #tpu.dot_dimension_numbers<[1], [1], [0], [0], [0, 0, 1, 0], [], []>} : vector<8x8xbf16>, vector<8x8xbf16>, vector<8x8xf32> -> vector<8x8xf32>
    %cst_182 = arith.constant 0.353553385 : f32
    %586 = vector.broadcast %cst_182 : f32 to vector<8x8xf32>
    %587 = arith.mulf %585, %586 : vector<8x8xf32>
    %588 = arith.addf %587, %519 : vector<8x8xf32>
    %cst_183 = arith.constant dense<0xFF800000> : vector<8xf32>
    %589 = vector.multi_reduction <maximumf>, %588, %cst_183 [1] : vector<8x8xf32> to vector<8xf32>
    %590 = vector.shape_cast %589 : vector<8xf32> to vector<8x1xf32>
    %591 = vector.broadcast %590 : vector<8x1xf32> to vector<8x8xf32>
    %592 = arith.subf %588, %591 : vector<8x8xf32>
    %593 = math.exp %592 : vector<8x8xf32>
    %cst_184 = arith.constant dense<0.000000e+00> : vector<8xf32>
    %594 = vector.multi_reduction <add>, %593, %cst_184 [1] : vector<8x8xf32> to vector<8xf32>
    %595 = vector.shape_cast %594 : vector<8xf32> to vector<8x1xf32>
    %596 = tpu.reciprocal %595 {approx = true} : vector<8x1xf32> -> vector<8x1xf32>
    %597 = vector.broadcast %596 : vector<8x1xf32> to vector<8x8xf32>
    %598 = arith.mulf %593, %597 : vector<8x8xf32>
    %599 = arith.truncf %598 : vector<8x8xf32> to vector<8x8xbf16>
    %600 = vector.extract_strided_slice %575 {offsets = [0, 0], sizes = [8, 8], strides = [1, 1]} : vector<8x32xf32> to vector<8x8xf32>
    %601 = arith.truncf %600 : vector<8x8xf32> to vector<8x8xbf16>
    %cst_185 = arith.constant dense<0.000000e+00> : vector<8x8xf32>
    %602 = tpu.matmul %599, %601, %cst_185 {dimension_numbers = #tpu.dot_dimension_numbers<[1], [0], [0], [1], [0, 0, 1, 1], [], []>} : vector<8x8xbf16>, vector<8x8xbf16>, vector<8x8xf32> -> vector<8x8xf32>
    %603 = arith.truncf %602 : vector<8x8xf32> to vector<8x8xbf16>
    %604 = vector.extract_strided_slice %577 {offsets = [0, 0], sizes = [8, 32], strides = [1, 1]} : vector<32x32xbf16> to vector<8x32xbf16>
    %cst_186 = arith.constant dense<0.000000e+00> : vector<8x32xf32>
    %605 = tpu.matmul %603, %604, %cst_186 {dimension_numbers = #tpu.dot_dimension_numbers<[1], [0], [0], [1], [0, 0, 1, 1], [], []>} : vector<8x8xbf16>, vector<8x32xbf16>, vector<8x32xf32> -> vector<8x32xf32>
    %606 = arith.addf %580, %605 : vector<8x32xf32>
    %607 = vector.extract_strided_slice %559 {offsets = [0, 8], sizes = [8, 8], strides = [1, 1]} : vector<8x32xf32> to vector<8x8xf32>
    %608 = arith.truncf %607 : vector<8x8xf32> to vector<8x8xbf16>
    %609 = vector.extract_strided_slice %567 {offsets = [0, 8], sizes = [8, 8], strides = [1, 1]} : vector<8x32xf32> to vector<8x8xf32>
    %610 = arith.truncf %609 : vector<8x8xf32> to vector<8x8xbf16>
    %cst_187 = arith.constant dense<0.000000e+00> : vector<8x8xf32>
    %611 = tpu.matmul %608, %610, %cst_187 {dimension_numbers = #tpu.dot_dimension_numbers<[1], [1], [0], [0], [0, 0, 1, 0], [], []>} : vector<8x8xbf16>, vector<8x8xbf16>, vector<8x8xf32> -> vector<8x8xf32>
    %cst_188 = arith.constant 0.353553385 : f32
    %612 = vector.broadcast %cst_188 : f32 to vector<8x8xf32>
    %613 = arith.mulf %611, %612 : vector<8x8xf32>
    %614 = arith.addf %613, %519 : vector<8x8xf32>
    %cst_189 = arith.constant dense<0xFF800000> : vector<8xf32>
    %615 = vector.multi_reduction <maximumf>, %614, %cst_189 [1] : vector<8x8xf32> to vector<8xf32>
    %616 = vector.shape_cast %615 : vector<8xf32> to vector<8x1xf32>
    %617 = vector.broadcast %616 : vector<8x1xf32> to vector<8x8xf32>
    %618 = arith.subf %614, %617 : vector<8x8xf32>
    %619 = math.exp %618 : vector<8x8xf32>
    %cst_190 = arith.constant dense<0.000000e+00> : vector<8xf32>
    %620 = vector.multi_reduction <add>, %619, %cst_190 [1] : vector<8x8xf32> to vector<8xf32>
    %621 = vector.shape_cast %620 : vector<8xf32> to vector<8x1xf32>
    %622 = tpu.reciprocal %621 {approx = true} : vector<8x1xf32> -> vector<8x1xf32>
    %623 = vector.broadcast %622 : vector<8x1xf32> to vector<8x8xf32>
    %624 = arith.mulf %619, %623 : vector<8x8xf32>
    %625 = arith.truncf %624 : vector<8x8xf32> to vector<8x8xbf16>
    %626 = vector.extract_strided_slice %575 {offsets = [0, 8], sizes = [8, 8], strides = [1, 1]} : vector<8x32xf32> to vector<8x8xf32>
    %627 = arith.truncf %626 : vector<8x8xf32> to vector<8x8xbf16>
    %cst_191 = arith.constant dense<0.000000e+00> : vector<8x8xf32>
    %628 = tpu.matmul %625, %627, %cst_191 {dimension_numbers = #tpu.dot_dimension_numbers<[1], [0], [0], [1], [0, 0, 1, 1], [], []>} : vector<8x8xbf16>, vector<8x8xbf16>, vector<8x8xf32> -> vector<8x8xf32>
    %629 = arith.truncf %628 : vector<8x8xf32> to vector<8x8xbf16>
    %630 = vector.extract_strided_slice %577 {offsets = [8, 0], sizes = [8, 32], strides = [1, 1]} : vector<32x32xbf16> to vector<8x32xbf16>
    %cst_192 = arith.constant dense<0.000000e+00> : vector<8x32xf32>
    %631 = tpu.matmul %629, %630, %cst_192 {dimension_numbers = #tpu.dot_dimension_numbers<[1], [0], [0], [1], [0, 0, 1, 1], [], []>} : vector<8x8xbf16>, vector<8x32xbf16>, vector<8x32xf32> -> vector<8x32xf32>
    %632 = arith.addf %606, %631 : vector<8x32xf32>
    %633 = vector.extract_strided_slice %559 {offsets = [0, 16], sizes = [8, 8], strides = [1, 1]} : vector<8x32xf32> to vector<8x8xf32>
    %634 = arith.truncf %633 : vector<8x8xf32> to vector<8x8xbf16>
    %635 = vector.extract_strided_slice %567 {offsets = [0, 16], sizes = [8, 8], strides = [1, 1]} : vector<8x32xf32> to vector<8x8xf32>
    %636 = arith.truncf %635 : vector<8x8xf32> to vector<8x8xbf16>
    %cst_193 = arith.constant dense<0.000000e+00> : vector<8x8xf32>
    %637 = tpu.matmul %634, %636, %cst_193 {dimension_numbers = #tpu.dot_dimension_numbers<[1], [1], [0], [0], [0, 0, 1, 0], [], []>} : vector<8x8xbf16>, vector<8x8xbf16>, vector<8x8xf32> -> vector<8x8xf32>
    %cst_194 = arith.constant 0.353553385 : f32
    %638 = vector.broadcast %cst_194 : f32 to vector<8x8xf32>
    %639 = arith.mulf %637, %638 : vector<8x8xf32>
    %640 = arith.addf %639, %519 : vector<8x8xf32>
    %cst_195 = arith.constant dense<0xFF800000> : vector<8xf32>
    %641 = vector.multi_reduction <maximumf>, %640, %cst_195 [1] : vector<8x8xf32> to vector<8xf32>
    %642 = vector.shape_cast %641 : vector<8xf32> to vector<8x1xf32>
    %643 = vector.broadcast %642 : vector<8x1xf32> to vector<8x8xf32>
    %644 = arith.subf %640, %643 : vector<8x8xf32>
    %645 = math.exp %644 : vector<8x8xf32>
    %cst_196 = arith.constant dense<0.000000e+00> : vector<8xf32>
    %646 = vector.multi_reduction <add>, %645, %cst_196 [1] : vector<8x8xf32> to vector<8xf32>
    %647 = vector.shape_cast %646 : vector<8xf32> to vector<8x1xf32>
    %648 = tpu.reciprocal %647 {approx = true} : vector<8x1xf32> -> vector<8x1xf32>
    %649 = vector.broadcast %648 : vector<8x1xf32> to vector<8x8xf32>
    %650 = arith.mulf %645, %649 : vector<8x8xf32>
    %651 = arith.truncf %650 : vector<8x8xf32> to vector<8x8xbf16>
    %652 = vector.extract_strided_slice %575 {offsets = [0, 16], sizes = [8, 8], strides = [1, 1]} : vector<8x32xf32> to vector<8x8xf32>
    %653 = arith.truncf %652 : vector<8x8xf32> to vector<8x8xbf16>
    %cst_197 = arith.constant dense<0.000000e+00> : vector<8x8xf32>
    %654 = tpu.matmul %651, %653, %cst_197 {dimension_numbers = #tpu.dot_dimension_numbers<[1], [0], [0], [1], [0, 0, 1, 1], [], []>} : vector<8x8xbf16>, vector<8x8xbf16>, vector<8x8xf32> -> vector<8x8xf32>
    %655 = arith.truncf %654 : vector<8x8xf32> to vector<8x8xbf16>
    %656 = vector.extract_strided_slice %577 {offsets = [16, 0], sizes = [8, 32], strides = [1, 1]} : vector<32x32xbf16> to vector<8x32xbf16>
    %cst_198 = arith.constant dense<0.000000e+00> : vector<8x32xf32>
    %657 = tpu.matmul %655, %656, %cst_198 {dimension_numbers = #tpu.dot_dimension_numbers<[1], [0], [0], [1], [0, 0, 1, 1], [], []>} : vector<8x8xbf16>, vector<8x32xbf16>, vector<8x32xf32> -> vector<8x32xf32>
    %658 = arith.addf %632, %657 : vector<8x32xf32>
    %659 = vector.extract_strided_slice %559 {offsets = [0, 24], sizes = [8, 8], strides = [1, 1]} : vector<8x32xf32> to vector<8x8xf32>
    %660 = arith.truncf %659 : vector<8x8xf32> to vector<8x8xbf16>
    %661 = vector.extract_strided_slice %567 {offsets = [0, 24], sizes = [8, 8], strides = [1, 1]} : vector<8x32xf32> to vector<8x8xf32>
    %662 = arith.truncf %661 : vector<8x8xf32> to vector<8x8xbf16>
    %cst_199 = arith.constant dense<0.000000e+00> : vector<8x8xf32>
    %663 = tpu.matmul %660, %662, %cst_199 {dimension_numbers = #tpu.dot_dimension_numbers<[1], [1], [0], [0], [0, 0, 1, 0], [], []>} : vector<8x8xbf16>, vector<8x8xbf16>, vector<8x8xf32> -> vector<8x8xf32>
    %cst_200 = arith.constant 0.353553385 : f32
    %664 = vector.broadcast %cst_200 : f32 to vector<8x8xf32>
    %665 = arith.mulf %663, %664 : vector<8x8xf32>
    %666 = arith.addf %665, %519 : vector<8x8xf32>
    %cst_201 = arith.constant dense<0xFF800000> : vector<8xf32>
    %667 = vector.multi_reduction <maximumf>, %666, %cst_201 [1] : vector<8x8xf32> to vector<8xf32>
    %668 = vector.shape_cast %667 : vector<8xf32> to vector<8x1xf32>
    %669 = vector.broadcast %668 : vector<8x1xf32> to vector<8x8xf32>
    %670 = arith.subf %666, %669 : vector<8x8xf32>
    %671 = math.exp %670 : vector<8x8xf32>
    %cst_202 = arith.constant dense<0.000000e+00> : vector<8xf32>
    %672 = vector.multi_reduction <add>, %671, %cst_202 [1] : vector<8x8xf32> to vector<8xf32>
    %673 = vector.shape_cast %672 : vector<8xf32> to vector<8x1xf32>
    %674 = tpu.reciprocal %673 {approx = true} : vector<8x1xf32> -> vector<8x1xf32>
    %675 = vector.broadcast %674 : vector<8x1xf32> to vector<8x8xf32>
    %676 = arith.mulf %671, %675 : vector<8x8xf32>
    %677 = arith.truncf %676 : vector<8x8xf32> to vector<8x8xbf16>
    %678 = vector.extract_strided_slice %575 {offsets = [0, 24], sizes = [8, 8], strides = [1, 1]} : vector<8x32xf32> to vector<8x8xf32>
    %679 = arith.truncf %678 : vector<8x8xf32> to vector<8x8xbf16>
    %cst_203 = arith.constant dense<0.000000e+00> : vector<8x8xf32>
    %680 = tpu.matmul %677, %679, %cst_203 {dimension_numbers = #tpu.dot_dimension_numbers<[1], [0], [0], [1], [0, 0, 1, 1], [], []>} : vector<8x8xbf16>, vector<8x8xbf16>, vector<8x8xf32> -> vector<8x8xf32>
    %681 = arith.truncf %680 : vector<8x8xf32> to vector<8x8xbf16>
    %682 = vector.extract_strided_slice %577 {offsets = [24, 0], sizes = [8, 32], strides = [1, 1]} : vector<32x32xbf16> to vector<8x32xbf16>
    %cst_204 = arith.constant dense<0.000000e+00> : vector<8x32xf32>
    %683 = tpu.matmul %681, %682, %cst_204 {dimension_numbers = #tpu.dot_dimension_numbers<[1], [0], [0], [1], [0, 0, 1, 1], [], []>} : vector<8x8xbf16>, vector<8x32xbf16>, vector<8x32xf32> -> vector<8x32xf32>
    %684 = arith.addf %658, %683 : vector<8x32xf32>
    %685 = vector.broadcast %579 : vector<1x32xf32> to vector<8x32xf32>
    %686 = arith.addf %684, %685 : vector<8x32xf32>
    %687 = arith.addf %507, %686 : vector<8x32xf32>
    %688 = vector.extract_strided_slice %523 {offsets = [0, 0, 0], sizes = [1, 32, 32], strides = [1, 1, 1]} : vector<2x32x32xbf16> to vector<1x32x32xbf16>
    %689 = vector.shape_cast %688 : vector<1x32x32xbf16> to vector<32x32xbf16>
    %690 = arith.truncf %493 : vector<1x32xf32> to vector<1x32xbf16>
    %cst_205 = arith.constant dense<0.000000e+00> : vector<1x32xf32>
    %691 = tpu.matmul %690, %689, %cst_205 {dimension_numbers = #tpu.dot_dimension_numbers<[1], [0], [0], [1], [0, 0, 1, 1], [], []>} : vector<1x32xbf16>, vector<32x32xbf16>, vector<1x32xf32> -> vector<1x32xf32>
    %692 = vector.extract_strided_slice %525 {offsets = [6, 0, 0], sizes = [1, 1, 32], strides = [1, 1, 1]} : vector<11x1x32xf32> to vector<1x1x32xf32>
    %693 = vector.shape_cast %692 : vector<1x1x32xf32> to vector<1x32xf32>
    %694 = arith.addf %691, %693 : vector<1x32xf32>
    %695 = vector.extract_strided_slice %523 {offsets = [1, 0, 0], sizes = [1, 32, 32], strides = [1, 1, 1]} : vector<2x32x32xbf16> to vector<1x32x32xbf16>
    %696 = vector.shape_cast %695 : vector<1x32x32xbf16> to vector<32x32xbf16>
    %697 = arith.truncf %694 : vector<1x32xf32> to vector<1x32xbf16>
    %cst_206 = arith.constant dense<0.000000e+00> : vector<1x32xf32>
    %698 = tpu.matmul %697, %696, %cst_206 {dimension_numbers = #tpu.dot_dimension_numbers<[1], [0], [0], [1], [0, 0, 1, 1], [], []>} : vector<1x32xbf16>, vector<32x32xbf16>, vector<1x32xf32> -> vector<1x32xf32>
    %699 = vector.broadcast %698 : vector<1x32xf32> to vector<8x32xf32>
    %700 = arith.addf %687, %699 : vector<8x32xf32>
    %701 = vector.extract_strided_slice %525 {offsets = [7, 0, 0], sizes = [1, 1, 32], strides = [1, 1, 1]} : vector<11x1x32xf32> to vector<1x1x32xf32>
    %702 = vector.shape_cast %701 : vector<1x1x32xf32> to vector<1x32xf32>
    %703 = vector.broadcast %702 : vector<1x32xf32> to vector<8x32xf32>
    %704 = arith.addf %700, %703 : vector<8x32xf32>
    %705 = vector.extract_strided_slice %525 {offsets = [8, 0, 0], sizes = [1, 1, 32], strides = [1, 1, 1]} : vector<11x1x32xf32> to vector<1x1x32xf32>
    %706 = vector.shape_cast %705 : vector<1x1x32xf32> to vector<1x32xf32>
    %707 = vector.extract_strided_slice %525 {offsets = [9, 0, 0], sizes = [1, 1, 32], strides = [1, 1, 1]} : vector<11x1x32xf32> to vector<1x1x32xf32>
    %708 = vector.shape_cast %707 : vector<1x1x32xf32> to vector<1x32xf32>
    %cst_207 = arith.constant dense<0.000000e+00> : vector<8xf32>
    %709 = vector.multi_reduction <add>, %704, %cst_207 [1] : vector<8x32xf32> to vector<8xf32>
    %710 = vector.shape_cast %709 : vector<8xf32> to vector<8x1xf32>
    %cst_208 = arith.constant 3.200000e+01 : f32
    %711 = vector.broadcast %cst_208 : f32 to vector<8x1xf32>
    %712 = arith.divf %710, %711 : vector<8x1xf32>
    %713 = vector.broadcast %712 : vector<8x1xf32> to vector<8x32xf32>
    %714 = arith.subf %704, %713 : vector<8x32xf32>
    %715 = arith.mulf %714, %714 : vector<8x32xf32>
    %cst_209 = arith.constant dense<0.000000e+00> : vector<8xf32>
    %716 = vector.multi_reduction <add>, %715, %cst_209 [1] : vector<8x32xf32> to vector<8xf32>
    %717 = vector.shape_cast %716 : vector<8xf32> to vector<8x1xf32>
    %cst_210 = arith.constant 3.200000e+01 : f32
    %718 = vector.broadcast %cst_210 : f32 to vector<8x1xf32>
    %719 = arith.divf %717, %718 : vector<8x1xf32>
    %720 = vector.broadcast %712 : vector<8x1xf32> to vector<8x32xf32>
    %721 = arith.subf %704, %720 : vector<8x32xf32>
    %cst_211 = arith.constant 9.99999974E-6 : f32
    %722 = vector.broadcast %cst_211 : f32 to vector<8x1xf32>
    %723 = arith.addf %719, %722 : vector<8x1xf32>
    %724 = math.rsqrt %723 : vector<8x1xf32>
    %725 = vector.broadcast %724 : vector<8x1xf32> to vector<8x32xf32>
    %726 = arith.mulf %721, %725 : vector<8x32xf32>
    %727 = vector.broadcast %706 : vector<1x32xf32> to vector<8x32xf32>
    %728 = arith.mulf %726, %727 : vector<8x32xf32>
    %729 = vector.broadcast %708 : vector<1x32xf32> to vector<8x32xf32>
    %730 = arith.addf %728, %729 : vector<8x32xf32>
    %c0_212 = arith.constant 0 : index
    %c0_213 = arith.constant 0 : index
    %c0_214 = arith.constant 0 : index
    %731 = vector.load %arg18[%c0_212, %c0_213, %c0_214] : memref<2x32x128xbf16, #tpu.memory_space<vmem>>, vector<1x32x128xbf16>
    %732 = vector.shape_cast %731 : vector<1x32x128xbf16> to vector<32x128xbf16>
    %733 = arith.truncf %730 : vector<8x32xf32> to vector<8x32xbf16>
    %cst_215 = arith.constant dense<0.000000e+00> : vector<8x128xf32>
    %734 = tpu.matmul %733, %732, %cst_215 {dimension_numbers = #tpu.dot_dimension_numbers<[1], [0], [0], [1], [0, 0, 1, 1], [], []>} : vector<8x32xbf16>, vector<32x128xbf16>, vector<8x128xf32> -> vector<8x128xf32>
    %c0_216 = arith.constant 0 : index
    %c0_217 = arith.constant 0 : index
    %c0_218 = arith.constant 0 : index
    %735 = vector.load %arg19[%c0_216, %c0_217, %c0_218] : memref<2x1x128xf32, #tpu.memory_space<vmem>>, vector<1x1x128xf32>
    %736 = vector.shape_cast %735 : vector<1x1x128xf32> to vector<1x128xf32>
    %737 = vector.broadcast %736 : vector<1x128xf32> to vector<8x128xf32>
    %738 = arith.addf %734, %737 : vector<8x128xf32>
    %cst_219 = arith.constant 5.000000e-01 : f32
    %739 = vector.broadcast %cst_219 : f32 to vector<8x128xf32>
    %740 = arith.mulf %739, %738 : vector<8x128xf32>
    %cst_220 = arith.constant 4.471500e-02 : f32
    %741 = vector.broadcast %cst_220 : f32 to vector<8x128xf32>
    %742 = arith.mulf %741, %738 : vector<8x128xf32>
    %743 = arith.mulf %742, %738 : vector<8x128xf32>
    %744 = arith.mulf %743, %738 : vector<8x128xf32>
    %745 = arith.addf %738, %744 : vector<8x128xf32>
    %cst_221 = arith.constant 0.797884583 : f32
    %746 = vector.broadcast %cst_221 : f32 to vector<8x128xf32>
    %747 = arith.mulf %746, %745 : vector<8x128xf32>
    %748 = math.tanh %747 : vector<8x128xf32>
    %cst_222 = arith.constant 1.000000e+00 : f32
    %749 = vector.broadcast %cst_222 : f32 to vector<8x128xf32>
    %750 = arith.addf %749, %748 : vector<8x128xf32>
    %751 = arith.mulf %740, %750 : vector<8x128xf32>
    %c0_223 = arith.constant 0 : index
    %c0_224 = arith.constant 0 : index
    %c0_225 = arith.constant 0 : index
    %752 = vector.load %arg20[%c0_223, %c0_224, %c0_225] : memref<2x128x32xbf16, #tpu.memory_space<vmem>>, vector<1x128x32xbf16>
    %753 = vector.shape_cast %752 : vector<1x128x32xbf16> to vector<128x32xbf16>
    %754 = arith.truncf %751 : vector<8x128xf32> to vector<8x128xbf16>
    %cst_226 = arith.constant dense<0.000000e+00> : vector<8x32xf32>
    %755 = tpu.matmul %754, %753, %cst_226 {dimension_numbers = #tpu.dot_dimension_numbers<[1], [0], [0], [1], [0, 0, 1, 1], [], []>} : vector<8x128xbf16>, vector<128x32xbf16>, vector<8x32xf32> -> vector<8x32xf32>
    %756 = arith.addf %704, %755 : vector<8x32xf32>
    %757 = vector.extract_strided_slice %525 {offsets = [10, 0, 0], sizes = [1, 1, 32], strides = [1, 1, 1]} : vector<11x1x32xf32> to vector<1x1x32xf32>
    %758 = vector.shape_cast %757 : vector<1x1x32xf32> to vector<1x32xf32>
    %759 = vector.broadcast %758 : vector<1x32xf32> to vector<8x32xf32>
    %760 = arith.addf %756, %759 : vector<8x32xf32>
    %c1_227 = arith.constant 1 : index
    %c0_228 = arith.constant 0 : index
    %c0_229 = arith.constant 0 : index
    %c0_230 = arith.constant 0 : index
    %761 = vector.load %arg15[%c1_227, %c0_228, %c0_229, %c0_230] : memref<2x4x32x32xbf16, #tpu.memory_space<vmem>>, vector<1x4x32x32xbf16>
    %762 = vector.shape_cast %761 : vector<1x4x32x32xbf16> to vector<4x32x32xbf16>
    %c1_231 = arith.constant 1 : index
    %c0_232 = arith.constant 0 : index
    %c0_233 = arith.constant 0 : index
    %c0_234 = arith.constant 0 : index
    %763 = vector.load %arg16[%c1_231, %c0_232, %c0_233, %c0_234] : memref<2x2x32x32xbf16, #tpu.memory_space<vmem>>, vector<1x2x32x32xbf16>
    %764 = vector.shape_cast %763 : vector<1x2x32x32xbf16> to vector<2x32x32xbf16>
    %c1_235 = arith.constant 1 : index
    %c0_236 = arith.constant 0 : index
    %c0_237 = arith.constant 0 : index
    %c0_238 = arith.constant 0 : index
    %765 = vector.load %arg17[%c1_235, %c0_236, %c0_237, %c0_238] : memref<2x11x1x32xf32, #tpu.memory_space<vmem>>, vector<1x11x1x32xf32>
    %766 = vector.shape_cast %765 : vector<1x11x1x32xf32> to vector<11x1x32xf32>
    %767 = vector.extract_strided_slice %766 {offsets = [0, 0, 0], sizes = [1, 1, 32], strides = [1, 1, 1]} : vector<11x1x32xf32> to vector<1x1x32xf32>
    %768 = vector.shape_cast %767 : vector<1x1x32xf32> to vector<1x32xf32>
    %769 = vector.extract_strided_slice %766 {offsets = [1, 0, 0], sizes = [1, 1, 32], strides = [1, 1, 1]} : vector<11x1x32xf32> to vector<1x1x32xf32>
    %770 = vector.shape_cast %769 : vector<1x1x32xf32> to vector<1x32xf32>
    %cst_239 = arith.constant dense<0.000000e+00> : vector<8xf32>
    %771 = vector.multi_reduction <add>, %760, %cst_239 [1] : vector<8x32xf32> to vector<8xf32>
    %772 = vector.shape_cast %771 : vector<8xf32> to vector<8x1xf32>
    %cst_240 = arith.constant 3.200000e+01 : f32
    %773 = vector.broadcast %cst_240 : f32 to vector<8x1xf32>
    %774 = arith.divf %772, %773 : vector<8x1xf32>
    %775 = vector.broadcast %774 : vector<8x1xf32> to vector<8x32xf32>
    %776 = arith.subf %760, %775 : vector<8x32xf32>
    %777 = arith.mulf %776, %776 : vector<8x32xf32>
    %cst_241 = arith.constant dense<0.000000e+00> : vector<8xf32>
    %778 = vector.multi_reduction <add>, %777, %cst_241 [1] : vector<8x32xf32> to vector<8xf32>
    %779 = vector.shape_cast %778 : vector<8xf32> to vector<8x1xf32>
    %cst_242 = arith.constant 3.200000e+01 : f32
    %780 = vector.broadcast %cst_242 : f32 to vector<8x1xf32>
    %781 = arith.divf %779, %780 : vector<8x1xf32>
    %782 = vector.broadcast %774 : vector<8x1xf32> to vector<8x32xf32>
    %783 = arith.subf %760, %782 : vector<8x32xf32>
    %cst_243 = arith.constant 9.99999974E-6 : f32
    %784 = vector.broadcast %cst_243 : f32 to vector<8x1xf32>
    %785 = arith.addf %781, %784 : vector<8x1xf32>
    %786 = math.rsqrt %785 : vector<8x1xf32>
    %787 = vector.broadcast %786 : vector<8x1xf32> to vector<8x32xf32>
    %788 = arith.mulf %783, %787 : vector<8x32xf32>
    %789 = vector.broadcast %768 : vector<1x32xf32> to vector<8x32xf32>
    %790 = arith.mulf %788, %789 : vector<8x32xf32>
    %791 = vector.broadcast %770 : vector<1x32xf32> to vector<8x32xf32>
    %792 = arith.addf %790, %791 : vector<8x32xf32>
    %793 = vector.extract_strided_slice %762 {offsets = [0, 0, 0], sizes = [1, 32, 32], strides = [1, 1, 1]} : vector<4x32x32xbf16> to vector<1x32x32xbf16>
    %794 = vector.shape_cast %793 : vector<1x32x32xbf16> to vector<32x32xbf16>
    %795 = arith.truncf %792 : vector<8x32xf32> to vector<8x32xbf16>
    %cst_244 = arith.constant dense<0.000000e+00> : vector<8x32xf32>
    %796 = tpu.matmul %795, %794, %cst_244 {dimension_numbers = #tpu.dot_dimension_numbers<[1], [0], [0], [1], [0, 0, 1, 1], [], []>} : vector<8x32xbf16>, vector<32x32xbf16>, vector<8x32xf32> -> vector<8x32xf32>
    %797 = vector.extract_strided_slice %766 {offsets = [2, 0, 0], sizes = [1, 1, 32], strides = [1, 1, 1]} : vector<11x1x32xf32> to vector<1x1x32xf32>
    %798 = vector.shape_cast %797 : vector<1x1x32xf32> to vector<1x32xf32>
    %799 = vector.broadcast %798 : vector<1x32xf32> to vector<8x32xf32>
    %800 = arith.addf %796, %799 : vector<8x32xf32>
    %801 = vector.extract_strided_slice %762 {offsets = [1, 0, 0], sizes = [1, 32, 32], strides = [1, 1, 1]} : vector<4x32x32xbf16> to vector<1x32x32xbf16>
    %802 = vector.shape_cast %801 : vector<1x32x32xbf16> to vector<32x32xbf16>
    %803 = arith.truncf %792 : vector<8x32xf32> to vector<8x32xbf16>
    %cst_245 = arith.constant dense<0.000000e+00> : vector<8x32xf32>
    %804 = tpu.matmul %803, %802, %cst_245 {dimension_numbers = #tpu.dot_dimension_numbers<[1], [0], [0], [1], [0, 0, 1, 1], [], []>} : vector<8x32xbf16>, vector<32x32xbf16>, vector<8x32xf32> -> vector<8x32xf32>
    %805 = vector.extract_strided_slice %766 {offsets = [3, 0, 0], sizes = [1, 1, 32], strides = [1, 1, 1]} : vector<11x1x32xf32> to vector<1x1x32xf32>
    %806 = vector.shape_cast %805 : vector<1x1x32xf32> to vector<1x32xf32>
    %807 = vector.broadcast %806 : vector<1x32xf32> to vector<8x32xf32>
    %808 = arith.addf %804, %807 : vector<8x32xf32>
    %809 = vector.extract_strided_slice %762 {offsets = [2, 0, 0], sizes = [1, 32, 32], strides = [1, 1, 1]} : vector<4x32x32xbf16> to vector<1x32x32xbf16>
    %810 = vector.shape_cast %809 : vector<1x32x32xbf16> to vector<32x32xbf16>
    %811 = arith.truncf %792 : vector<8x32xf32> to vector<8x32xbf16>
    %cst_246 = arith.constant dense<0.000000e+00> : vector<8x32xf32>
    %812 = tpu.matmul %811, %810, %cst_246 {dimension_numbers = #tpu.dot_dimension_numbers<[1], [0], [0], [1], [0, 0, 1, 1], [], []>} : vector<8x32xbf16>, vector<32x32xbf16>, vector<8x32xf32> -> vector<8x32xf32>
    %813 = vector.extract_strided_slice %766 {offsets = [4, 0, 0], sizes = [1, 1, 32], strides = [1, 1, 1]} : vector<11x1x32xf32> to vector<1x1x32xf32>
    %814 = vector.shape_cast %813 : vector<1x1x32xf32> to vector<1x32xf32>
    %815 = vector.broadcast %814 : vector<1x32xf32> to vector<8x32xf32>
    %816 = arith.addf %812, %815 : vector<8x32xf32>
    %817 = vector.extract_strided_slice %762 {offsets = [3, 0, 0], sizes = [1, 32, 32], strides = [1, 1, 1]} : vector<4x32x32xbf16> to vector<1x32x32xbf16>
    %818 = vector.shape_cast %817 : vector<1x32x32xbf16> to vector<32x32xbf16>
    %819 = vector.extract_strided_slice %766 {offsets = [5, 0, 0], sizes = [1, 1, 32], strides = [1, 1, 1]} : vector<11x1x32xf32> to vector<1x1x32xf32>
    %820 = vector.shape_cast %819 : vector<1x1x32xf32> to vector<1x32xf32>
    %cst_247 = arith.constant 0.000000e+00 : f32
    %821 = vector.broadcast %cst_247 : f32 to vector<8x32xf32>
    %822 = vector.extract_strided_slice %800 {offsets = [0, 0], sizes = [8, 8], strides = [1, 1]} : vector<8x32xf32> to vector<8x8xf32>
    %823 = arith.truncf %822 : vector<8x8xf32> to vector<8x8xbf16>
    %824 = vector.extract_strided_slice %808 {offsets = [0, 0], sizes = [8, 8], strides = [1, 1]} : vector<8x32xf32> to vector<8x8xf32>
    %825 = arith.truncf %824 : vector<8x8xf32> to vector<8x8xbf16>
    %cst_248 = arith.constant dense<0.000000e+00> : vector<8x8xf32>
    %826 = tpu.matmul %823, %825, %cst_248 {dimension_numbers = #tpu.dot_dimension_numbers<[1], [1], [0], [0], [0, 0, 1, 0], [], []>} : vector<8x8xbf16>, vector<8x8xbf16>, vector<8x8xf32> -> vector<8x8xf32>
    %cst_249 = arith.constant 0.353553385 : f32
    %827 = vector.broadcast %cst_249 : f32 to vector<8x8xf32>
    %828 = arith.mulf %826, %827 : vector<8x8xf32>
    %829 = arith.addf %828, %519 : vector<8x8xf32>
    %cst_250 = arith.constant dense<0xFF800000> : vector<8xf32>
    %830 = vector.multi_reduction <maximumf>, %829, %cst_250 [1] : vector<8x8xf32> to vector<8xf32>
    %831 = vector.shape_cast %830 : vector<8xf32> to vector<8x1xf32>
    %832 = vector.broadcast %831 : vector<8x1xf32> to vector<8x8xf32>
    %833 = arith.subf %829, %832 : vector<8x8xf32>
    %834 = math.exp %833 : vector<8x8xf32>
    %cst_251 = arith.constant dense<0.000000e+00> : vector<8xf32>
    %835 = vector.multi_reduction <add>, %834, %cst_251 [1] : vector<8x8xf32> to vector<8xf32>
    %836 = vector.shape_cast %835 : vector<8xf32> to vector<8x1xf32>
    %837 = tpu.reciprocal %836 {approx = true} : vector<8x1xf32> -> vector<8x1xf32>
    %838 = vector.broadcast %837 : vector<8x1xf32> to vector<8x8xf32>
    %839 = arith.mulf %834, %838 : vector<8x8xf32>
    %840 = arith.truncf %839 : vector<8x8xf32> to vector<8x8xbf16>
    %841 = vector.extract_strided_slice %816 {offsets = [0, 0], sizes = [8, 8], strides = [1, 1]} : vector<8x32xf32> to vector<8x8xf32>
    %842 = arith.truncf %841 : vector<8x8xf32> to vector<8x8xbf16>
    %cst_252 = arith.constant dense<0.000000e+00> : vector<8x8xf32>
    %843 = tpu.matmul %840, %842, %cst_252 {dimension_numbers = #tpu.dot_dimension_numbers<[1], [0], [0], [1], [0, 0, 1, 1], [], []>} : vector<8x8xbf16>, vector<8x8xbf16>, vector<8x8xf32> -> vector<8x8xf32>
    %844 = arith.truncf %843 : vector<8x8xf32> to vector<8x8xbf16>
    %845 = vector.extract_strided_slice %818 {offsets = [0, 0], sizes = [8, 32], strides = [1, 1]} : vector<32x32xbf16> to vector<8x32xbf16>
    %cst_253 = arith.constant dense<0.000000e+00> : vector<8x32xf32>
    %846 = tpu.matmul %844, %845, %cst_253 {dimension_numbers = #tpu.dot_dimension_numbers<[1], [0], [0], [1], [0, 0, 1, 1], [], []>} : vector<8x8xbf16>, vector<8x32xbf16>, vector<8x32xf32> -> vector<8x32xf32>
    %847 = arith.addf %821, %846 : vector<8x32xf32>
    %848 = vector.extract_strided_slice %800 {offsets = [0, 8], sizes = [8, 8], strides = [1, 1]} : vector<8x32xf32> to vector<8x8xf32>
    %849 = arith.truncf %848 : vector<8x8xf32> to vector<8x8xbf16>
    %850 = vector.extract_strided_slice %808 {offsets = [0, 8], sizes = [8, 8], strides = [1, 1]} : vector<8x32xf32> to vector<8x8xf32>
    %851 = arith.truncf %850 : vector<8x8xf32> to vector<8x8xbf16>
    %cst_254 = arith.constant dense<0.000000e+00> : vector<8x8xf32>
    %852 = tpu.matmul %849, %851, %cst_254 {dimension_numbers = #tpu.dot_dimension_numbers<[1], [1], [0], [0], [0, 0, 1, 0], [], []>} : vector<8x8xbf16>, vector<8x8xbf16>, vector<8x8xf32> -> vector<8x8xf32>
    %cst_255 = arith.constant 0.353553385 : f32
    %853 = vector.broadcast %cst_255 : f32 to vector<8x8xf32>
    %854 = arith.mulf %852, %853 : vector<8x8xf32>
    %855 = arith.addf %854, %519 : vector<8x8xf32>
    %cst_256 = arith.constant dense<0xFF800000> : vector<8xf32>
    %856 = vector.multi_reduction <maximumf>, %855, %cst_256 [1] : vector<8x8xf32> to vector<8xf32>
    %857 = vector.shape_cast %856 : vector<8xf32> to vector<8x1xf32>
    %858 = vector.broadcast %857 : vector<8x1xf32> to vector<8x8xf32>
    %859 = arith.subf %855, %858 : vector<8x8xf32>
    %860 = math.exp %859 : vector<8x8xf32>
    %cst_257 = arith.constant dense<0.000000e+00> : vector<8xf32>
    %861 = vector.multi_reduction <add>, %860, %cst_257 [1] : vector<8x8xf32> to vector<8xf32>
    %862 = vector.shape_cast %861 : vector<8xf32> to vector<8x1xf32>
    %863 = tpu.reciprocal %862 {approx = true} : vector<8x1xf32> -> vector<8x1xf32>
    %864 = vector.broadcast %863 : vector<8x1xf32> to vector<8x8xf32>
    %865 = arith.mulf %860, %864 : vector<8x8xf32>
    %866 = arith.truncf %865 : vector<8x8xf32> to vector<8x8xbf16>
    %867 = vector.extract_strided_slice %816 {offsets = [0, 8], sizes = [8, 8], strides = [1, 1]} : vector<8x32xf32> to vector<8x8xf32>
    %868 = arith.truncf %867 : vector<8x8xf32> to vector<8x8xbf16>
    %cst_258 = arith.constant dense<0.000000e+00> : vector<8x8xf32>
    %869 = tpu.matmul %866, %868, %cst_258 {dimension_numbers = #tpu.dot_dimension_numbers<[1], [0], [0], [1], [0, 0, 1, 1], [], []>} : vector<8x8xbf16>, vector<8x8xbf16>, vector<8x8xf32> -> vector<8x8xf32>
    %870 = arith.truncf %869 : vector<8x8xf32> to vector<8x8xbf16>
    %871 = vector.extract_strided_slice %818 {offsets = [8, 0], sizes = [8, 32], strides = [1, 1]} : vector<32x32xbf16> to vector<8x32xbf16>
    %cst_259 = arith.constant dense<0.000000e+00> : vector<8x32xf32>
    %872 = tpu.matmul %870, %871, %cst_259 {dimension_numbers = #tpu.dot_dimension_numbers<[1], [0], [0], [1], [0, 0, 1, 1], [], []>} : vector<8x8xbf16>, vector<8x32xbf16>, vector<8x32xf32> -> vector<8x32xf32>
    %873 = arith.addf %847, %872 : vector<8x32xf32>
    %874 = vector.extract_strided_slice %800 {offsets = [0, 16], sizes = [8, 8], strides = [1, 1]} : vector<8x32xf32> to vector<8x8xf32>
    %875 = arith.truncf %874 : vector<8x8xf32> to vector<8x8xbf16>
    %876 = vector.extract_strided_slice %808 {offsets = [0, 16], sizes = [8, 8], strides = [1, 1]} : vector<8x32xf32> to vector<8x8xf32>
    %877 = arith.truncf %876 : vector<8x8xf32> to vector<8x8xbf16>
    %cst_260 = arith.constant dense<0.000000e+00> : vector<8x8xf32>
    %878 = tpu.matmul %875, %877, %cst_260 {dimension_numbers = #tpu.dot_dimension_numbers<[1], [1], [0], [0], [0, 0, 1, 0], [], []>} : vector<8x8xbf16>, vector<8x8xbf16>, vector<8x8xf32> -> vector<8x8xf32>
    %cst_261 = arith.constant 0.353553385 : f32
    %879 = vector.broadcast %cst_261 : f32 to vector<8x8xf32>
    %880 = arith.mulf %878, %879 : vector<8x8xf32>
    %881 = arith.addf %880, %519 : vector<8x8xf32>
    %cst_262 = arith.constant dense<0xFF800000> : vector<8xf32>
    %882 = vector.multi_reduction <maximumf>, %881, %cst_262 [1] : vector<8x8xf32> to vector<8xf32>
    %883 = vector.shape_cast %882 : vector<8xf32> to vector<8x1xf32>
    %884 = vector.broadcast %883 : vector<8x1xf32> to vector<8x8xf32>
    %885 = arith.subf %881, %884 : vector<8x8xf32>
    %886 = math.exp %885 : vector<8x8xf32>
    %cst_263 = arith.constant dense<0.000000e+00> : vector<8xf32>
    %887 = vector.multi_reduction <add>, %886, %cst_263 [1] : vector<8x8xf32> to vector<8xf32>
    %888 = vector.shape_cast %887 : vector<8xf32> to vector<8x1xf32>
    %889 = tpu.reciprocal %888 {approx = true} : vector<8x1xf32> -> vector<8x1xf32>
    %890 = vector.broadcast %889 : vector<8x1xf32> to vector<8x8xf32>
    %891 = arith.mulf %886, %890 : vector<8x8xf32>
    %892 = arith.truncf %891 : vector<8x8xf32> to vector<8x8xbf16>
    %893 = vector.extract_strided_slice %816 {offsets = [0, 16], sizes = [8, 8], strides = [1, 1]} : vector<8x32xf32> to vector<8x8xf32>
    %894 = arith.truncf %893 : vector<8x8xf32> to vector<8x8xbf16>
    %cst_264 = arith.constant dense<0.000000e+00> : vector<8x8xf32>
    %895 = tpu.matmul %892, %894, %cst_264 {dimension_numbers = #tpu.dot_dimension_numbers<[1], [0], [0], [1], [0, 0, 1, 1], [], []>} : vector<8x8xbf16>, vector<8x8xbf16>, vector<8x8xf32> -> vector<8x8xf32>
    %896 = arith.truncf %895 : vector<8x8xf32> to vector<8x8xbf16>
    %897 = vector.extract_strided_slice %818 {offsets = [16, 0], sizes = [8, 32], strides = [1, 1]} : vector<32x32xbf16> to vector<8x32xbf16>
    %cst_265 = arith.constant dense<0.000000e+00> : vector<8x32xf32>
    %898 = tpu.matmul %896, %897, %cst_265 {dimension_numbers = #tpu.dot_dimension_numbers<[1], [0], [0], [1], [0, 0, 1, 1], [], []>} : vector<8x8xbf16>, vector<8x32xbf16>, vector<8x32xf32> -> vector<8x32xf32>
    %899 = arith.addf %873, %898 : vector<8x32xf32>
    %900 = vector.extract_strided_slice %800 {offsets = [0, 24], sizes = [8, 8], strides = [1, 1]} : vector<8x32xf32> to vector<8x8xf32>
    %901 = arith.truncf %900 : vector<8x8xf32> to vector<8x8xbf16>
    %902 = vector.extract_strided_slice %808 {offsets = [0, 24], sizes = [8, 8], strides = [1, 1]} : vector<8x32xf32> to vector<8x8xf32>
    %903 = arith.truncf %902 : vector<8x8xf32> to vector<8x8xbf16>
    %cst_266 = arith.constant dense<0.000000e+00> : vector<8x8xf32>
    %904 = tpu.matmul %901, %903, %cst_266 {dimension_numbers = #tpu.dot_dimension_numbers<[1], [1], [0], [0], [0, 0, 1, 0], [], []>} : vector<8x8xbf16>, vector<8x8xbf16>, vector<8x8xf32> -> vector<8x8xf32>
    %cst_267 = arith.constant 0.353553385 : f32
    %905 = vector.broadcast %cst_267 : f32 to vector<8x8xf32>
    %906 = arith.mulf %904, %905 : vector<8x8xf32>
    %907 = arith.addf %906, %519 : vector<8x8xf32>
    %cst_268 = arith.constant dense<0xFF800000> : vector<8xf32>
    %908 = vector.multi_reduction <maximumf>, %907, %cst_268 [1] : vector<8x8xf32> to vector<8xf32>
    %909 = vector.shape_cast %908 : vector<8xf32> to vector<8x1xf32>
    %910 = vector.broadcast %909 : vector<8x1xf32> to vector<8x8xf32>
    %911 = arith.subf %907, %910 : vector<8x8xf32>
    %912 = math.exp %911 : vector<8x8xf32>
    %cst_269 = arith.constant dense<0.000000e+00> : vector<8xf32>
    %913 = vector.multi_reduction <add>, %912, %cst_269 [1] : vector<8x8xf32> to vector<8xf32>
    %914 = vector.shape_cast %913 : vector<8xf32> to vector<8x1xf32>
    %915 = tpu.reciprocal %914 {approx = true} : vector<8x1xf32> -> vector<8x1xf32>
    %916 = vector.broadcast %915 : vector<8x1xf32> to vector<8x8xf32>
    %917 = arith.mulf %912, %916 : vector<8x8xf32>
    %918 = arith.truncf %917 : vector<8x8xf32> to vector<8x8xbf16>
    %919 = vector.extract_strided_slice %816 {offsets = [0, 24], sizes = [8, 8], strides = [1, 1]} : vector<8x32xf32> to vector<8x8xf32>
    %920 = arith.truncf %919 : vector<8x8xf32> to vector<8x8xbf16>
    %cst_270 = arith.constant dense<0.000000e+00> : vector<8x8xf32>
    %921 = tpu.matmul %918, %920, %cst_270 {dimension_numbers = #tpu.dot_dimension_numbers<[1], [0], [0], [1], [0, 0, 1, 1], [], []>} : vector<8x8xbf16>, vector<8x8xbf16>, vector<8x8xf32> -> vector<8x8xf32>
    %922 = arith.truncf %921 : vector<8x8xf32> to vector<8x8xbf16>
    %923 = vector.extract_strided_slice %818 {offsets = [24, 0], sizes = [8, 32], strides = [1, 1]} : vector<32x32xbf16> to vector<8x32xbf16>
    %cst_271 = arith.constant dense<0.000000e+00> : vector<8x32xf32>
    %924 = tpu.matmul %922, %923, %cst_271 {dimension_numbers = #tpu.dot_dimension_numbers<[1], [0], [0], [1], [0, 0, 1, 1], [], []>} : vector<8x8xbf16>, vector<8x32xbf16>, vector<8x32xf32> -> vector<8x32xf32>
    %925 = arith.addf %899, %924 : vector<8x32xf32>
    %926 = vector.broadcast %820 : vector<1x32xf32> to vector<8x32xf32>
    %927 = arith.addf %925, %926 : vector<8x32xf32>
    %928 = arith.addf %760, %927 : vector<8x32xf32>
    %929 = vector.extract_strided_slice %764 {offsets = [0, 0, 0], sizes = [1, 32, 32], strides = [1, 1, 1]} : vector<2x32x32xbf16> to vector<1x32x32xbf16>
    %930 = vector.shape_cast %929 : vector<1x32x32xbf16> to vector<32x32xbf16>
    %931 = arith.truncf %493 : vector<1x32xf32> to vector<1x32xbf16>
    %cst_272 = arith.constant dense<0.000000e+00> : vector<1x32xf32>
    %932 = tpu.matmul %931, %930, %cst_272 {dimension_numbers = #tpu.dot_dimension_numbers<[1], [0], [0], [1], [0, 0, 1, 1], [], []>} : vector<1x32xbf16>, vector<32x32xbf16>, vector<1x32xf32> -> vector<1x32xf32>
    %933 = vector.extract_strided_slice %766 {offsets = [6, 0, 0], sizes = [1, 1, 32], strides = [1, 1, 1]} : vector<11x1x32xf32> to vector<1x1x32xf32>
    %934 = vector.shape_cast %933 : vector<1x1x32xf32> to vector<1x32xf32>
    %935 = arith.addf %932, %934 : vector<1x32xf32>
    %936 = vector.extract_strided_slice %764 {offsets = [1, 0, 0], sizes = [1, 32, 32], strides = [1, 1, 1]} : vector<2x32x32xbf16> to vector<1x32x32xbf16>
    %937 = vector.shape_cast %936 : vector<1x32x32xbf16> to vector<32x32xbf16>
    %938 = arith.truncf %935 : vector<1x32xf32> to vector<1x32xbf16>
    %cst_273 = arith.constant dense<0.000000e+00> : vector<1x32xf32>
    %939 = tpu.matmul %938, %937, %cst_273 {dimension_numbers = #tpu.dot_dimension_numbers<[1], [0], [0], [1], [0, 0, 1, 1], [], []>} : vector<1x32xbf16>, vector<32x32xbf16>, vector<1x32xf32> -> vector<1x32xf32>
    %940 = vector.broadcast %939 : vector<1x32xf32> to vector<8x32xf32>
    %941 = arith.addf %928, %940 : vector<8x32xf32>
    %942 = vector.extract_strided_slice %766 {offsets = [7, 0, 0], sizes = [1, 1, 32], strides = [1, 1, 1]} : vector<11x1x32xf32> to vector<1x1x32xf32>
    %943 = vector.shape_cast %942 : vector<1x1x32xf32> to vector<1x32xf32>
    %944 = vector.broadcast %943 : vector<1x32xf32> to vector<8x32xf32>
    %945 = arith.addf %941, %944 : vector<8x32xf32>
    %946 = vector.extract_strided_slice %766 {offsets = [8, 0, 0], sizes = [1, 1, 32], strides = [1, 1, 1]} : vector<11x1x32xf32> to vector<1x1x32xf32>
    %947 = vector.shape_cast %946 : vector<1x1x32xf32> to vector<1x32xf32>
    %948 = vector.extract_strided_slice %766 {offsets = [9, 0, 0], sizes = [1, 1, 32], strides = [1, 1, 1]} : vector<11x1x32xf32> to vector<1x1x32xf32>
    %949 = vector.shape_cast %948 : vector<1x1x32xf32> to vector<1x32xf32>
    %cst_274 = arith.constant dense<0.000000e+00> : vector<8xf32>
    %950 = vector.multi_reduction <add>, %945, %cst_274 [1] : vector<8x32xf32> to vector<8xf32>
    %951 = vector.shape_cast %950 : vector<8xf32> to vector<8x1xf32>
    %cst_275 = arith.constant 3.200000e+01 : f32
    %952 = vector.broadcast %cst_275 : f32 to vector<8x1xf32>
    %953 = arith.divf %951, %952 : vector<8x1xf32>
    %954 = vector.broadcast %953 : vector<8x1xf32> to vector<8x32xf32>
    %955 = arith.subf %945, %954 : vector<8x32xf32>
    %956 = arith.mulf %955, %955 : vector<8x32xf32>
    %cst_276 = arith.constant dense<0.000000e+00> : vector<8xf32>
    %957 = vector.multi_reduction <add>, %956, %cst_276 [1] : vector<8x32xf32> to vector<8xf32>
    %958 = vector.shape_cast %957 : vector<8xf32> to vector<8x1xf32>
    %cst_277 = arith.constant 3.200000e+01 : f32
    %959 = vector.broadcast %cst_277 : f32 to vector<8x1xf32>
    %960 = arith.divf %958, %959 : vector<8x1xf32>
    %961 = vector.broadcast %953 : vector<8x1xf32> to vector<8x32xf32>
    %962 = arith.subf %945, %961 : vector<8x32xf32>
    %cst_278 = arith.constant 9.99999974E-6 : f32
    %963 = vector.broadcast %cst_278 : f32 to vector<8x1xf32>
    %964 = arith.addf %960, %963 : vector<8x1xf32>
    %965 = math.rsqrt %964 : vector<8x1xf32>
    %966 = vector.broadcast %965 : vector<8x1xf32> to vector<8x32xf32>
    %967 = arith.mulf %962, %966 : vector<8x32xf32>
    %968 = vector.broadcast %947 : vector<1x32xf32> to vector<8x32xf32>
    %969 = arith.mulf %967, %968 : vector<8x32xf32>
    %970 = vector.broadcast %949 : vector<1x32xf32> to vector<8x32xf32>
    %971 = arith.addf %969, %970 : vector<8x32xf32>
    %c1_279 = arith.constant 1 : index
    %c0_280 = arith.constant 0 : index
    %c0_281 = arith.constant 0 : index
    %972 = vector.load %arg18[%c1_279, %c0_280, %c0_281] : memref<2x32x128xbf16, #tpu.memory_space<vmem>>, vector<1x32x128xbf16>
    %973 = vector.shape_cast %972 : vector<1x32x128xbf16> to vector<32x128xbf16>
    %974 = arith.truncf %971 : vector<8x32xf32> to vector<8x32xbf16>
    %cst_282 = arith.constant dense<0.000000e+00> : vector<8x128xf32>
    %975 = tpu.matmul %974, %973, %cst_282 {dimension_numbers = #tpu.dot_dimension_numbers<[1], [0], [0], [1], [0, 0, 1, 1], [], []>} : vector<8x32xbf16>, vector<32x128xbf16>, vector<8x128xf32> -> vector<8x128xf32>
    %c1_283 = arith.constant 1 : index
    %c0_284 = arith.constant 0 : index
    %c0_285 = arith.constant 0 : index
    %976 = vector.load %arg19[%c1_283, %c0_284, %c0_285] : memref<2x1x128xf32, #tpu.memory_space<vmem>>, vector<1x1x128xf32>
    %977 = vector.shape_cast %976 : vector<1x1x128xf32> to vector<1x128xf32>
    %978 = vector.broadcast %977 : vector<1x128xf32> to vector<8x128xf32>
    %979 = arith.addf %975, %978 : vector<8x128xf32>
    %cst_286 = arith.constant 5.000000e-01 : f32
    %980 = vector.broadcast %cst_286 : f32 to vector<8x128xf32>
    %981 = arith.mulf %980, %979 : vector<8x128xf32>
    %cst_287 = arith.constant 4.471500e-02 : f32
    %982 = vector.broadcast %cst_287 : f32 to vector<8x128xf32>
    %983 = arith.mulf %982, %979 : vector<8x128xf32>
    %984 = arith.mulf %983, %979 : vector<8x128xf32>
    %985 = arith.mulf %984, %979 : vector<8x128xf32>
    %986 = arith.addf %979, %985 : vector<8x128xf32>
    %cst_288 = arith.constant 0.797884583 : f32
    %987 = vector.broadcast %cst_288 : f32 to vector<8x128xf32>
    %988 = arith.mulf %987, %986 : vector<8x128xf32>
    %989 = math.tanh %988 : vector<8x128xf32>
    %cst_289 = arith.constant 1.000000e+00 : f32
    %990 = vector.broadcast %cst_289 : f32 to vector<8x128xf32>
    %991 = arith.addf %990, %989 : vector<8x128xf32>
    %992 = arith.mulf %981, %991 : vector<8x128xf32>
    %c1_290 = arith.constant 1 : index
    %c0_291 = arith.constant 0 : index
    %c0_292 = arith.constant 0 : index
    %993 = vector.load %arg20[%c1_290, %c0_291, %c0_292] : memref<2x128x32xbf16, #tpu.memory_space<vmem>>, vector<1x128x32xbf16>
    %994 = vector.shape_cast %993 : vector<1x128x32xbf16> to vector<128x32xbf16>
    %995 = arith.truncf %992 : vector<8x128xf32> to vector<8x128xbf16>
    %cst_293 = arith.constant dense<0.000000e+00> : vector<8x32xf32>
    %996 = tpu.matmul %995, %994, %cst_293 {dimension_numbers = #tpu.dot_dimension_numbers<[1], [0], [0], [1], [0, 0, 1, 1], [], []>} : vector<8x128xbf16>, vector<128x32xbf16>, vector<8x32xf32> -> vector<8x32xf32>
    %997 = arith.addf %945, %996 : vector<8x32xf32>
    %998 = vector.extract_strided_slice %766 {offsets = [10, 0, 0], sizes = [1, 1, 32], strides = [1, 1, 1]} : vector<11x1x32xf32> to vector<1x1x32xf32>
    %999 = vector.shape_cast %998 : vector<1x1x32xf32> to vector<1x32xf32>
    %1000 = vector.broadcast %999 : vector<1x32xf32> to vector<8x32xf32>
    %1001 = arith.addf %997, %1000 : vector<8x32xf32>
    %c0_294 = arith.constant 0 : index
    %c0_295 = arith.constant 0 : index
    %c0_296 = arith.constant 0 : index
    %1002 = vector.load %arg21[%c0_294, %c0_295, %c0_296] : memref<2x1x32xf32, #tpu.memory_space<vmem>>, vector<1x1x32xf32>
    %1003 = vector.shape_cast %1002 : vector<1x1x32xf32> to vector<1x32xf32>
    %c1_297 = arith.constant 1 : index
    %c0_298 = arith.constant 0 : index
    %c0_299 = arith.constant 0 : index
    %1004 = vector.load %arg21[%c1_297, %c0_298, %c0_299] : memref<2x1x32xf32, #tpu.memory_space<vmem>>, vector<1x1x32xf32>
    %1005 = vector.shape_cast %1004 : vector<1x1x32xf32> to vector<1x32xf32>
    %cst_300 = arith.constant dense<0.000000e+00> : vector<8xf32>
    %1006 = vector.multi_reduction <add>, %1001, %cst_300 [1] : vector<8x32xf32> to vector<8xf32>
    %1007 = vector.shape_cast %1006 : vector<8xf32> to vector<8x1xf32>
    %cst_301 = arith.constant 3.200000e+01 : f32
    %1008 = vector.broadcast %cst_301 : f32 to vector<8x1xf32>
    %1009 = arith.divf %1007, %1008 : vector<8x1xf32>
    %1010 = vector.broadcast %1009 : vector<8x1xf32> to vector<8x32xf32>
    %1011 = arith.subf %1001, %1010 : vector<8x32xf32>
    %1012 = arith.mulf %1011, %1011 : vector<8x32xf32>
    %cst_302 = arith.constant dense<0.000000e+00> : vector<8xf32>
    %1013 = vector.multi_reduction <add>, %1012, %cst_302 [1] : vector<8x32xf32> to vector<8xf32>
    %1014 = vector.shape_cast %1013 : vector<8xf32> to vector<8x1xf32>
    %cst_303 = arith.constant 3.200000e+01 : f32
    %1015 = vector.broadcast %cst_303 : f32 to vector<8x1xf32>
    %1016 = arith.divf %1014, %1015 : vector<8x1xf32>
    %1017 = vector.broadcast %1009 : vector<8x1xf32> to vector<8x32xf32>
    %1018 = arith.subf %1001, %1017 : vector<8x32xf32>
    %cst_304 = arith.constant 9.99999974E-6 : f32
    %1019 = vector.broadcast %cst_304 : f32 to vector<8x1xf32>
    %1020 = arith.addf %1016, %1019 : vector<8x1xf32>
    %1021 = math.rsqrt %1020 : vector<8x1xf32>
    %1022 = vector.broadcast %1021 : vector<8x1xf32> to vector<8x32xf32>
    %1023 = arith.mulf %1018, %1022 : vector<8x32xf32>
    %1024 = vector.broadcast %1003 : vector<1x32xf32> to vector<8x32xf32>
    %1025 = arith.mulf %1023, %1024 : vector<8x32xf32>
    %1026 = vector.broadcast %1005 : vector<1x32xf32> to vector<8x32xf32>
    %1027 = arith.addf %1025, %1026 : vector<8x32xf32>
    %1028 = arith.truncf %1027 : vector<8x32xf32> to vector<8x32xbf16>
    %c0_305 = arith.constant 0 : index
    %c0_306 = arith.constant 0 : index
    %1029 = vector.load %arg22[%c0_305, %c0_306] : memref<32x128xbf16, #tpu.memory_space<vmem>>, vector<32x128xbf16>
    %cst_307 = arith.constant dense<0.000000e+00> : vector<8x128xf32>
    %1030 = tpu.matmul %1028, %1029, %cst_307 {dimension_numbers = #tpu.dot_dimension_numbers<[1], [0], [0], [1], [0, 0, 1, 1], [], []>} : vector<8x32xbf16>, vector<32x128xbf16>, vector<8x128xf32> -> vector<8x128xf32>
    %c0_308 = arith.constant 0 : index
    %c0_309 = arith.constant 0 : index
    %c0_310 = arith.constant 0 : index
    %1031 = vector.load %arg23[%c0_308, %c0_309, %c0_310] : memref<1x8x128xf32, #tpu.memory_space<vmem>>, vector<1x8x128xf32>
    %1032 = vector.shape_cast %1031 : vector<1x8x128xf32> to vector<8x128xf32>
    %1033 = vector.shape_cast %1030 : vector<8x128xf32> to vector<1x8x128xf32>
    tpu.vector_store %arg23[%c0_308, %c0_309, %c0_310], %1033 {strides = array<i32>} : memref<1x8x128xf32, #tpu.memory_space<vmem>>, vector<1x8x128xf32>,
    return
  }
  func.func @transform_0(%arg0: i32) -> (i32, i32, i32) {
    %c0_i32 = arith.constant 0 : i32
    %c0_i32_0 = arith.constant 0 : i32
    %c0_i32_1 = arith.constant 0 : i32
    return %arg0, %c0_i32, %c0_i32_0 : i32, i32, i32
  }
  func.func @transform_1(%arg0: i32) -> (i32, i32, i32) {
    %c0_i32 = arith.constant 0 : i32
    %c0_i32_0 = arith.constant 0 : i32
    %c0_i32_1 = arith.constant 0 : i32
    return %arg0, %c0_i32, %c0_i32_0 : i32, i32, i32
  }
  func.func @transform_2(%arg0: i32) -> (i32, i32, i32) {
    %c0_i32 = arith.constant 0 : i32
    %c0_i32_0 = arith.constant 0 : i32
    %c0_i32_1 = arith.constant 0 : i32
    return %arg0, %c0_i32, %c0_i32_0 : i32, i32, i32
  }
  func.func @transform_3(%arg0: i32) -> (i32, i32) {
    %c0_i32 = arith.constant 0 : i32
    %c0_i32_0 = arith.constant 0 : i32
    %c0_i32_1 = arith.constant 0 : i32
    return %c0_i32, %c0_i32_0 : i32, i32
  }
  func.func @transform_4(%arg0: i32) -> (i32, i32) {
    %c0_i32 = arith.constant 0 : i32
    %c0_i32_0 = arith.constant 0 : i32
    %c0_i32_1 = arith.constant 0 : i32
    return %c0_i32, %c0_i32_0 : i32, i32
  }
  func.func @transform_5(%arg0: i32) -> (i32, i32, i32, i32) {
    %c0_i32 = arith.constant 0 : i32
    %c0_i32_0 = arith.constant 0 : i32
    %c0_i32_1 = arith.constant 0 : i32
    %c0_i32_2 = arith.constant 0 : i32
    %c0_i32_3 = arith.constant 0 : i32
    return %c0_i32, %c0_i32_0, %c0_i32_1, %c0_i32_2 : i32, i32, i32, i32
  }
  func.func @transform_6(%arg0: i32) -> (i32, i32, i32, i32) {
    %c0_i32 = arith.constant 0 : i32
    %c0_i32_0 = arith.constant 0 : i32
    %c0_i32_1 = arith.constant 0 : i32
    %c0_i32_2 = arith.constant 0 : i32
    %c0_i32_3 = arith.constant 0 : i32
    return %c0_i32, %c0_i32_0, %c0_i32_1, %c0_i32_2 : i32, i32, i32, i32
  }
  func.func @transform_7(%arg0: i32) -> (i32, i32, i32) {
    %c0_i32 = arith.constant 0 : i32
    %c0_i32_0 = arith.constant 0 : i32
    %c0_i32_1 = arith.constant 0 : i32
    %c0_i32_2 = arith.constant 0 : i32
    return %c0_i32, %c0_i32_0, %c0_i32_1 : i32, i32, i32
  }
  func.func @transform_8(%arg0: i32) -> (i32, i32, i32) {
    %c0_i32 = arith.constant 0 : i32
    %c0_i32_0 = arith.constant 0 : i32
    %c0_i32_1 = arith.constant 0 : i32
    %c0_i32_2 = arith.constant 0 : i32
    return %c0_i32, %c0_i32_0, %c0_i32_1 : i32, i32, i32
  }
  func.func @transform_9(%arg0: i32) -> (i32, i32, i32) {
    %c0_i32 = arith.constant 0 : i32
    %c0_i32_0 = arith.constant 0 : i32
    %c0_i32_1 = arith.constant 0 : i32
    %c0_i32_2 = arith.constant 0 : i32
    return %c0_i32, %c0_i32_0, %c0_i32_1 : i32, i32, i32
  }
  func.func @transform_10(%arg0: i32) -> (i32, i32, i32) {
    %c0_i32 = arith.constant 0 : i32
    %c0_i32_0 = arith.constant 0 : i32
    %c0_i32_1 = arith.constant 0 : i32
    %c0_i32_2 = arith.constant 0 : i32
    return %c0_i32, %c0_i32_0, %c0_i32_1 : i32, i32, i32
  }
  func.func @transform_11(%arg0: i32) -> (i32, i32) {
    %c0_i32 = arith.constant 0 : i32
    %c0_i32_0 = arith.constant 0 : i32
    %c0_i32_1 = arith.constant 0 : i32
    return %c0_i32, %c0_i32_0 : i32, i32
  }
  func.func @transform_12(%arg0: i32) -> (i32, i32) {
    %c0_i32 = arith.constant 0 : i32
    %c0_i32_0 = arith.constant 0 : i32
    %c0_i32_1 = arith.constant 0 : i32
    return %c0_i32, %c0_i32_0 : i32, i32
  }
  func.func @transform_13(%arg0: i32) -> (i32, i32) {
    %c0_i32 = arith.constant 0 : i32
    %c0_i32_0 = arith.constant 0 : i32
    %c0_i32_1 = arith.constant 0 : i32
    return %c0_i32, %c0_i32_0 : i32, i32
  }
  func.func @transform_14(%arg0: i32) -> (i32, i32, i32, i32) {
    %c0_i32 = arith.constant 0 : i32
    %c0_i32_0 = arith.constant 0 : i32
    %c0_i32_1 = arith.constant 0 : i32
    %c0_i32_2 = arith.constant 0 : i32
    %c0_i32_3 = arith.constant 0 : i32
    return %c0_i32, %c0_i32_0, %c0_i32_1, %c0_i32_2 : i32, i32, i32, i32
  }
  func.func @transform_15(%arg0: i32) -> (i32, i32, i32, i32) {
    %c0_i32 = arith.constant 0 : i32
    %c0_i32_0 = arith.constant 0 : i32
    %c0_i32_1 = arith.constant 0 : i32
    %c0_i32_2 = arith.constant 0 : i32
    %c0_i32_3 = arith.constant 0 : i32
    return %c0_i32, %c0_i32_0, %c0_i32_1, %c0_i32_2 : i32, i32, i32, i32
  }
  func.func @transform_16(%arg0: i32) -> (i32, i32, i32, i32) {
    %c0_i32 = arith.constant 0 : i32
    %c0_i32_0 = arith.constant 0 : i32
    %c0_i32_1 = arith.constant 0 : i32
    %c0_i32_2 = arith.constant 0 : i32
    %c0_i32_3 = arith.constant 0 : i32
    return %c0_i32, %c0_i32_0, %c0_i32_1, %c0_i32_2 : i32, i32, i32, i32
  }
  func.func @transform_17(%arg0: i32) -> (i32, i32, i32) {
    %c0_i32 = arith.constant 0 : i32
    %c0_i32_0 = arith.constant 0 : i32
    %c0_i32_1 = arith.constant 0 : i32
    %c0_i32_2 = arith.constant 0 : i32
    return %c0_i32, %c0_i32_0, %c0_i32_1 : i32, i32, i32
  }
  func.func @transform_18(%arg0: i32) -> (i32, i32, i32) {
    %c0_i32 = arith.constant 0 : i32
    %c0_i32_0 = arith.constant 0 : i32
    %c0_i32_1 = arith.constant 0 : i32
    %c0_i32_2 = arith.constant 0 : i32
    return %c0_i32, %c0_i32_0, %c0_i32_1 : i32, i32, i32
  }
  func.func @transform_19(%arg0: i32) -> (i32, i32, i32) {
    %c0_i32 = arith.constant 0 : i32
    %c0_i32_0 = arith.constant 0 : i32
    %c0_i32_1 = arith.constant 0 : i32
    %c0_i32_2 = arith.constant 0 : i32
    return %c0_i32, %c0_i32_0, %c0_i32_1 : i32, i32, i32
  }
  func.func @transform_20(%arg0: i32) -> (i32, i32, i32) {
    %c0_i32 = arith.constant 0 : i32
    %c0_i32_0 = arith.constant 0 : i32
    %c0_i32_1 = arith.constant 0 : i32
    %c0_i32_2 = arith.constant 0 : i32
    return %c0_i32, %c0_i32_0, %c0_i32_1 : i32, i32, i32
  }
  func.func @transform_21(%arg0: i32) -> (i32, i32) {
    %c0_i32 = arith.constant 0 : i32
    %c0_i32_0 = arith.constant 0 : i32
    %c0_i32_1 = arith.constant 0 : i32
    return %c0_i32, %c0_i32_0 : i32, i32
  }
  func.func @transform_22(%arg0: i32) -> (i32, i32, i32) {
    %c0_i32 = arith.constant 0 : i32
    %c0_i32_0 = arith.constant 0 : i32
    %c0_i32_1 = arith.constant 0 : i32
    return %arg0, %c0_i32, %c0_i32_0 : i32, i32, i32
  }
}

</mosaic_0001>

<bundles_post_ra>
// kernel: vit_gpt2_captioner.1
= control target key start
LH: loop header
LB: loop body
LE: loop exit
PB: predicated region body
PF: predicated region fallthrough
CT: control target
= control target key end

     0   :  { %s8490_s0 = inlined_call_operand.vmem [shape: f32[2,4,192], index: 0, kind: input, shape index: {}]   ;;  %s8491_s1 = inlined_call_operand.vmem [shape: s32[2,8,1], index: 1, kind: input, shape index: {}]   ;;  %s8492_s2 = inlined_call_operand.vmem [shape: f32[2,1,8], index: 2, kind: input, shape index: {}]   ;;  %s8493_s3 = inlined_call_operand.vmem [shape: bf16[192,32], index: 3, kind: input, shape index: {}]   ;;  %s8494_s4 = inlined_call_operand.vmem [shape: f32[8,32], index: 4, kind: input, shape index: {}]   ;;  %s8495_s5 = inlined_call_operand.vmem [shape: bf16[2,4,32,32], index: 5, kind: input, shape index: {}]   ;;  %s8496_s6 = inlined_call_operand.vmem [shape: f32[2,9,1,32], index: 6, kind: input, shape index: {}]   ;;  %s8497_s7 = inlined_call_operand.vmem [shape: bf16[2,32,64], index: 7, kind: input, shape index: {}]   ;;  %s8498_s8 = inlined_call_operand.vmem [shape: f32[2,1,64], index: 8, kind: input, shape index: {}]   ;;  %s8499_s9 = inlined_call_operand.vmem [shape: bf16[2,64,32], index: 9, kind: input, shape index: {}]   ;;  %s8500_s10 = inlined_call_operand.vmem [shape: f32[2,1,32], index: 10, kind: input, shape index: {}]   ;;  %s8501_s11 = inlined_call_operand.vmem [shape: f32[33,32], index: 11, kind: input, shape index: {}]   ;;  %s8502_s12 = inlined_call_operand.vmem [shape: bf16[64,32], index: 12, kind: input, shape index: {}]   ;;  %s8503_s13 = inlined_call_operand.vmem [shape: f32[8,32], index: 13, kind: input, shape index: {}]   ;;  %s8504_s14 = inlined_call_operand.vmem [shape: bf16[2,4,32,32], index: 14, kind: input, shape index: {}]   ;;  %s8505_s15 = inlined_call_operand.vmem [shape: bf16[2,2,32,32], index: 15, kind: input, shape index: {}]   ;;  %s8506_s16 = inlined_call_operand.vmem [shape: f32[2,11,1,32], index: 16, kind: input, shape index: {}]   ;;  %s8507_s17 = inlined_call_operand.vmem [shape: bf16[2,32,128], index: 17, kind: input, shape index: {}]   ;;  %s8508_s18 = inlined_call_operand.vmem [shape: f32[2,1,128], index: 18, kind: input, shape index: {}]   ;;  %s8509_s19 = inlined_call_operand.vmem [shape: bf16[2,128,32], index: 19, kind: input, shape index: {}]   ;;  %s8510_s20 = inlined_call_operand.vmem [shape: f32[2,1,32], index: 20, kind: input, shape index: {}]   ;;  %s8511_s21 = inlined_call_operand.vmem [shape: bf16[32,128], index: 21, kind: input, shape index: {}]   ;;  %s8512_s22 = inlined_call_operand.hbm [shape: f32[2,8,128], index: 22, kind: output, shape index: {}]  }
   0x1   :  { %8533 = sst [smem:[#allocation12_spill]] %s8490_s0 }
   0x2   :  { %8534 = sst [smem:[#allocation13_spill]] %s8491_s1 }
   0x3   :  { %8535 = sst [smem:[#allocation14_spill]] %s8492_s2 }
   0x4   :  { %8536 = sst [smem:[#allocation15_spill]] %s8493_s3 }
   0x5   :  { %8537 = sst [smem:[#allocation16_spill]] %s8494_s4 }
   0x6   :  { %8538 = sst [smem:[#allocation17_spill]] %s8495_s5 }
   0x7   :  { %8539 = sst [smem:[#allocation18_spill]] %s8496_s6 }
   0x8   :  { %8540 = sst [smem:[#allocation19_spill]] %s8497_s7 }
   0x9   :  { %8541 = sst [smem:[#allocation20_spill]] %s8498_s8 }
   0xa   :  { %8542 = sst [smem:[#allocation21_spill]] %s8510_s20 }
   0xb   :  { %8543 = sst [smem:[#allocation22_spill]] %s8512_s22 }
   0xc   :  { %27 = vsyncpa [#allocation3], 0 }
   0xd   :  { %29 = vsyncpa [#allocation3 + $0x1], 0  ;;  %s7283_s3 = smov 0   ;;  %s7285_s28 = smov 0  }
   0xe   :  { %s7287_s29 = smov 0   ;;  %s7289_s30 = smov 0  }
   0xf LB: > { %8544 = sst [smem:[#allocation5_spill]] %s7146_s3  ;;  %s7304_s4 = sadd.s32 4294967295, %s7158_s30   ;;  %s7158_s30 = sphi %s7289_s30, %s8573_s30   ;;  %s7154_s29 = sphi %s7287_s29, %s8575_s29   ;;  %s7150_s28 = sphi %s7285_s28, %s8577_s28   ;;  %s7146_s3 = sphi %s7283_s3, %s8576_s3  }
  0x10   : > { %8545 = sst [smem:[#allocation6_spill]] %s7154_s29  ;;  %s5826_s0 = sadd.s32 4294967294, %s7158_s30  }
  0x11   : > { %8546 = sst [smem:[#allocation7_spill]] %s7158_s30  ;;  %s7308_s23 = sadd.s32 1, %s7158_s30  }
  0x12   : > { %8547 = sst [smem:[#allocation8_spill]] %s7308_s23  ;;  %s519_s1 = sadd.s32 1, %s7154_s29 }
  0x13   : > { %s516_s5 = ssub.s32 %s7158_s30, %s7308_s23  ;;  %p529_p0 = scmp.ne.s32.totalorder %s7154_s29, %s7150_s28 }
  0x14   : > { %p517_p1 = scmp.eq.s32.totalorder %s516_s5, 0  ;;  %p530_p2 = scmp.eq.s32.totalorder %s7304_s4, 1 }
  0x15   : > { %p535_p3 = scmp.ne.s32.totalorder %s7150_s28, %s7146_s3  ;;  %p536_p4 = scmp.eq.s32.totalorder %s5826_s0, 1 }
  0x16   : > { %s7319_s24 = scalar_select %p517_p1, %s7154_s29, %s519_s1  }
  0x17   : > { %p7321_p5 = por %p530_p2, %p529_p0  ;;  %p7325_p6 = por %p536_p4, %p535_p3 }
  0x18   : > { %8548 = sst [smem:[#allocation9_spill]] %s7319_s24  ;;  %p5829_p7 = scmp.ge.s32.totalorder %s7158_s30, 1 }
  0x19   : > { %s8549_s6 = scalar_select %p7321_p5, 1, 0 }
  0x1a   : > { %s8551_s25 = scalar_select %p7325_p6, 1, 0 }
  0x1b   : > { %8550 = sst [smem:[#allocation10_spill]] %s8549_s6  ;;  %p632_p8 = scmp.lt.s32.totalorder %s7158_s30, 3 }
  0x1c   : > { %8552 = sst [smem:[#allocation11_spill]] %s8551_s25 }
  0x1d   : > { %p633_p9 = pnand %p5829_p7, %p632_p8 }
  0x1e   : > { %s8553_s27 = sld [smem:[#allocation15_spill]] (!%p633_p9)  ;;  %v7160_v1 = vmov (!%p633_p9), 0   ;;  %p701_p10 = scmp.lt.s32.totalorder (!%p633_p9), %s7304_s4, 1  ;;  %v869_v3 = vlaneseq (!%p633_p9)  ;;  %vm816_vm1 = vcmask (!%p633_p9), 523264   ;;  %v7161_v12 = vmov (!%p633_p9), -1e+09  }
  0x1f   : > { %636 = sbr.rel (%p633_p9) target bundleno = 16594 (0x40d2), region = 108  ;;  %820 = vmatprep.subr.bf16.mxu0 (!%p633_p9), %v7160_v1  ;;  %6919 = vset.pattern.permute.xlu1 (!%p633_p9), %v7160_v1  ;;  %s8554_s29 = sld [smem:[#allocation12_spill]] (!%p633_p9)  ;;  %vm863_vm2 = vcmask (!%p633_p9), 1040384   ;;  %vm865_vm3 = vcmask (!%p633_p9), 1044480   ;;  %vm898_vm4 = vcmask (!%p633_p9), 261120   ;;  %v7162_v45 = vmov (!%p633_p9), 0.0  }
  0x20   : > { %6920 = vset.pattern.permute.xlu0 (!%p633_p9), %v7160_v1  ;;  %v7345_v5 = vand.u32 (!%p633_p9), 127, %v869_v3  ;;  %v3175_v6 = vshrl.u32 (!%p633_p9), %v869_v3, 7  ;;  %s8555_s30 = sld [smem:[#allocation14_spill]] (!%p633_p9)  ;;  %s8557_s25 = sld [smem:[#allocation17_spill]] (!%p633_p9)  ;;  %6341 = vmatprep.subr.bf16.mxu1 (!%p633_p9), %v7162_v45  ;;  %vm7163_vm5 = vmmov (!%p633_p9), 0   ;;  %vm1107_vm6 = vcmask (!%p633_p9), 64512  }
  0x21   : > { %6345 = vmatprep.mubr.msk.bf16.mxu1 (!%p633_p9), %vm7163_vm5, %v7162_v45  ;;  %s8531_s6 = smov (!%p633_p9), 120   ;;  %vm1172_vm7 = vcmask (!%p633_p9), 1043456   ;;  %s8529_s26 = smov (!%p633_p9), 112  }
  0x22   : > { %vm3176_vm0 = vcmp.ge.s32.totalorder (!%p633_p9), %v3175_v6, %v7345_v5  ;;  %v7364_v15 = vsub.s32 (!%p633_p9), 0, %v3175_v6  ;;  %vm871_vm8 = vcmp.lt.s32.totalorder (!%p633_p9), %v7345_v5, 5  ;;  %s8560_s7 = sld [smem:[#allocation19_spill]] (!%p633_p9)  ;;  %s8561_s8 = sld [smem:[#allocation20_spill]] (!%p633_p9) }
  0x23   : > { %v3177_v13 = vsel (!%p633_p9), %vm3176_vm0, 0.0, %v7161_v12  ;;  %s8563_s1 = sld [smem:[#allocation13_spill]] (!%p633_p9) }
  0x24   : > { %v6921_v0 = vld [vmem:[%s8553_s27] sm:$0xff] (!%p633_p9)   ;;  %v6922_v2 = vld [vmem:[%s8553_s27 + $0x8] sm:$0xff] (!%p633_p9)   ;;  %v6923_v4 = vld [vmem:[%s8553_s27 + $0x10] sm:$0xff] (!%p633_p9)  }
  0x25   : > { %821 = vmatpush1.bf16.msra.mxu0 (!%p633_p9), %v6921_v0  ;;  %v6924_v7 = vld [vmem:[%s8553_s27 + $0x18] sm:$0xff] (!%p633_p9)   ;;  %v6925_v10 = vld [vmem:[%s8553_s27 + $0x20] sm:$0xff] (!%p633_p9)   ;;  %v6926_v18 = vld [vmem:[%s8553_s27 + $0x28] sm:$0xff] (!%p633_p9)  }
  0x26   : > { %822 = vmatprep.subr.bf16.mxu0 %v7160_v1  ;;  %s7339_s5 = scalar_select %p701_p10, %s7304_s4, 1  ;;  %v6927_v21 = vld [vmem:[%s8553_s27 + $0x30] sm:$0xff]   ;;  %v6928_v22 = vld [vmem:[%s8553_s27 + $0x38] sm:$0xff]   ;;  %v6929_v23 = vld [vmem:[%s8553_s27 + $0x40] sm:$0xff]  }
  0x27   : > { %v6930_v24 = vld [vmem:[%s8553_s27 + $0x48] sm:$0xff]   ;;  %v6931_v25 = vld [vmem:[%s8553_s27 + $0x50] sm:$0xff]   ;;  %v6932_v26 = vld [vmem:[%s8553_s27 + $0x58] sm:$0xff]  }
  0x28   : > { %s8526_s24 = sshll.u32 %s7339_s5, 3  ;;  %s712_s22 = scalar_lea.vmem %s8555_s30, %s7339_s5  ;;  %v6934_v43 = vld [vmem:[%s8557_s25] sm:$0xff]   ;;  %v6935_v44 = vld [vmem:[%s8557_s25 + $0x10] sm:$0xff]   ;;  %v6936_v46 = vld [vmem:[%s8557_s25 + $0x8] sm:$0xff]  }
  0x29   : > { %823 = vmatpush1.bf16.msra.mxu0 %v6922_v2  ;;  %s705_s23 = scalar_lea.vmem %s8554_s29, %s8526_s24  ;;  %v3090_v9 = vld [vmem:[%s712_s22] sm:$0x1]  ;;  %s8556_s30 = sld [smem:[#allocation16_spill]]  ;;  %6342 = vmatpush3.bf16.msra.mxu1 %v6935_v44  ;;  %v6937_v47 = vld [vmem:[%s8557_s25 + $0x18] sm:$0xff]   ;;  %v6939_v59 = vld [vmem:[%s8557_s25 + $0x28] sm:$0xff]  }
  0x2a   : > { %824 = vmatprep.subr.bf16.mxu0 %v7160_v1  ;;  %v714_v8 = vld [vmem:[%s705_s23] sm:$0xff]  ;;  %v3178_v14 = vsub.f32 1.0, %v3090_v9  ;;  %6343 = vmatprep.subr.bf16.mxu1 %v7162_v45  ;;  %s8527_s29 = smov 104   ;;  %s8565_s22 = smov 112  }
  0x2b   : > { %v740_v11 = vcombine.high %v714_v8, %v714_v8  ;;  %v742_v27 = vpack.c.bf16 %v714_v8, %v714_v8  ;;  %v6938_v57 = vld [vmem:[%s8557_s25 + $0x20] sm:$0xff]  }
  0x2c   : > { %v3179_v17 = vmul.f32 -1e+09, %v3178_v14 }
  0x2d   : > { %825 = vmatpush1.bf16.msra.mxu0 %v6923_v4  ;;  %v743_v16 = vpack.c.bf16 %v740_v11, %v740_v11  ;;  %6344 = vmatpush3.bf16.msra.mxu1 %v6937_v47 }
  0x2e   : > { %826 = vmatprep.subr.bf16.mxu0 %v7160_v1  ;;  %v3184_v19 = vrot.slane %v3179_v17, %v7364_v15  ;;  %6349 = vmatprep.subr.bf16.mxu1 %v7162_v45 }
  0x2f   : > { %5846 = vmatprep.mubr.msk.bf16.mxu0 %vm816_vm1, %v743_v16  ;;  %v867_v32 = vld [vmem:[%s8556_s30] sm:$0xff]  ;;  %s8558_s30 = sld [smem:[#allocation18_spill]] }
  0x30   : > { %v7371_v20 = vadd.f32 %v3184_v19, %v3177_v13 }
  0x31   : > { %827 = vmatpush1.bf16.msra.mxu0 %v6924_v7 }
  0x32   : > { %828 = vmatprep.subr.bf16.mxu0 %v7160_v1 }
  0x35   : > { %829 = vmatpush1.bf16.msra.mxu0 %v6925_v10  ;;  %s8559_s23 = smov %s8558_s30  ;;  %v5847_v52 = vld [vmem:[%s8558_s30] ss:$0 sm:$0xff]  ;;  %s8562_s30 = sshll.u32 %s7339_s5, 3 }
  0x36   : > { %830 = vmatprep.subr.bf16.mxu0 %v7160_v1  ;;  %v5848_v54 = vld [vmem:[%s8559_s23 + $0x1] ss:$0 sm:$0xff]  ;;  %v5853_v60 = vld [vmem:[%s8559_s23 + $0x3] ss:$0 sm:$0xff]  ;;  %v5849_v8 = vld [vmem:[%s8559_s23 + $0x2] ss:$0 sm:$0xff]  ;;  %s709_s2 = scalar_lea.vmem %s8563_s1, %s8562_s30 }
  0x37   : > { %v5857_v10 = vld [vmem:[%s8559_s23 + $0x4] ss:$0 sm:$0xff] }
  0x39   : > { %831 = vmatpush1.bf16.msra.mxu0 %v6926_v18 }
  0x3a   : > { %832 = vmatprep.subr.bf16.mxu0 %v7160_v1 }
  0x3d   : > { %833 = vmatpush1.bf16.msra.mxu0 %v6927_v21 }
  0x3e   : > { %834 = vmatprep.subr.bf16.mxu0 %v7160_v1 }
  0x41   : > { %835 = vmatpush1.bf16.msra.mxu0 %v6928_v22 }
  0x42   : > { %836 = vmatprep.subr.bf16.mxu0 %v7160_v1 }
  0x45   : > { %837 = vmatpush1.bf16.msra.mxu0 %v6929_v23  ;;  %v7474_v23 = vsel %vm871_vm8, 0.0, %v7161_v12 }
  0x46   : > { %838 = vmatprep.subr.bf16.mxu0 %v7160_v1 }
  0x49   : > { %839 = vmatpush1.bf16.msra.mxu0 %v6930_v24 }
  0x4a   : > { %840 = vmatprep.subr.bf16.mxu0 %v7160_v1 }
  0x4d   : > { %841 = vmatpush1.bf16.msra.mxu0 %v6931_v25 }
  0x4e   : > { %842 = vmatprep.subr.bf16.mxu0 %v7160_v1 }
  0x51   : > { %843 = vmatpush1.bf16.msra.mxu0 %v6932_v26 }
  0x52   : > { %6333 = vmatprep.subr.bf16.mxu0 %v7162_v45 }
  0x54   : > { %853 = vmatmul.mubr.bf16.vlgmr.msra.gmra.mrb[0].mxu0 %v742_v27 }
  0x55   : > { %6334 = vmatpush3.bf16.msra.mxu0 %v6934_v43  ;;  %6337 = vmatprep.mubr.msk.bf16.mxu0 %vm7163_vm5, %v7162_v45 }
  0x56   : > { %6335 = vmatprep.subr.bf16.mxu0 %v7162_v45 }
  0x59   : > { %6336 = vmatpush3.bf16.msra.mxu0 %v6936_v46 }
  0x5a   : > { %6375 = vmatprep.subr.bf16.mxu0 %v7162_v45 }
 0x127   : > { %v854_v28 = vpop.f32.mrb[0].mxu0 }
 0x128   : > { %v861_v29 = vrot.slane %v854_v28, 7  ;;  %v856_v30 = vpop.f32.mrb[1].mxu0 }
 0x129   : > { %v857_v31 = vpop.f32.mrb[2].mxu0 }
 0x12a   : > { %v864_v33 = vsel %vm863_vm2, 0.0, %v861_v29  ;;  %v858_v34 = vpop.f32.mrb[3].mxu0 }
 0x12b   : > { %v866_v35 = vsel %vm865_vm3, %v864_v33, 0.0 }
 0x12c   : > { %v7394_v36 = vadd.f32 %v867_v32, %v866_v35 }
 0x12e   : > { %v899_v37 = vsel %vm898_vm4, %v7394_v36, 0.0 }
 0x12f   : > { %900 = vadd.xlane.f32.xlu0 %v899_v37 }
 0x1bc   : > { %v901_v38 = vpop.xlane.xlu0 %900 }
 0x1bd   : > { %v903_v39 = vmul.f32 0.03125, %v901_v38 }
 0x1bf   : > { %v904_v40 = vsub.f32 %v7394_v36, %v903_v39 }
 0x1c1   : > { %v905_v41 = vmul.f32 %v904_v40, %v904_v40 }
 0x1c3   : > { %v906_v42 = vsel %vm898_vm4, %v905_v41, 0.0 }
 0x1c4   : > { %907 = vadd.xlane.f32.xlu0 %v906_v42 }
 0x251   : > { %v908_v48 = vpop.xlane.xlu0 %907 }
 0x252   : > { %v909_v49 = vmul.f32 0.03125, %v908_v48 }
 0x254   : > { %v910_v50 = vadd.f32 1e-12, %v909_v49 }
 0x256   : > { %7004 = vrsqrt.f32 %v910_v50 }
 0x260   : > { %v7005_v51 = vpop.eup %7004 }
 0x261   : > { %v912_v53 = vmul.f32 %v7005_v51, %v904_v40 }
 0x263   : > { %v919_v55 = vmul.f32 %v5847_v52, %v912_v53 }
 0x265   : > { %v926_v56 = vadd.f32 %v5848_v54, %v919_v55 }
 0x267   : > { %v927_v58 = vpack.c.bf16 %v926_v56, %v926_v56 }
 0x269   : > { %6338 = vmatmul.mubr.msk.bf16.vlgmr.msra.gmra.mrb[4].mxu0 %vm898_vm4, %v927_v58  ;;  %6346 = vmatmul.mubr.msk.bf16.vlgmr.msra.gmra.mrb[0].mxu1 %vm898_vm4, %v927_v58 }
 0x26a   : > { %6350 = vmatpush3.bf16.msra.mxu1 %v6938_v57  ;;  %6353 = vmatprep.mubr.msk.bf16.mxu1 %vm7163_vm5, %v7162_v45 }
 0x26b   : > { %6351 = vmatprep.subr.bf16.mxu1 %v7162_v45  ;;  %6377 = vmatprep.mubr.msk.bf16.mxu0 %vm7163_vm5, %v7162_v45 }
 0x26e   : > { %6352 = vmatpush3.bf16.msra.mxu1 %v6939_v59 }
 0x26f   : > { %6357 = vmatprep.subr.bf16.mxu1 %v7162_v45 }
 0x271   : > { %6354 = vmatmul.mubr.msk.bf16.vlgmr.msra.gmra.mrb[4].mxu1 %vm898_vm4, %v927_v58 }
 0x272   : > { %6359 = vmatprep.mubr.msk.bf16.mxu1 %vm7163_vm5, %v7162_v45 }
 0x33c   : > { %v983_v61 = vpop.f32.mrb[4].mxu0  ;;  %v1041_v62 = vpop.f32.mrb[0].mxu1 }
 0x33d   : > { %v1042_v63 = vadd.f32 %v5853_v60, %v1041_v62  ;;  %v6339_v0 = vpop.f32.mrb[5].mxu0  ;;  %v6347_v1 = vpop.f32.mrb[1].mxu1  ;;  %v984_v11 = vadd.f32 %v5849_v8, %v983_v61  ;;  %v886_v60 = vld [vmem:[%s8557_s25 + $0x34] sm:$0xf] }
 0x33e   : > { %v986_v2 = vpop.f32.mrb[6].mxu0  ;;  %v1044_v3 = vpop.f32.mrb[2].mxu1  ;;  %v1337_v61 = vsel %vm1172_vm7, %v886_v60, 0 }
 0x33f   : > { %v7448_v4 = vpack.c.bf16 %v1042_v63, %v1042_v63  ;;  %v6340_v6 = vpop.f32.mrb[7].mxu0  ;;  %v6348_v7 = vpop.f32.mrb[3].mxu1  ;;  %v7461_v18 = vpack.c.bf16 %v984_v11, %v984_v11  ;;  %v885_v2 = vld [vmem:[%s8557_s25 + $0x30] sm:$0xf] }
 0x340   : > { %v1383_v7 = vsel %vm1172_vm7, %v885_v2, 0 }
 0x341   : > { %1221 = vrot.lane.b32.xlu0 %v7448_v4, %s8531_s6  ;;  %v1112_v9 = vsel %vm1107_vm6, %v7448_v4, 0 }
 0x342   : > { %6358 = vmatpush3.bf16.xpose.msra.mxu1 %v1112_v9 }
 0x343   : > { %6363 = vmatprep.subr.bf16.mxu1 %v7162_v45 }
 0x344   : > { %v1099_v13 = vpop.f32.mrb[4].mxu1 }
 0x345   : > { %v1100_v14 = vadd.f32 %v5857_v10, %v1099_v13  ;;  %v6355_v16 = vpop.f32.mrb[5].mxu1 }
 0x346   : > { %v1102_v17 = vpop.f32.mrb[6].mxu1 }
 0x347   : > { %v7463_v19 = vpack.c.bf16 %v1100_v14, %v1100_v14  ;;  %v6356_v21 = vpop.f32.mrb[7].mxu1 }
 0x349   : > { %6360 = vmatmul.mubr.msk.bf16.vlgmr.msra.gmra.mrb[8].mxu1 %vm1107_vm6, %v7461_v18  ;;  %v1174_v22 = vsel %vm1172_vm7, %v7463_v19, 0 }
 0x34a   : > { %6364 = vmatpush3.bf16.msra.mxu1 %v1174_v22  ;;  %6365 = vmatprep.mubr.msk.bf16.mxu1 %vm7163_vm5, %v7162_v45 }
 0x34b   : > { %6369 = vmatprep.subr.bf16.mxu1 %v7162_v45 }
 0x3b3   : > { %v1222_v39 = vpop.permute.xlu0 %1221 }
 0x3b4   : > { %v1227_v41 = vsel %vm1107_vm6, %v1222_v39, 0 }
 0x41c   : > { %v1148_v24 = vpop.f32.mrb[8].mxu1 }
 0x41d   : > { %v1154_v25 = vmul.f32 0.35355338, %v1148_v24  ;;  %v6361_v26 = vpop.f32.mrb[9].mxu1 }
 0x41e   : > { %v1151_v27 = vpop.f32.mrb[10].mxu1 }
 0x41f   : > { %v6362_v28 = vpop.f32.mrb[11].mxu1  ;;  %v1155_v29 = vadd.f32 %v1154_v25, %v7474_v23 }
 0x421   : > { %v1156_v30 = vsel %vm1107_vm6, %v1155_v29, -inf }
 0x422   : > { %1157 = vmax.xlane.f32.xlu1 %v1156_v30 }
 0x4af   : > { %v1158_v31 = vpop.xlane.xlu1 %1157 }
 0x4b0   : > { %v1159_v32 = vsub.f32 %v1155_v29, %v1158_v31 }
 0x4b2   : > { %v1160_v33 = vmul.f32 1.442695, %v1159_v32 }
 0x4b4   : > { %7006 = vpow2.f32 %v1160_v33 }
 0x4be   : > { %v7007_v34 = vpop.eup %7006 }
 0x4bf   : > { %v1162_v35 = vsel %vm1107_vm6, %v7007_v34, 0.0 }
 0x4c0   : > { %1163 = vadd.xlane.f32.xlu1 %v1162_v35 }
 0x4d1   : > { %1218 = vrot.lane.b32.xlu1 %v7461_v18, %s8531_s6 }
 0x54d   : > { %v1164_v12 = vpop.xlane.xlu1 %1163 }
 0x54e   : > { %7008 = vrcp.f32 %v1164_v12 }
 0x551   : > { %v1219_v42 = vpop.permute.xlu1 %1218 }
 0x558   : > { %v7009_v37 = vpop.eup %7008 }
 0x559   : > { %v1166_v38 = vmul.f32 %v7009_v37, %v7007_v34 }
 0x55b   : > { %v1167_v40 = vpack.c.bf16 %v1166_v38, %v1166_v38 }
 0x55d   : > { %6366 = vmatmul.mubr.msk.bf16.vlgmr.msra.gmra.mrb[12].mxu1 %vm1107_vm6, %v1167_v40 }
 0x55e   : > { %6370 = vmatpush3.bf16.xpose.msra.mxu1 %v1227_v41  ;;  %6371 = vmatprep.mubr.msk.bf16.mxu1 %vm7163_vm5, %v7162_v45 }
 0x55f   : > { %6381 = vmatprep.subr.bf16.mxu1 %v7162_v45 }
 0x565   : > { %6372 = vmatmul.mubr.msk.bf16.vlgmr.msra.gmra.mrb[16].mxu1 %vm1107_vm6, %v1219_v42 }
 0x566   : > { %6383 = vmatprep.mubr.msk.bf16.mxu1 %vm7163_vm5, %v7162_v45  ;;  %6382 = vmatpush3.bf16.msra.mxu1 %v1337_v61 }
 0x567   : > { %6393 = vmatprep.subr.bf16.mxu1 %v7162_v45 }
 0x630   : > { %v1210_v43 = vpop.f32.mrb[12].mxu1 }
 0x631   : > { %v6367_v44 = vpop.f32.mrb[13].mxu1  ;;  %v1216_v8 = vpack.c.bf16 %v1210_v43, %v1210_v43 }
 0x632   : > { %v1213_v46 = vpop.f32.mrb[14].mxu1 }
 0x633   : > { %v6368_v47 = vpop.f32.mrb[15].mxu1 }
 0x638   : > { %v1263_v48 = vpop.f32.mrb[16].mxu1 }
 0x639   : > { %v1269_v49 = vmul.f32 0.35355338, %v1263_v48  ;;  %v6373_v50 = vpop.f32.mrb[17].mxu1 }
 0x63a   : > { %v1266_v51 = vpop.f32.mrb[18].mxu1 }
 0x63b   : > { %v6374_v52 = vpop.f32.mrb[19].mxu1  ;;  %v1270_v53 = vadd.f32 %v1269_v49, %v7474_v23 }
 0x63c   : > { %v887_v52 = vld [vmem:[%s8557_s25 + $0x38] sm:$0xf] }
 0x63d   : > { %v1271_v54 = vsel %vm1107_vm6, %v1270_v53, -inf }
 0x63e   : > { %1272 = vmax.xlane.f32.xlu1 %v1271_v54 }
 0x64f   : > { %1427 = vrot.lane.b32.xlu1 %v7448_v4, %s8529_s26 }
 0x653   : > { %1425 = vrot.lane.b32.xlu1 %v7461_v18, %s8529_s26 }
 0x6cb   : > { %v1273_v55 = vpop.xlane.xlu1 %1272 }
 0x6cc   : > { %v1274_v56 = vsub.f32 %v1270_v53, %v1273_v55  ;;  %v1542_v53 = vsel %vm1172_vm7, %v887_v52, 0  ;;  %v5875_v52 = vld [vmem:[%s8559_s23 + $0x7] ss:$0 sm:$0xff] }
 0x6ce   : > { %v1275_v57 = vmul.f32 1.442695, %v1274_v56 }
 0x6cf   : > { %v1428_v9 = vpop.permute.xlu1 %1427 }
 0x6d0   : > { %7010 = vpow2.f32 %v1275_v57  ;;  %v1433_v16 = vsel %vm1107_vm6, %v1428_v9, 0 }
 0x6d3   : > { %v1426_v24 = vpop.permute.xlu1 %1425 }
 0x6da   : > { %v7011_v58 = vpop.eup %7010 }
 0x6db   : > { %v1277_v59 = vsel %vm1107_vm6, %v7011_v58, 0.0 }
 0x6dc   : > { %1278 = vadd.xlane.f32.xlu0 %v1277_v59 }
 0x6f2   : > { %1284 = vrot.lane.b32.xlu0 %v7463_v19, %s8531_s6 }
 0x769   : > { %v1279_v62 = vpop.xlane.xlu0 %1278 }
 0x76a   : > { %7012 = vrcp.f32 %v1279_v62 }
 0x76d   : > { %v1285_v63 = vpop.permute.xlu0 %1284 }
 0x76e   : > { %v1290_v0 = vsel %vm1172_vm7, %v1285_v63, 0 }
 0x76f   : > { %6376 = vmatpush3.bf16.msra.mxu0 %v1290_v0 }
 0x770   : > { %6387 = vmatprep.subr.bf16.mxu0 %v7162_v45 }
 0x774   : > { %v7013_v1 = vpop.eup %7012 }
 0x775   : > { %v1281_v3 = vmul.f32 %v7013_v1, %v7011_v58 }
 0x777   : > { %v1282_v6 = vpack.c.bf16 %v1281_v3, %v1281_v3 }
 0x779   : > { %6378 = vmatmul.mubr.msk.bf16.vlgmr.msra.gmra.mrb[8].mxu0 %vm1107_vm6, %v1282_v6 }
 0x77a   : > { %6388 = vmatpush3.bf16.msra.mxu0 %v1383_v7  ;;  %6389 = vmatprep.mubr.msk.bf16.mxu0 %vm7163_vm5, %v7162_v45 }
 0x77b   : > { %6399 = vmatprep.subr.bf16.mxu0 %v7162_v45 }
 0x781   : > { %6390 = vmatmul.mubr.msk.bf16.vlgmr.msra.gmra.mrb[12].mxu0 %vm1107_vm6, %v1216_v8 }
 0x782   : > { %6401 = vmatprep.mubr.msk.bf16.mxu0 %vm7163_vm5, %v7162_v45 }
 0x84c   : > { %v1326_v10 = vpop.f32.mrb[8].mxu0 }
 0x84d   : > { %v1332_v11 = vpack.c.bf16 %v1326_v10, %v1326_v10  ;;  %v6379_v13 = vpop.f32.mrb[9].mxu0 }
 0x84e   : > { %v1329_v14 = vpop.f32.mrb[10].mxu0 }
 0x84f   : > { %v6380_v17 = vpop.f32.mrb[11].mxu0  ;;  %6384 = vmatmul.mubr.msk.bf16.vlgmr.msra.gmra.mrb[20].mxu1 %vm1107_vm6, %v1332_v11  ;;  %v888_v11 = vld [vmem:[%s8557_s25 + $0x3c] sm:$0xf] }
 0x850   : > { %6394 = vmatpush3.bf16.xpose.msra.mxu1 %v1433_v16  ;;  %6395 = vmatprep.mubr.msk.bf16.mxu1 %vm7163_vm5, %v7162_v45 }
 0x851   : > { %6405 = vmatprep.subr.bf16.mxu1 %v7162_v45 }
 0x854   : > { %v1419_v21 = vpop.f32.mrb[12].mxu0 }
 0x855   : > { %v6391_v22 = vpop.f32.mrb[13].mxu0 }
 0x856   : > { %v1422_v25 = vpop.f32.mrb[14].mxu0 }
 0x857   : > { %v6392_v26 = vpop.f32.mrb[15].mxu0  ;;  %6396 = vmatmul.mubr.msk.bf16.vlgmr.msra.gmra.mrb[24].mxu1 %vm1107_vm6, %v1426_v24 }
 0x858   : > { %6407 = vmatprep.mubr.msk.bf16.mxu1 %vm7163_vm5, %v7162_v45  ;;  %6406 = vmatpush3.bf16.msra.mxu1 %v1542_v53 }
 0x859   : > { %6417 = vmatprep.subr.bf16.mxu1 %v7162_v45 }
 0x922   : > { %v1373_v27 = vpop.f32.mrb[20].mxu1 }
 0x923   : > { %v7524_v28 = vadd.f32 %v1419_v21, %v1373_v27  ;;  %v6385_v29 = vpop.f32.mrb[21].mxu1 }
 0x924   : > { %v1376_v30 = vpop.f32.mrb[22].mxu1 }
 0x925   : > { %v6386_v31 = vpop.f32.mrb[23].mxu1 }
 0x92a   : > { %v1469_v32 = vpop.f32.mrb[24].mxu1 }
 0x92b   : > { %v1475_v33 = vmul.f32 0.35355338, %v1469_v32  ;;  %v6397_v34 = vpop.f32.mrb[25].mxu1 }
 0x92c   : > { %v1472_v35 = vpop.f32.mrb[26].mxu1 }
 0x92d   : > { %v6398_v12 = vpop.f32.mrb[27].mxu1  ;;  %v1476_v37 = vadd.f32 %v1475_v33, %v7474_v23 }
 0x92f   : > { %v1477_v38 = vsel %vm1107_vm6, %v1476_v37, -inf }
 0x930   : > { %1478 = vmax.xlane.f32.xlu1 %v1477_v38 }
 0x941   : > { %1587 = vrot.lane.b32.xlu1 %v7448_v4, %s8527_s29 }
 0x945   : > { %1585 = vrot.lane.b32.xlu1 %v7461_v18, %s8527_s29 }
 0x9bd   : > { %v1479_v39 = vpop.xlane.xlu1 %1478 }
 0x9be   : > { %v1480_v40 = vsub.f32 %v1476_v37, %v1479_v39 }
 0x9c0   : > { %v1481_v41 = vmul.f32 1.442695, %v1480_v40 }
 0x9c1   : > { %v1588_v48 = vpop.permute.xlu1 %1587 }
 0x9c2   : > { %7014 = vpow2.f32 %v1481_v41  ;;  %v1593_v50 = vsel %vm1107_vm6, %v1588_v48, 0 }
 0x9c5   : > { %v1586_v51 = vpop.permute.xlu1 %1585 }
 0x9cc   : > { %v7015_v42 = vpop.eup %7014 }
 0x9cd   : > { %v1483_v43 = vsel %vm1107_vm6, %v7015_v42, 0.0 }
 0x9ce   : > { %1484 = vadd.xlane.f32.xlu0 %v1483_v43 }
 0x9e4   : > { %1489 = vrot.lane.b32.xlu0 %v7463_v19, %s8529_s26 }
 0xa5b   : > { %v1485_v44 = vpop.xlane.xlu0 %1484 }
 0xa5c   : > { %7016 = vrcp.f32 %v1485_v44 }
 0xa5f   : > { %v1490_v46 = vpop.permute.xlu0 %1489 }
 0xa60   : > { %v1495_v47 = vsel %vm1172_vm7, %v1490_v46, 0 }
 0xa61   : > { %6400 = vmatpush3.bf16.msra.mxu0 %v1495_v47  ;;  %v6940_v47 = vld [vmem:[%s8560_s7] sm:$0xff]  }
 0xa62   : > { %6411 = vmatprep.subr.bf16.mxu0 %v7162_v45 }
 0xa66   : > { %v7017_v4 = vpop.eup %7016 }
 0xa67   : > { %v1487_v18 = vmul.f32 %v7017_v4, %v7015_v42  ;;  %v6941_v4 = vld [vmem:[%s8560_s7 + $0x8] sm:$0xff]  }
 0xa69   : > { %v1488_v49 = vpack.c.bf16 %v1487_v18, %v1487_v18 }
 0xa6b   : > { %6402 = vmatmul.mubr.msk.bf16.vlgmr.msra.gmra.mrb[16].mxu0 %vm1107_vm6, %v1488_v49 }
 0xa6c   : > { %6412 = vmatpush3.bf16.xpose.msra.mxu0 %v1593_v50  ;;  %6413 = vmatprep.mubr.msk.bf16.mxu0 %vm7163_vm5, %v7162_v45  ;;  %v5874_v50 = vld [vmem:[%s8559_s23 + $0x6] ss:$0 sm:$0xff] }
 0xa6d   : > { %6423 = vmatprep.subr.bf16.mxu0 %v7162_v45 }
 0xa73   : > { %6414 = vmatmul.mubr.msk.bf16.vlgmr.msra.gmra.mrb[20].mxu0 %vm1107_vm6, %v1586_v51 }
 0xa74   : > { %6425 = vmatprep.mubr.msk.bf16.mxu0 %vm7163_vm5, %v7162_v45 }
 0xb3e   : > { %v1531_v54 = vpop.f32.mrb[16].mxu0 }
 0xb3f   : > { %v1537_v55 = vpack.c.bf16 %v1531_v54, %v1531_v54  ;;  %v6403_v56 = vpop.f32.mrb[17].mxu0 }
 0xb40   : > { %v1534_v57 = vpop.f32.mrb[18].mxu0  ;;  %v6942_v56 = vld [vmem:[%s8499_s9] sm:$0xff]  }
 0xb41   : > { %v6404_v58 = vpop.f32.mrb[19].mxu0  ;;  %6408 = vmatmul.mubr.msk.bf16.vlgmr.msra.gmra.mrb[28].mxu1 %vm1107_vm6, %v1537_v55  ;;  %v6943_v57 = vld [vmem:[%s8499_s9 + $0x8] sm:$0xff]  }
 0xb42   : > { %6419 = vmatprep.mubr.msk.bf16.mxu1 %vm7163_vm5, %v7162_v45  ;;  %v6944_v58 = vld [vmem:[%s8499_s9 + $0x10] sm:$0xff]  }
 0xb46   : > { %v1629_v59 = vpop.f32.mrb[20].mxu0 }
 0xb47   : > { %v1635_v60 = vmul.f32 0.35355338, %v1629_v59  ;;  %v6415_v61 = vpop.f32.mrb[21].mxu0  ;;  %v6945_v59 = vld [vmem:[%s8499_s9 + $0x18] sm:$0xff]  }
 0xb48   : > { %v1632_v62 = vpop.f32.mrb[22].mxu0 }
 0xb49   : > { %v6416_v63 = vpop.f32.mrb[23].mxu0  ;;  %v1636_v0 = vadd.f32 %v1635_v60, %v7474_v23  ;;  %v5876_v60 = vld [vmem:[%s8561_s8] ss:$0 sm:$0xff] }
 0xb4b   : > { %v1637_v1 = vsel %vm1107_vm6, %v1636_v0, -inf }
 0xb4c   : > { %1638 = vmax.xlane.f32.xlu0 %v1637_v1 }
 0xb62   : > { %1649 = vrot.lane.b32.xlu0 %v7463_v19, %s8527_s29  ;;  %v1702_v19 = vsel %vm1172_vm7, %v888_v11, 0 }
 0xb63   : > { %6424 = vmatpush3.bf16.msra.mxu0 %v1702_v19 }
 0xb64   : > { %6437 = vmatprep.subr.bf16.mxu0 %v7162_v45 }
 0xbd9   : > { %v1639_v2 = vpop.xlane.xlu0 %1638 }
 0xbda   : > { %v1640_v3 = vsub.f32 %v1636_v0, %v1639_v2 }
 0xbdc   : > { %v1641_v6 = vmul.f32 1.442695, %v1640_v3 }
 0xbdd   : > { %v1650_v7 = vpop.permute.xlu0 %1649 }
 0xbde   : > { %7018 = vpow2.f32 %v1641_v6  ;;  %v1655_v8 = vsel %vm1172_vm7, %v1650_v7, 0 }
 0xbdf   : > { %6418 = vmatpush3.bf16.msra.mxu1 %v1655_v8 }
 0xbe0   : > { %6429 = vmatprep.subr.bf16.mxu1 %v7162_v45 }
 0xbe8   : > { %v7019_v9 = vpop.eup %7018 }
 0xbe9   : > { %v1643_v10 = vsel %vm1107_vm6, %v7019_v9, 0.0 }
 0xbea   : > { %1644 = vadd.xlane.f32.xlu1 %v1643_v10 }
 0xc14   : > { %v1578_v13 = vpop.f32.mrb[28].mxu1 }
 0xc15   : > { %v1584_v14 = vadd.f32 %v1578_v13, %v7524_v28  ;;  %v6409_v16 = vpop.f32.mrb[29].mxu1  ;;  %v5873_v28 = vld [vmem:[%s8559_s23 + $0x5] ss:$0 sm:$0xff] }
 0xc16   : > { %v1581_v17 = vpop.f32.mrb[30].mxu1 }
 0xc17   : > { %v6410_v21 = vpop.f32.mrb[31].mxu1 }
 0xc77   : > { %v1645_v22 = vpop.xlane.xlu1 %1644 }
 0xc78   : > { %7020 = vrcp.f32 %v1645_v22 }
 0xc82   : > { %v7021_v24 = vpop.eup %7020 }
 0xc83   : > { %v1647_v25 = vmul.f32 %v7021_v24, %v7019_v9 }
 0xc85   : > { %v1648_v26 = vpack.c.bf16 %v1647_v25, %v1647_v25 }
 0xc87   : > { %6420 = vmatmul.mubr.msk.bf16.vlgmr.msra.gmra.mrb[32].mxu1 %vm1107_vm6, %v1648_v26 }
 0xc88   : > { %6433 = vmatprep.mubr.msk.bf16.mxu1 %vm7163_vm5, %v7162_v45  ;;  %6430 = vmatpush3.bf16.msra.mxu1 %v6940_v47 }
 0xc89   : > { %6431 = vmatprep.subr.bf16.mxu1 %v7162_v45 }
 0xc8c   : > { %6432 = vmatpush3.bf16.msra.mxu1 %v6941_v4  ;;  %v6951_v4 = vld [vmem:[%s8557_s25 + $0x58] sm:$0xff]  }
 0xc8d   : > { %6449 = vmatprep.subr.bf16.mxu1 %v7162_v45 }
 0xd5a   : > { %v1691_v27 = vpop.f32.mrb[32].mxu1 }
 0xd5b   : > { %v1697_v29 = vpack.c.bf16 %v1691_v27, %v1691_v27  ;;  %v6421_v30 = vpop.f32.mrb[33].mxu1 }
 0xd5c   : > { %v1694_v31 = vpop.f32.mrb[34].mxu1 }
 0xd5d   : > { %v6422_v32 = vpop.f32.mrb[35].mxu1  ;;  %6426 = vmatmul.mubr.msk.bf16.vlgmr.msra.gmra.mrb[24].mxu0 %vm1107_vm6, %v1697_v29 }
 0xd5e   : > { %6445 = vmatprep.mubr.msk.bf16.mxu0 %vm7163_vm5, %v7162_v45  ;;  %6438 = vmatpush3.bf16.msra.mxu0 %v6942_v56 }
 0xd5f   : > { %6439 = vmatprep.subr.bf16.mxu0 %v7162_v45 }
 0xd62   : > { %6440 = vmatpush3.bf16.msra.mxu0 %v6943_v57 }
 0xd63   : > { %6441 = vmatprep.subr.bf16.mxu0 %v7162_v45 }
 0xd66   : > { %6442 = vmatpush3.bf16.msra.mxu0 %v6944_v58 }
 0xd67   : > { %6443 = vmatprep.subr.bf16.mxu0 %v7162_v45 }
 0xd6a   : > { %6444 = vmatpush3.bf16.msra.mxu0 %v6945_v59 }
 0xd6b   : > { %6465 = vmatprep.subr.bf16.mxu0 %v7162_v45 }
 0xe30   : > { %v1738_v33 = vpop.f32.mrb[24].mxu0 }
 0xe31   : > { %v1744_v34 = vadd.f32 %v1738_v33, %v1584_v14  ;;  %v6427_v35 = vpop.f32.mrb[25].mxu0  ;;  %v5885_v14 = vld [vmem:[%s8559_s23 + $0x8] ss:$0 sm:$0xff]  ;;  %v6947_v33 = vld [vmem:[%s8557_s25 + $0x60] sm:$0xff]  }
 0xe32   : > { %v1741_v12 = vpop.f32.mrb[26].mxu0  ;;  %v6949_v35 = vld [vmem:[%s8557_s25 + $0x68] sm:$0xff]  }
 0xe33   : > { %v1751_v37 = vadd.f32 %v5873_v28, %v1744_v34  ;;  %v6428_v38 = vpop.f32.mrb[27].mxu0  ;;  %v6946_v28 = vld [vmem:[%s8557_s25 + $0x40] sm:$0xff]   ;;  %v6948_v34 = vld [vmem:[%s8557_s25 + $0x48] sm:$0xff]  }
 0xe35   : > { %v1752_v39 = vadd.f32 %v1751_v37, %v7394_v36 }
 0xe37   : > { %v1753_v40 = vsel %vm898_vm4, %v1752_v39, 0.0 }
 0xe38   : > { %1754 = vadd.xlane.f32.xlu1 %v1753_v40  ;;  %v5911_v40 = vld [vmem:[%s8559_s23 + $0x9] ss:$0 sm:$0xff] }
 0xec5   : > { %v1755_v41 = vpop.xlane.xlu1 %1754 }
 0xec6   : > { %v1756_v42 = vmul.f32 0.03125, %v1755_v41 }
 0xec8   : > { %v1757_v43 = vsub.f32 %v1752_v39, %v1756_v42  ;;  %v5912_v42 = vld [vmem:[%s8559_s23 + $0xa] ss:$0 sm:$0xff] }
 0xeca   : > { %v1758_v44 = vmul.f32 %v1757_v43, %v1757_v43 }
 0xecc   : > { %v1759_v46 = vsel %vm898_vm4, %v1758_v44, 0.0 }
 0xecd   : > { %1760 = vadd.xlane.f32.xlu1 %v1759_v46  ;;  %v6950_v46 = vld [vmem:[%s8557_s25 + $0x50] sm:$0xff]  }
 0xf5a   : > { %v1761_v36 = vpop.xlane.xlu1 %1760 }
 0xf5b   : > { %v1762_v18 = vmul.f32 0.03125, %v1761_v36  ;;  %v5913_v36 = vld [vmem:[%s8559_s23 + $0xb] ss:$0 sm:$0xff] }
 0xf5d   : > { %v1763_v48 = vadd.f32 1e-12, %v1762_v18  ;;  %v5921_v18 = vld [vmem:[%s8559_s23 + $0xd] ss:$0 sm:$0xff] }
 0xf5f   : > { %7022 = vrsqrt.f32 %v1763_v48 }
 0xf69   : > { %v7023_v49 = vpop.eup %7022 }
 0xf6a   : > { %v1765_v51 = vmul.f32 %v7023_v49, %v1757_v43 }
 0xf6c   : > { %v1772_v53 = vmul.f32 %v5874_v50, %v1765_v51 }
 0xf6e   : > { %v1779_v54 = vadd.f32 %v5875_v52, %v1772_v53 }
 0xf70   : > { %v1784_v55 = vpack.c.bf16 %v1779_v54, %v1779_v54 }
 0xf72   : > { %6434 = vmatmul.mubr.msk.bf16.vlgmr.msra.gmra.mrb[36].mxu1 %vm898_vm4, %v1784_v55 }
 0xf73   : > { %6453 = vmatprep.mubr.msk.bf16.mxu1 %vm7163_vm5, %v7162_v45  ;;  %6450 = vmatpush3.bf16.msra.mxu1 %v6946_v28 }
 0xf74   : > { %6451 = vmatprep.subr.bf16.mxu1 %v7162_v45 }
 0xf77   : > { %6452 = vmatpush3.bf16.msra.mxu1 %v6948_v34 }
 0xf78   : > { %6457 = vmatprep.subr.bf16.mxu1 %v7162_v45 }
0x1045   : > { %v1841_v61 = vpop.f32.mrb[36].mxu1 }
0x1046   : > { %v1842_v62 = vadd.f32 %v5876_v60, %v1841_v61  ;;  %v6435_v63 = vpop.f32.mrb[37].mxu1  ;;  %v5917_v61 = vld [vmem:[%s8559_s23 + $0xc] ss:$0 sm:$0xff] }
0x1047   : > { %v1844_v0 = vpop.f32.mrb[38].mxu1 }
0x1048   : > { %v1848_v1 = vmul.f32 0.044715, %v1842_v62  ;;  %v6436_v2 = vpop.f32.mrb[39].mxu1  ;;  %v1847_v10 = vmul.f32 0.5, %v1842_v62 }
0x104a   : > { %v1849_v3 = vmul.f32 %v1848_v1, %v1842_v62 }
0x104c   : > { %v1850_v6 = vmul.f32 %v1849_v3, %v1842_v62 }
0x104e   : > { %v1851_v7 = vadd.f32 %v1850_v6, %v1842_v62 }
0x1050   : > { %v1852_v8 = vmul.f32 0.7978846, %v1851_v7 }
0x1052   : > { %7024 = vtanh.f32 %v1852_v8 }
0x105c   : > { %v7025_v9 = vpop.eup %7024 }
0x105d   : > { %v1854_v11 = vadd.f32 1.0, %v7025_v9 }
0x105f   : > { %v1855_v19 = vmul.f32 %v1854_v11, %v1847_v10 }
0x1061   : > { %v1864_v13 = vpack.c.bf16 %v1855_v19, %v1855_v19 }
0x1063   : > { %6446 = vmatmul.mubr.msk.bf16.vlgmr.msra.gmra.mrb[28].mxu0 %vm816_vm1, %v1864_v13 }
0x1064   : > { %6469 = vmatprep.mubr.msk.bf16.mxu0 %vm7163_vm5, %v7162_v45  ;;  %6466 = vmatpush3.bf16.msra.mxu0 %v6947_v33 }
0x1065   : > { %6467 = vmatprep.subr.bf16.mxu0 %v7162_v45 }
0x1068   : > { %6468 = vmatpush3.bf16.msra.mxu0 %v6949_v35 }
0x1069   : > { %6479 = vmatprep.subr.bf16.mxu0 %v7162_v45 }
0x1136   : > { %v1926_v16 = vpop.f32.mrb[28].mxu0 }
0x1137   : > { %v1932_v17 = vadd.f32 %v1926_v16, %v1752_v39  ;;  %v6447_v21 = vpop.f32.mrb[29].mxu0 }
0x1138   : > { %v1929_v22 = vpop.f32.mrb[30].mxu0 }
0x1139   : > { %v7620_v24 = vadd.f32 %v5885_v14, %v1932_v17  ;;  %v6448_v25 = vpop.f32.mrb[31].mxu0 }
0x113b   : > { %v1967_v26 = vsel %vm898_vm4, %v7620_v24, 0.0 }
0x113c   : > { %1968 = vadd.xlane.f32.xlu1 %v1967_v26 }
0x11c9   : > { %v1969_v27 = vpop.xlane.xlu1 %1968 }
0x11ca   : > { %v1970_v29 = vmul.f32 0.03125, %v1969_v27 }
0x11cc   : > { %v1971_v30 = vsub.f32 %v7620_v24, %v1970_v29 }
0x11ce   : > { %v1972_v31 = vmul.f32 %v1971_v30, %v1971_v30 }
0x11d0   : > { %v1973_v32 = vsel %vm898_vm4, %v1972_v31, 0.0 }
0x11d1   : > { %1974 = vadd.xlane.f32.xlu1 %v1973_v32 }
0x125e   : > { %v1975_v12 = vpop.xlane.xlu1 %1974 }
0x125f   : > { %v1976_v37 = vmul.f32 0.03125, %v1975_v12 }
0x1261   : > { %v1977_v38 = vadd.f32 1e-12, %v1976_v37 }
0x1263   : > { %7026 = vrsqrt.f32 %v1977_v38 }
0x126d   : > { %v7027_v39 = vpop.eup %7026 }
0x126e   : > { %v1979_v41 = vmul.f32 %v7027_v39, %v1971_v30 }
0x1270   : > { %v1986_v43 = vmul.f32 %v5911_v40, %v1979_v41 }
0x1272   : > { %v1993_v44 = vadd.f32 %v5912_v42, %v1986_v43 }
0x1274   : > { %v1994_v47 = vpack.c.bf16 %v1993_v44, %v1993_v44  ;;  %v5899_v44 = vld [vmem:[%s8557_s25 + $0x74] sm:$0xf] }
0x1276   : > { %6454 = vmatmul.mubr.msk.bf16.vlgmr.msra.gmra.mrb[40].mxu1 %vm898_vm4, %v1994_v47  ;;  %6470 = vmatmul.mubr.msk.bf16.vlgmr.msra.gmra.mrb[32].mxu0 %vm898_vm4, %v1994_v47 }
0x1277   : > { %6458 = vmatpush3.bf16.msra.mxu1 %v6950_v46  ;;  %6461 = vmatprep.mubr.msk.bf16.mxu1 %vm7163_vm5, %v7162_v45  ;;  %v2402_v46 = vsel %vm1172_vm7, %v5899_v44, 0 }
0x1278   : > { %6459 = vmatprep.subr.bf16.mxu1 %v7162_v45  ;;  %6481 = vmatprep.mubr.msk.bf16.mxu0 %vm7163_vm5, %v7162_v45 }
0x127b   : > { %6460 = vmatpush3.bf16.msra.mxu1 %v6951_v4 }
0x127c   : > { %6473 = vmatprep.subr.bf16.mxu1 %v7162_v45 }
0x127e   : > { %6462 = vmatmul.mubr.msk.bf16.vlgmr.msra.gmra.mrb[44].mxu1 %vm898_vm4, %v1994_v47 }
0x127f   : > { %6475 = vmatprep.mubr.msk.bf16.mxu1 %vm7163_vm5, %v7162_v45 }
0x1349   : > { %v2050_v48 = vpop.f32.mrb[40].mxu1  ;;  %v2166_v49 = vpop.f32.mrb[32].mxu0 }
0x134a   : > { %v2051_v50 = vadd.f32 %v5913_v36, %v2050_v48  ;;  %v2167_v51 = vadd.f32 %v5921_v18, %v2166_v49  ;;  %v6455_v52 = vpop.f32.mrb[41].mxu1  ;;  %v6471_v53 = vpop.f32.mrb[33].mxu0  ;;  %v5898_v48 = vld [vmem:[%s8557_s25 + $0x70] sm:$0xf] }
0x134b   : > { %v2053_v54 = vpop.f32.mrb[42].mxu1  ;;  %v2169_v55 = vpop.f32.mrb[34].mxu0 }
0x134c   : > { %v7671_v56 = vpack.c.bf16 %v2051_v50, %v2051_v50  ;;  %v7673_v57 = vpack.c.bf16 %v2167_v51, %v2167_v51  ;;  %v6456_v58 = vpop.f32.mrb[43].mxu1  ;;  %v6472_v59 = vpop.f32.mrb[35].mxu0  ;;  %v2448_v51 = vsel %vm1172_vm7, %v5898_v48, 0 }
0x134e   : > { %2283 = vrot.lane.b32.xlu1 %v7671_v56, %s8531_s6  ;;  %v2239_v60 = vsel %vm1172_vm7, %v7673_v57, 0 }
0x134f   : > { %6480 = vmatpush3.bf16.msra.mxu0 %v2239_v60 }
0x1350   : > { %6491 = vmatprep.subr.bf16.mxu0 %v7162_v45 }
0x1351   : > { %v2108_v62 = vpop.f32.mrb[44].mxu1 }
0x1352   : > { %v2109_v63 = vadd.f32 %v5917_v61, %v2108_v62  ;;  %v6463_v0 = vpop.f32.mrb[45].mxu1 }
0x1353   : > { %v2111_v1 = vpop.f32.mrb[46].mxu1 }
0x1354   : > { %v7683_v2 = vpack.c.bf16 %v2109_v63, %v2109_v63  ;;  %v6464_v3 = vpop.f32.mrb[47].mxu1 }
0x1356   : > { %2286 = vrot.lane.b32.xlu0 %v7683_v2, %s8531_s6  ;;  %v2178_v6 = vsel %vm1107_vm6, %v7683_v2, 0 }
0x1357   : > { %6474 = vmatpush3.bf16.xpose.msra.mxu1 %v2178_v6 }
0x1358   : > { %6485 = vmatprep.subr.bf16.mxu1 %v7162_v45 }
0x135e   : > { %6476 = vmatmul.mubr.msk.bf16.vlgmr.msra.gmra.mrb[48].mxu1 %vm1107_vm6, %v7671_v56 }
0x135f   : > { %6487 = vmatprep.mubr.msk.bf16.mxu1 %vm7163_vm5, %v7162_v45 }
0x13c0   : > { %v2284_v9 = vpop.permute.xlu1 %2283 }
0x13c8   : > { %v2287_v7 = vpop.permute.xlu0 %2286 }
0x13c9   : > { %v2292_v8 = vsel %vm1107_vm6, %v2287_v7, 0 }
0x13ca   : > { %6486 = vmatpush3.bf16.xpose.msra.mxu1 %v2292_v8 }
0x13cb   : > { %6497 = vmatprep.subr.bf16.mxu1 %v7162_v45 }
0x13d1   : > { %6488 = vmatmul.mubr.msk.bf16.vlgmr.msra.gmra.mrb[52].mxu1 %vm1107_vm6, %v2284_v9 }
0x13d2   : > { %6499 = vmatprep.mubr.msk.bf16.mxu1 %vm7163_vm5, %v7162_v45  ;;  %6498 = vmatpush3.bf16.msra.mxu1 %v2402_v46 }
0x13d3   : > { %6509 = vmatprep.subr.bf16.mxu1 %v7162_v45 }
0x1431   : > { %v2214_v10 = vpop.f32.mrb[48].mxu1 }
0x1432   : > { %v2220_v11 = vmul.f32 0.35355338, %v2214_v10  ;;  %v6477_v19 = vpop.f32.mrb[49].mxu1 }
0x1433   : > { %v2217_v13 = vpop.f32.mrb[50].mxu1 }
0x1434   : > { %v6478_v14 = vpop.f32.mrb[51].mxu1  ;;  %v2221_v16 = vadd.f32 %v2220_v11, %v7474_v23 }
0x1436   : > { %v2222_v17 = vsel %vm1107_vm6, %v2221_v16, -inf }
0x1437   : > { %2223 = vmax.xlane.f32.xlu0 %v2222_v17 }
0x14a4   : > { %v2328_v21 = vpop.f32.mrb[52].mxu1 }
0x14a5   : > { %v2334_v22 = vmul.f32 0.35355338, %v2328_v21  ;;  %v6489_v25 = vpop.f32.mrb[53].mxu1 }
0x14a6   : > { %v2331_v26 = vpop.f32.mrb[54].mxu1 }
0x14a7   : > { %v6490_v27 = vpop.f32.mrb[55].mxu1  ;;  %v2335_v29 = vadd.f32 %v2334_v22, %v7474_v23 }
0x14a9   : > { %v2336_v30 = vsel %vm1107_vm6, %v2335_v29, -inf }
0x14aa   : > { %2337 = vmax.xlane.f32.xlu1 %v2336_v30 }
0x14bb   : > { %2492 = vrot.lane.b32.xlu1 %v7683_v2, %s8529_s26 }
0x14c4   : > { %v2224_v31 = vpop.xlane.xlu0 %2223 }
0x14c5   : > { %v2225_v32 = vsub.f32 %v2221_v16, %v2224_v31 }
0x14c7   : > { %v2226_v28 = vmul.f32 1.442695, %v2225_v32 }
0x14c9   : > { %7028 = vpow2.f32 %v2226_v28 }
0x14d3   : > { %v7029_v33 = vpop.eup %7028 }
0x14d4   : > { %v2228_v34 = vsel %vm1107_vm6, %v7029_v33, 0.0 }
0x14d5   : > { %2229 = vadd.xlane.f32.xlu0 %v2228_v34 }
0x1537   : > { %v2338_v35 = vpop.xlane.xlu1 %2337 }
0x1538   : > { %v2339_v12 = vsub.f32 %v2335_v29, %v2338_v35 }
0x153a   : > { %v2340_v37 = vmul.f32 1.442695, %v2339_v12 }
0x153b   : > { %v2493_v59 = vpop.permute.xlu1 %2492 }
0x153c   : > { %7030 = vpow2.f32 %v2340_v37  ;;  %v2498_v0 = vsel %vm1107_vm6, %v2493_v59, 0  ;;  %v5901_v59 = vld [vmem:[%s8557_s25 + $0x7c] sm:$0xf] }
0x1546   : > { %v7031_v38 = vpop.eup %7030 }
0x1547   : > { %v2342_v39 = vsel %vm1107_vm6, %v7031_v38, 0.0 }
0x1548   : > { %2343 = vadd.xlane.f32.xlu0 %v2342_v39 }
0x155e   : > { %2349 = vrot.lane.b32.xlu0 %v7673_v57, %s8531_s6  ;;  %s6134_s6 = sshll.u32 %s7304_s4, 7  ;;  %s7167_s4 = smov [#allocation2]  }
0x1562   : > { %v2230_v40 = vpop.xlane.xlu0 %2229  ;;  %2490 = vrot.lane.b32.xlu0 %v7671_v56, %s8529_s26 }
0x1563   : > { %7032 = vrcp.f32 %v2230_v40 }
0x156d   : > { %v7033_v41 = vpop.eup %7032 }
0x156e   : > { %v2232_v42 = vmul.f32 %v7033_v41, %v7029_v33 }
0x1570   : > { %v2233_v43 = vpack.c.bf16 %v2232_v42, %v2232_v42 }
0x1572   : > { %6482 = vmatmul.mubr.msk.bf16.vlgmr.msra.gmra.mrb[36].mxu0 %vm1107_vm6, %v2233_v43 }
0x1573   : > { %6493 = vmatprep.mubr.msk.bf16.mxu0 %vm7163_vm5, %v7162_v45 }
0x15d5   : > { %v2344_v47 = vpop.xlane.xlu0 %2343 }
0x15d6   : > { %7034 = vrcp.f32 %v2344_v47 }
0x15d9   : > { %v2350_v4 = vpop.permute.xlu0 %2349 }
0x15da   : > { %v2355_v36 = vsel %vm1172_vm7, %v2350_v4, 0 }
0x15db   : > { %6492 = vmatpush3.bf16.msra.mxu0 %v2355_v36 }
0x15dc   : > { %6503 = vmatprep.subr.bf16.mxu0 %v7162_v45 }
0x15dd   : > { %v2491_v3 = vpop.permute.xlu0 %2490 }
0x15e0   : > { %v7035_v18 = vpop.eup %7034 }
0x15e1   : > { %v2346_v49 = vmul.f32 %v7035_v18, %v7031_v38 }
0x15e3   : > { %v2347_v50 = vpack.c.bf16 %v2346_v49, %v2346_v49 }
0x15e5   : > { %6494 = vmatmul.mubr.msk.bf16.vlgmr.msra.gmra.mrb[40].mxu0 %vm1107_vm6, %v2347_v50 }
0x15e6   : > { %6504 = vmatpush3.bf16.msra.mxu0 %v2448_v51  ;;  %6505 = vmatprep.mubr.msk.bf16.mxu0 %vm7163_vm5, %v7162_v45 }
0x15e7   : > { %6515 = vmatprep.subr.bf16.mxu0 %v7162_v45 }
0x1645   : > { %v2275_v52 = vpop.f32.mrb[36].mxu0 }
0x1646   : > { %v2281_v53 = vpack.c.bf16 %v2275_v52, %v2275_v52  ;;  %v6483_v54 = vpop.f32.mrb[37].mxu0 }
0x1647   : > { %v2278_v55 = vpop.f32.mrb[38].mxu0 }
0x1648   : > { %v6484_v58 = vpop.f32.mrb[39].mxu0  ;;  %6506 = vmatmul.mubr.msk.bf16.vlgmr.msra.gmra.mrb[44].mxu0 %vm1107_vm6, %v2281_v53 }
0x1649   : > { %6517 = vmatprep.mubr.msk.bf16.mxu0 %vm7163_vm5, %v7162_v45 }
0x16b8   : > { %v2391_v60 = vpop.f32.mrb[40].mxu0 }
0x16b9   : > { %v2397_v61 = vpack.c.bf16 %v2391_v60, %v2391_v60  ;;  %v6495_v62 = vpop.f32.mrb[41].mxu0 }
0x16ba   : > { %v2394_v63 = vpop.f32.mrb[42].mxu0 }
0x16bb   : > { %v6496_v1 = vpop.f32.mrb[43].mxu0  ;;  %6500 = vmatmul.mubr.msk.bf16.vlgmr.msra.gmra.mrb[56].mxu1 %vm1107_vm6, %v2397_v61 }
0x16bc   : > { %6510 = vmatpush3.bf16.xpose.msra.mxu1 %v2498_v0  ;;  %6511 = vmatprep.mubr.msk.bf16.mxu1 %vm7163_vm5, %v7162_v45 }
0x16bd   : > { %6521 = vmatprep.subr.bf16.mxu1 %v7162_v45 }
0x16c3   : > { %6512 = vmatmul.mubr.msk.bf16.vlgmr.msra.gmra.mrb[60].mxu1 %vm1107_vm6, %v2491_v3 }
0x16c4   : > { %6523 = vmatprep.mubr.msk.bf16.mxu1 %vm7163_vm5, %v7162_v45 }
0x171b   : > { %v2484_v6 = vpop.f32.mrb[44].mxu0 }
0x171c   : > { %v6507_v7 = vpop.f32.mrb[45].mxu0 }
0x171d   : > { %v2487_v8 = vpop.f32.mrb[46].mxu0 }
0x171e   : > { %v6508_v9 = vpop.f32.mrb[47].mxu0 }
0x178e   : > { %v2438_v10 = vpop.f32.mrb[56].mxu1 }
0x178f   : > { %v7740_v11 = vadd.f32 %v2484_v6, %v2438_v10  ;;  %v6501_v19 = vpop.f32.mrb[57].mxu1 }
0x1790   : > { %v2441_v13 = vpop.f32.mrb[58].mxu1 }
0x1791   : > { %v6502_v14 = vpop.f32.mrb[59].mxu1 }
0x1792   : > { %v5937_v14 = vld [vmem:[%s8559_s23 + $0xe] ss:$0 sm:$0xff] }
0x1796   : > { %v2534_v16 = vpop.f32.mrb[60].mxu1 }
0x1797   : > { %v2540_v17 = vmul.f32 0.35355338, %v2534_v16  ;;  %v6513_v21 = vpop.f32.mrb[61].mxu1 }
0x1798   : > { %v2537_v22 = vpop.f32.mrb[62].mxu1 }
0x1799   : > { %v6514_v25 = vpop.f32.mrb[63].mxu1  ;;  %v2541_v26 = vadd.f32 %v2540_v17, %v7474_v23 }
0x179b   : > { %v2542_v27 = vsel %vm1107_vm6, %v2541_v26, -inf }
0x179c   : > { %2543 = vmax.xlane.f32.xlu0 %v2542_v27 }
0x17b2   : > { %2554 = vrot.lane.b32.xlu0 %v7673_v57, %s8529_s26 }
0x17b6   : > { %2650 = vrot.lane.b32.xlu0 %v7671_v56, %s8527_s29 }
0x1829   : > { %v2544_v29 = vpop.xlane.xlu0 %2543 }
0x182a   : > { %v2545_v30 = vsub.f32 %v2541_v26, %v2544_v29 }
0x182c   : > { %v2546_v31 = vmul.f32 1.442695, %v2545_v30 }
0x182d   : > { %v2555_v32 = vpop.permute.xlu0 %2554 }
0x182e   : > { %7036 = vpow2.f32 %v2546_v31  ;;  %v2560_v28 = vsel %vm1172_vm7, %v2555_v32, 0 }
0x182f   : > { %6516 = vmatpush3.bf16.msra.mxu0 %v2560_v28 }
0x1830   : > { %6527 = vmatprep.subr.bf16.mxu0 %v7162_v45 }
0x1831   : > { %v2651_v40 = vpop.permute.xlu0 %2650 }
0x1838   : > { %v7037_v33 = vpop.eup %7036 }
0x1839   : > { %v2548_v34 = vsel %vm1107_vm6, %v7037_v33, 0.0 }
0x183a   : > { %2549 = vadd.xlane.f32.xlu1 %v2548_v34  ;;  %v6952_v34 = vld [vmem:[%s8560_s7 + $0x10] sm:$0xff]  }
0x184b   : > { %2652 = vrot.lane.b32.xlu1 %v7683_v2, %s8527_s29  ;;  %v5900_v2 = vld [vmem:[%s8557_s25 + $0x78] sm:$0xf] }
0x184c   : > { %v2607_v41 = vsel %vm1172_vm7, %v5900_v2, 0 }
0x184d   : > { %6522 = vmatpush3.bf16.msra.mxu1 %v2607_v41 }
0x184e   : > { %6533 = vmatprep.subr.bf16.mxu1 %v7162_v45 }
0x18c7   : > { %v2550_v35 = vpop.xlane.xlu1 %2549 }
0x18c8   : > { %7038 = vrcp.f32 %v2550_v35  ;;  %v6953_v35 = vld [vmem:[%s8560_s7 + $0x18] sm:$0xff]   ;;  %s8566_s7 = smov 104  }
0x18cb   : > { %v2653_v37 = vpop.permute.xlu1 %2652 }
0x18cc   : > { %v2658_v39 = vsel %vm1107_vm6, %v2653_v37, 0 }
0x18d2   : > { %v7039_v56 = vpop.eup %7038 }
0x18d3   : > { %v2552_v12 = vmul.f32 %v7039_v56, %v7037_v33 }
0x18d5   : > { %v2553_v38 = vpack.c.bf16 %v2552_v12, %v2552_v12 }
0x18d7   : > { %6518 = vmatmul.mubr.msk.bf16.vlgmr.msra.gmra.mrb[48].mxu0 %vm1107_vm6, %v2553_v38  ;;  %v5938_v38 = vld [vmem:[%s8559_s23 + $0xf] ss:$0 sm:$0xff] }
0x18d8   : > { %6528 = vmatpush3.bf16.xpose.msra.mxu0 %v2658_v39  ;;  %6529 = vmatprep.mubr.msk.bf16.mxu0 %vm7163_vm5, %v7162_v45 }
0x18d9   : > { %6539 = vmatprep.subr.bf16.mxu0 %v7162_v45 }
0x18df   : > { %6530 = vmatmul.mubr.msk.bf16.vlgmr.msra.gmra.mrb[52].mxu0 %vm1107_vm6, %v2651_v40  ;;  %v5939_v40 = vld [vmem:[%s8559_s23 + $0x10] ss:$0 sm:$0xff] }
0x18e0   : > { %6541 = vmatprep.mubr.msk.bf16.mxu0 %vm7163_vm5, %v7162_v45 }
0x19aa   : > { %v2596_v42 = vpop.f32.mrb[48].mxu0 }
0x19ab   : > { %v2602_v43 = vpack.c.bf16 %v2596_v42, %v2596_v42  ;;  %v6519_v44 = vpop.f32.mrb[49].mxu0 }
0x19ac   : > { %v2599_v46 = vpop.f32.mrb[50].mxu0  ;;  %v6955_v44 = vld [vmem:[%s8499_s9 + $0x28] sm:$0xff]  }
0x19ad   : > { %v6520_v47 = vpop.f32.mrb[51].mxu0  ;;  %6524 = vmatmul.mubr.msk.bf16.vlgmr.msra.gmra.mrb[64].mxu1 %vm1107_vm6, %v2602_v43  ;;  %v6954_v43 = vld [vmem:[%s8499_s9 + $0x20] sm:$0xff]   ;;  %v6956_v46 = vld [vmem:[%s8499_s9 + $0x30] sm:$0xff]  }
0x19ae   : > { %6535 = vmatprep.mubr.msk.bf16.mxu1 %vm7163_vm5, %v7162_v45  ;;  %v6957_v47 = vld [vmem:[%s8499_s9 + $0x38] sm:$0xff]  }
0x19b2   : > { %v2694_v4 = vpop.f32.mrb[52].mxu0 }
0x19b3   : > { %v2700_v36 = vmul.f32 0.35355338, %v2694_v4  ;;  %v6531_v18 = vpop.f32.mrb[53].mxu0  ;;  %v5945_v4 = vld [vmem:[%s8561_s8 + $0x1] ss:$0 sm:$0xff] }
0x19b4   : > { %v2697_v48 = vpop.f32.mrb[54].mxu0 }
0x19b5   : > { %v6532_v49 = vpop.f32.mrb[55].mxu0  ;;  %v2701_v50 = vadd.f32 %v2700_v36, %v7474_v23  ;;  %v2767_v23 = vsel %vm1172_vm7, %v5901_v59, 0 }
0x19b6   : > { %6540 = vmatpush3.bf16.msra.mxu0 %v2767_v23 }
0x19b7   : > { %v2702_v51 = vsel %vm1107_vm6, %v2701_v50, -inf  ;;  %6553 = vmatprep.subr.bf16.mxu0 %v7162_v45 }
0x19b8   : > { %2703 = vmax.xlane.f32.xlu1 %v2702_v51 }
0x1a45   : > { %v2704_v52 = vpop.xlane.xlu1 %2703 }
0x1a46   : > { %v2705_v53 = vsub.f32 %v2701_v50, %v2704_v52 }
0x1a48   : > { %v2706_v54 = vmul.f32 1.442695, %v2705_v53 }
0x1a4a   : > { %7040 = vpow2.f32 %v2706_v54 }
0x1a54   : > { %v7041_v55 = vpop.eup %7040 }
0x1a55   : > { %v2708_v58 = vsel %vm1107_vm6, %v7041_v55, 0.0 }
0x1a56   : > { %2709 = vadd.xlane.f32.xlu0 %v2708_v58 }
0x1a6c   : > { %2714 = vrot.lane.b32.xlu0 %v7673_v57, %s8527_s29 }
0x1a80   : > { %v2643_v60 = vpop.f32.mrb[64].mxu1 }
0x1a81   : > { %v2649_v61 = vadd.f32 %v2643_v60, %v7740_v11  ;;  %v6525_v62 = vpop.f32.mrb[65].mxu1 }
0x1a82   : > { %v2646_v63 = vpop.f32.mrb[66].mxu1 }
0x1a83   : > { %v6526_v0 = vpop.f32.mrb[67].mxu1  ;;  %v5962_v63 = vld [vmem:[%s8559_s23 + $0x11] ss:$0 sm:$0xff] }
0x1ae3   : > { %v2710_v1 = vpop.xlane.xlu0 %2709 }
0x1ae4   : > { %7042 = vrcp.f32 %v2710_v1 }
0x1ae7   : > { %v2715_v3 = vpop.permute.xlu0 %2714 }
0x1ae8   : > { %v2720_v57 = vsel %vm1172_vm7, %v2715_v3, 0 }
0x1ae9   : > { %6534 = vmatpush3.bf16.msra.mxu1 %v2720_v57 }
0x1aea   : > { %6545 = vmatprep.subr.bf16.mxu1 %v7162_v45 }
0x1aee   : > { %v7043_v6 = vpop.eup %7042 }
0x1aef   : > { %v2712_v7 = vmul.f32 %v7043_v6, %v7041_v55 }
0x1af1   : > { %v2713_v8 = vpack.c.bf16 %v2712_v7, %v2712_v7 }
0x1af3   : > { %6536 = vmatmul.mubr.msk.bf16.vlgmr.msra.gmra.mrb[68].mxu1 %vm1107_vm6, %v2713_v8 }
0x1af4   : > { %6549 = vmatprep.mubr.msk.bf16.mxu1 %vm7163_vm5, %v7162_v45  ;;  %6546 = vmatpush3.bf16.msra.mxu1 %v6952_v34 }
0x1af5   : > { %6547 = vmatprep.subr.bf16.mxu1 %v7162_v45 }
0x1af8   : > { %6548 = vmatpush3.bf16.msra.mxu1 %v6953_v35  ;;  %v6958_v35 = vld [vmem:[%s8502_s12] sm:$0xff]  }
0x1af9   : > { %6565 = vmatprep.subr.bf16.mxu1 %v7162_v45 }
0x1bc6   : > { %v2756_v9 = vpop.f32.mrb[68].mxu1 }
0x1bc7   : > { %v2762_v10 = vpack.c.bf16 %v2756_v9, %v2756_v9  ;;  %v6537_v11 = vpop.f32.mrb[69].mxu1 }
0x1bc8   : > { %v2759_v19 = vpop.f32.mrb[70].mxu1 }
0x1bc9   : > { %v6538_v13 = vpop.f32.mrb[71].mxu1  ;;  %6542 = vmatmul.mubr.msk.bf16.vlgmr.msra.gmra.mrb[56].mxu0 %vm1107_vm6, %v2762_v10 }
0x1bca   : > { %6561 = vmatprep.mubr.msk.bf16.mxu0 %vm7163_vm5, %v7162_v45  ;;  %6554 = vmatpush3.bf16.msra.mxu0 %v6954_v43  ;;  %v3089_v13 = vld [vmem:[%s709_s2] sm:$0xff]  ;;  %s8564_s2 = smov 120  }
0x1bcb   : > { %6555 = vmatprep.subr.bf16.mxu0 %v7162_v45  ;;  %v3106_v43 = vld [vmem:[%s8503_s13] sm:$0xff] }
0x1bce   : > { %6556 = vmatpush3.bf16.msra.mxu0 %v6955_v44 }
0x1bcf   : > { %6557 = vmatprep.subr.bf16.mxu0 %v7162_v45 }
0x1bd2   : > { %6558 = vmatpush3.bf16.msra.mxu0 %v6956_v46 }
0x1bd3   : > { %6559 = vmatprep.subr.bf16.mxu0 %v7162_v45 }
0x1bd6   : > { %6560 = vmatpush3.bf16.msra.mxu0 %v6957_v47 }
0x1bd7   : > { %6585 = vmatprep.subr.bf16.mxu0 %v7162_v45 }
0x1c9c   : > { %v2803_v16 = vpop.f32.mrb[56].mxu0 }
0x1c9d   : > { %v2809_v17 = vadd.f32 %v2803_v16, %v2649_v61  ;;  %v6543_v21 = vpop.f32.mrb[57].mxu0  ;;  %v3039_v16 = vld [vmem:[%s8501_s11 + $0x8] sm:$0xff] }
0x1c9e   : > { %v2806_v22 = vpop.f32.mrb[58].mxu0  ;;  %v3040_v21 = vld [vmem:[%s8501_s11 + $0x10] sm:$0xff] }
0x1c9f   : > { %v2816_v25 = vadd.f32 %v5937_v14, %v2809_v17  ;;  %v6544_v26 = vpop.f32.mrb[59].mxu0  ;;  %v3038_v14 = vld [vmem:[%s8501_s11] sm:$0xff]  ;;  %v3041_v22 = vld [vmem:[%s8501_s11 + $0x18] sm:$0xff] }
0x1ca0   : > { %v3044_v17 = vpack.c.bf16 %v3039_v16, %v3038_v14 }
0x1ca1   : > { %v2817_v27 = vadd.f32 %v2816_v25, %v7620_v24  ;;  %v3045_v25 = vpack.c.bf16 %v3041_v22, %v3040_v21 }
0x1ca3   : > { %v2818_v29 = vsel %vm898_vm4, %v2817_v27, 0.0 }
0x1ca4   : > { %2819 = vadd.xlane.f32.xlu1 %v2818_v29 }
0x1d31   : > { %v2820_v30 = vpop.xlane.xlu1 %2819 }
0x1d32   : > { %v2821_v31 = vmul.f32 0.03125, %v2820_v30 }
0x1d34   : > { %v2822_v32 = vsub.f32 %v2817_v27, %v2821_v31  ;;  %v5964_v31 = vld [vmem:[%s8500_s10] ss:$0 sm:$0xff] }
0x1d36   : > { %v2823_v28 = vmul.f32 %v2822_v32, %v2822_v32 }
0x1d38   : > { %v2824_v33 = vsel %vm898_vm4, %v2823_v28, 0.0  ;;  %v5965_v28 = vld [vmem:[%s8500_s10 + $0x1] ss:$0 sm:$0xff] }
0x1d39   : > { %2825 = vadd.xlane.f32.xlu1 %v2824_v33 }
0x1dc6   : > { %v2826_v24 = vpop.xlane.xlu1 %2825 }
0x1dc7   : > { %v2827_v56 = vmul.f32 0.03125, %v2826_v24 }
0x1dc9   : > { %v2828_v12 = vadd.f32 1e-12, %v2827_v56  ;;  %v6959_v56 = vld [vmem:[%s8502_s12 + $0x8] sm:$0xff]  }
0x1dcb   : > { %7044 = vrsqrt.f32 %v2828_v12 }
0x1dd5   : > { %v7045_v37 = vpop.eup %7044 }
0x1dd6   : > { %v2830_v39 = vmul.f32 %v7045_v37, %v2822_v32  ;;  %v6960_v37 = vld [vmem:[%s8502_s12 + $0x10] sm:$0xff]  }
0x1dd8   : > { %v2837_v2 = vmul.f32 %v5938_v38, %v2830_v39  ;;  %v6961_v39 = vld [vmem:[%s8502_s12 + $0x18] sm:$0xff]  }
0x1dda   : > { %v2844_v41 = vadd.f32 %v5939_v40, %v2837_v2 }
0x1ddc   : > { %v2850_v42 = vpack.c.bf16 %v2844_v41, %v2844_v41 }
0x1dde   : > { %6550 = vmatmul.mubr.msk.bf16.vlgmr.msra.gmra.mrb[72].mxu1 %vm898_vm4, %v2850_v42 }
0x1ddf   : > { %6569 = vmatprep.mubr.msk.bf16.mxu1 %vm7163_vm5, %v7162_v45  ;;  %6566 = vmatpush3.bf16.msra.mxu1 %v3044_v17 }
0x1de0   : > { %6567 = vmatprep.subr.bf16.mxu1 %v7162_v45 }
0x1de3   : > { %6568 = vmatpush3.bf16.msra.mxu1 %v3045_v25 }
0x1de4   : > { %6573 = vmatprep.subr.bf16.mxu1 %v7162_v45 }
0x1eb1   : > { %v2908_v36 = vpop.f32.mrb[72].mxu1 }
0x1eb2   : > { %v2909_v18 = vadd.f32 %v5945_v4, %v2908_v36  ;;  %v6551_v48 = vpop.f32.mrb[73].mxu1 }
0x1eb3   : > { %v2911_v49 = vpop.f32.mrb[74].mxu1 }
0x1eb4   : > { %v2915_v50 = vmul.f32 0.044715, %v2909_v18  ;;  %v6552_v51 = vpop.f32.mrb[75].mxu1  ;;  %v2914_v59 = vmul.f32 0.5, %v2909_v18 }
0x1eb6   : > { %v2916_v52 = vmul.f32 %v2915_v50, %v2909_v18 }
0x1eb8   : > { %v2917_v53 = vmul.f32 %v2916_v52, %v2909_v18 }
0x1eba   : > { %v2918_v54 = vadd.f32 %v2917_v53, %v2909_v18  ;;  %v6962_v53 = vld [vmem:[%s8504_s14] sm:$0xff]  }
0x1ebc   : > { %v2919_v55 = vmul.f32 0.7978846, %v2918_v54  ;;  %v6963_v54 = vld [vmem:[%s8504_s14 + $0x20] sm:$0xff]  }
0x1ebe   : > { %7046 = vtanh.f32 %v2919_v55  ;;  %v6964_v55 = vld [vmem:[%s8504_s14 + $0x8] sm:$0xff]  }
0x1ec8   : > { %v7047_v58 = vpop.eup %7046 }
0x1ec9   : > { %v2921_v23 = vadd.f32 1.0, %v7047_v58  ;;  %v6965_v58 = vld [vmem:[%s8504_s14 + $0x28] sm:$0xff]  }
0x1ecb   : > { %v2922_v60 = vmul.f32 %v2921_v23, %v2914_v59 }
0x1ecd   : > { %v2932_v61 = vpack.c.bf16 %v2922_v60, %v2922_v60 }
0x1ecf   : > { %6562 = vmatmul.mubr.msk.bf16.vlgmr.msra.gmra.mrb[60].mxu0 %vm816_vm1, %v2932_v61 }
0x1ed0   : > { %6589 = vmatprep.mubr.msk.bf16.mxu0 %vm7163_vm5, %v7162_v45  ;;  %6586 = vmatpush3.bf16.msra.mxu0 %v6962_v53 }
0x1ed1   : > { %6587 = vmatprep.subr.bf16.mxu0 %v7162_v45 }
0x1ed4   : > { %6588 = vmatpush3.bf16.msra.mxu0 %v6964_v55 }
0x1ed5   : > { %6593 = vmatprep.subr.bf16.mxu0 %v7162_v45 }
0x1fa2   : > { %v2994_v62 = vpop.f32.mrb[60].mxu0 }
0x1fa3   : > { %v3000_v0 = vadd.f32 %v2994_v62, %v2817_v27  ;;  %v6563_v1 = vpop.f32.mrb[61].mxu0  ;;  %v5973_v62 = vld [vmem:[%s8506_s16] ss:$0 sm:$0xff] }
0x1fa4   : > { %v2997_v3 = vpop.f32.mrb[62].mxu0 }
0x1fa5   : > { %v6564_v57 = vpop.f32.mrb[63].mxu0  ;;  %v3007_v6 = vadd.f32 %v5962_v63, %v3000_v0  ;;  %v5974_v0 = vld [vmem:[%s8506_s16 + $0x1] ss:$0 sm:$0xff] }
0x1fa6   : > { %v6966_v57 = vld [vmem:[%s8504_s14 + $0x10] sm:$0xff]  }
0x1fa7   : > { %v3011_v7 = vsel %vm898_vm4, %v3007_v6, 0.0 }
0x1fa8   : > { %3012 = vadd.xlane.f32.xlu1 %v3011_v7  ;;  %v6967_v7 = vld [vmem:[%s8504_s14 + $0x18] sm:$0xff]  }
0x2035   : > { %v3013_v8 = vpop.xlane.xlu1 %3012 }
0x2036   : > { %v3014_v9 = vmul.f32 0.03125, %v3013_v8  ;;  %v5975_v8 = vld [vmem:[%s8506_s16 + $0x2] ss:$0 sm:$0xff] }
0x2038   : > { %v3015_v10 = vsub.f32 %v3007_v6, %v3014_v9  ;;  %v5983_v9 = vld [vmem:[%s8506_s16 + $0x4] ss:$0 sm:$0xff] }
0x203a   : > { %v3016_v11 = vmul.f32 %v3015_v10, %v3015_v10 }
0x203c   : > { %v3017_v19 = vsel %vm898_vm4, %v3016_v11, 0.0 }
0x203d   : > { %3018 = vadd.xlane.f32.xlu1 %v3017_v19 }
0x204e   : > { %3092 = vperm.xlu1 %6919, %v3089_v13  }
0x20ca   : > { %v3019_v26 = vpop.xlane.xlu1 %3018 }
0x20cb   : > { %v3020_v27 = vmul.f32 0.03125, %v3019_v26 }
0x20cd   : > { %v3021_v29 = vadd.f32 1e-12, %v3020_v27 }
0x20ce   : > { %v3093_v12 = vpop.permute.xlu1 %3092 }
0x20cf   : > { %7048 = vrsqrt.f32 %v3021_v29  ;;  %vm3094_vm9 = vcmp.eq.s32.totalorder %v3093_v12, %v7345_v5 }
0x20d0   : > { %v5967_v38 = vsel %vm3094_vm9, 1.0, %v7162_v45 }
0x20d1   : > { %v3097_v40 = vpack.c.bf16 %v5967_v38, %v5967_v38 }
0x20d9   : > { %v7049_v30 = vpop.eup %7048 }
0x20da   : > { %v3023_v32 = vmul.f32 %v7049_v30, %v3015_v10  ;;  %v5979_v30 = vld [vmem:[%s8506_s16 + $0x3] ss:$0 sm:$0xff] }
0x20dc   : > { %v3030_v33 = vmul.f32 %v5964_v31, %v3023_v32 }
0x20de   : > { %v3037_v34 = vadd.f32 %v5965_v28, %v3030_v33 }
0x20e0   : > { %v3043_v24 = vpack.c.bf16 %v3037_v34, %v3037_v34 }
0x20e2   : > { %6570 = vmatmul.mubr.msk.bf16.vlgmr.msra.gmra.mrb[76].mxu1 %vm898_vm4, %v3043_v24 }
0x20e3   : > { %6574 = vmatpush3.bf16.msra.mxu1 %v6958_v35  ;;  %6581 = vmatprep.mubr.msk.bf16.mxu1 %vm7163_vm5, %v7162_v45 }
0x20e4   : > { %6575 = vmatprep.subr.bf16.mxu1 %v7162_v45 }
0x20e7   : > { %6576 = vmatpush3.bf16.msra.mxu1 %v6959_v56 }
0x20e8   : > { %6577 = vmatprep.subr.bf16.mxu1 %v7162_v45 }
0x20eb   : > { %6578 = vmatpush3.bf16.msra.mxu1 %v6960_v37 }
0x20ec   : > { %6579 = vmatprep.subr.bf16.mxu1 %v7162_v45 }
0x20ef   : > { %6580 = vmatpush3.bf16.msra.mxu1 %v6961_v39 }
0x20f0   : > { %6601 = vmatprep.subr.bf16.mxu1 %v7162_v45 }
0x20f2   : > { %6582 = vmatmul.mubr.msk.bf16.vlgmr.msra.gmra.mrb[80].mxu1 %vm816_vm1, %v3097_v40 }
0x20f3   : > { %6605 = vmatprep.mubr.msk.bf16.mxu1 %vm7163_vm5, %v7162_v45  ;;  %6602 = vmatpush3.bf16.msra.mxu1 %v6963_v54 }
0x20f4   : > { %6603 = vmatprep.subr.bf16.mxu1 %v7162_v45 }
0x20f7   : > { %6604 = vmatpush3.bf16.msra.mxu1 %v6965_v58 }
0x20f8   : > { %6615 = vmatprep.subr.bf16.mxu1 %v7162_v45 }
0x21b5   : > { %v7887_v2 = vpop.f32.mrb[76].mxu1 }
0x21b6   : > { %v6571_v5 = vpop.f32.mrb[77].mxu1 }
0x21b7   : > { %v3086_v41 = vpop.f32.mrb[78].mxu1 }
0x21b8   : > { %v6572_v42 = vpop.f32.mrb[79].mxu1 }
0x21c5   : > { %v3168_v44 = vpop.f32.mrb[80].mxu1 }
0x21c6   : > { %v7892_v46 = vadd.f32 %v3168_v44, %v3106_v43  ;;  %v6583_v47 = vpop.f32.mrb[81].mxu1 }
0x21c7   : > { %v3171_v4 = vpop.f32.mrb[82].mxu1 }
0x21c8   : > { %v6584_v36 = vpop.f32.mrb[83].mxu1  ;;  %v3222_v18 = vsel %vm898_vm4, %v7892_v46, 0.0 }
0x21c9   : > { %3223 = vadd.xlane.f32.xlu0 %v3222_v18 }
0x2256   : > { %v3224_v48 = vpop.xlane.xlu0 %3223 }
0x2257   : > { %v3225_v49 = vmul.f32 0.03125, %v3224_v48 }
0x2259   : > { %v3226_v50 = vsub.f32 %v7892_v46, %v3225_v49 }
0x225b   : > { %v3227_v51 = vmul.f32 %v3226_v50, %v3226_v50 }
0x225d   : > { %v3228_v52 = vsel %vm898_vm4, %v3227_v51, 0.0 }
0x225e   : > { %3229 = vadd.xlane.f32.xlu1 %v3228_v52 }
0x22eb   : > { %v3230_v59 = vpop.xlane.xlu1 %3229 }
0x22ec   : > { %v3231_v23 = vmul.f32 0.03125, %v3230_v59 }
0x22ee   : > { %v3232_v60 = vadd.f32 1e-05, %v3231_v23 }
0x22f0   : > { %7050 = vrsqrt.f32 %v3232_v60 }
0x22fa   : > { %v7051_v61 = vpop.eup %7050 }
0x22fb   : > { %v3234_v63 = vmul.f32 %v7051_v61, %v3226_v50 }
0x22fd   : > { %v3241_v1 = vmul.f32 %v5973_v62, %v3234_v63 }
0x22ff   : > { %v3248_v3 = vadd.f32 %v5974_v0, %v3241_v1  ;;  %v3200_v1 = vld [vmem:[%s8504_s14 + $0x34] sm:$0xf] }
0x2301   : > { %v3249_v6 = vpack.c.bf16 %v3248_v3, %v3248_v3  ;;  %v3657_v3 = vsel %vm1172_vm7, %v3200_v1, 0 }
0x2303   : > { %6590 = vmatmul.mubr.msk.bf16.vlgmr.msra.gmra.mrb[64].mxu0 %vm898_vm4, %v3249_v6  ;;  %6606 = vmatmul.mubr.msk.bf16.vlgmr.msra.gmra.mrb[84].mxu1 %vm898_vm4, %v3249_v6 }
0x2304   : > { %6594 = vmatpush3.bf16.msra.mxu0 %v6966_v57  ;;  %6597 = vmatprep.mubr.msk.bf16.mxu0 %vm7163_vm5, %v7162_v45 }
0x2305   : > { %6595 = vmatprep.subr.bf16.mxu0 %v7162_v45  ;;  %6617 = vmatprep.mubr.msk.bf16.mxu1 %vm7163_vm5, %v7162_v45 }
0x2308   : > { %6596 = vmatpush3.bf16.msra.mxu0 %v6967_v7 }
0x2309   : > { %6609 = vmatprep.subr.bf16.mxu0 %v7162_v45 }
0x230b   : > { %6598 = vmatmul.mubr.msk.bf16.vlgmr.msra.gmra.mrb[68].mxu0 %vm898_vm4, %v3249_v6 }
0x230c   : > { %6611 = vmatprep.mubr.msk.bf16.mxu0 %vm7163_vm5, %v7162_v45 }
0x23d6   : > { %v3305_v10 = vpop.f32.mrb[64].mxu0  ;;  %v3421_v11 = vpop.f32.mrb[84].mxu1 }
0x23d7   : > { %v3306_v19 = vadd.f32 %v5975_v8, %v3305_v10  ;;  %v3422_v13 = vadd.f32 %v5983_v9, %v3421_v11  ;;  %v6591_v14 = vpop.f32.mrb[65].mxu0  ;;  %v6607_v16 = vpop.f32.mrb[85].mxu1  ;;  %v3199_v9 = vld [vmem:[%s8504_s14 + $0x30] sm:$0xf] }
0x23d8   : > { %v3308_v17 = vpop.f32.mrb[66].mxu0  ;;  %v3424_v21 = vpop.f32.mrb[86].mxu1 }
0x23d9   : > { %v7943_v22 = vpack.c.bf16 %v3306_v19, %v3306_v19  ;;  %v7945_v25 = vpack.c.bf16 %v3422_v13, %v3422_v13  ;;  %v6592_v26 = vpop.f32.mrb[67].mxu0  ;;  %v6608_v27 = vpop.f32.mrb[87].mxu1  ;;  %v3703_v19 = vsel %vm1172_vm7, %v3199_v9, 0 }
0x23db   : > { %3538 = vrot.lane.b32.xlu1 %v7943_v22, %s8564_s2  ;;  %v3494_v29 = vsel %vm1172_vm7, %v7945_v25, 0 }
0x23dc   : > { %6616 = vmatpush3.bf16.msra.mxu1 %v3494_v29 }
0x23dd   : > { %6627 = vmatprep.subr.bf16.mxu1 %v7162_v45 }
0x23de   : > { %v3363_v31 = vpop.f32.mrb[68].mxu0 }
0x23df   : > { %v3364_v32 = vadd.f32 %v5979_v30, %v3363_v31  ;;  %v6599_v28 = vpop.f32.mrb[69].mxu0 }
0x23e0   : > { %v3366_v33 = vpop.f32.mrb[70].mxu0 }
0x23e1   : > { %v7955_v34 = vpack.c.bf16 %v3364_v32, %v3364_v32  ;;  %v6600_v35 = vpop.f32.mrb[71].mxu0 }
0x23e3   : > { %3541 = vrot.lane.b32.xlu0 %v7955_v34, %s8564_s2  ;;  %v3433_v24 = vsel %vm1107_vm6, %v7955_v34, 0 }
0x23e4   : > { %6610 = vmatpush3.bf16.xpose.msra.mxu0 %v3433_v24 }
0x23e5   : > { %6621 = vmatprep.subr.bf16.mxu0 %v7162_v45 }
0x23eb   : > { %6612 = vmatmul.mubr.msk.bf16.vlgmr.msra.gmra.mrb[72].mxu0 %vm1107_vm6, %v7943_v22 }
0x23ec   : > { %6623 = vmatprep.mubr.msk.bf16.mxu0 %vm7163_vm5, %v7162_v45 }
0x244d   : > { %v3539_v37 = vpop.permute.xlu1 %3538 }
0x2455   : > { %v3542_v56 = vpop.permute.xlu0 %3541 }
0x2456   : > { %v3547_v12 = vsel %vm1107_vm6, %v3542_v56, 0 }
0x2457   : > { %6622 = vmatpush3.bf16.xpose.msra.mxu0 %v3547_v12 }
0x2458   : > { %6633 = vmatprep.subr.bf16.mxu0 %v7162_v45 }
0x245e   : > { %6624 = vmatmul.mubr.msk.bf16.vlgmr.msra.gmra.mrb[76].mxu0 %vm1107_vm6, %v3539_v37 }
0x245f   : > { %6635 = vmatprep.mubr.msk.bf16.mxu0 %vm7163_vm5, %v7162_v45  ;;  %6634 = vmatpush3.bf16.msra.mxu0 %v3657_v3 }
0x2460   : > { %6645 = vmatprep.subr.bf16.mxu0 %v7162_v45 }
0x24be   : > { %v3469_v38 = vpop.f32.mrb[72].mxu0 }
0x24bf   : > { %v3475_v39 = vmul.f32 0.35355338, %v3469_v38  ;;  %v6613_v40 = vpop.f32.mrb[73].mxu0 }
0x24c0   : > { %v3472_v5 = vpop.f32.mrb[74].mxu0 }
0x24c1   : > { %v6614_v41 = vpop.f32.mrb[75].mxu0  ;;  %v3476_v42 = vadd.f32 %v3475_v39, %v7371_v20 }
0x24c3   : > { %v3477_v43 = vsel %vm1107_vm6, %v3476_v42, -inf }
0x24c4   : > { %3478 = vmax.xlane.f32.xlu0 %v3477_v43 }
0x2531   : > { %v3583_v44 = vpop.f32.mrb[76].mxu0 }
0x2532   : > { %v3589_v47 = vmul.f32 0.35355338, %v3583_v44  ;;  %v6625_v4 = vpop.f32.mrb[77].mxu0 }
0x2533   : > { %v3586_v36 = vpop.f32.mrb[78].mxu0 }
0x2534   : > { %v6626_v18 = vpop.f32.mrb[79].mxu0  ;;  %v3590_v48 = vadd.f32 %v3589_v47, %v7371_v20 }
0x2536   : > { %v3591_v49 = vsel %vm1107_vm6, %v3590_v48, -inf }
0x2537   : > { %3592 = vmax.xlane.f32.xlu1 %v3591_v49 }
0x2548   : > { %3747 = vrot.lane.b32.xlu1 %v7955_v34, %s8565_s22 }
0x2551   : > { %v3479_v50 = vpop.xlane.xlu0 %3478 }
0x2552   : > { %v3480_v51 = vsub.f32 %v3476_v42, %v3479_v50 }
0x2554   : > { %v3481_v52 = vmul.f32 1.442695, %v3480_v51 }
0x2556   : > { %7052 = vpow2.f32 %v3481_v52 }
0x2560   : > { %v7053_v53 = vpop.eup %7052 }
0x2561   : > { %v3483_v54 = vsel %vm1107_vm6, %v7053_v53, 0.0 }
0x2562   : > { %3484 = vadd.xlane.f32.xlu0 %v3483_v54 }
0x25c4   : > { %v3593_v55 = vpop.xlane.xlu1 %3592 }
0x25c5   : > { %v3594_v58 = vsub.f32 %v3590_v48, %v3593_v55 }
0x25c7   : > { %v3595_v59 = vmul.f32 1.442695, %v3594_v58 }
0x25c8   : > { %v3748_v26 = vpop.permute.xlu1 %3747 }
0x25c9   : > { %7054 = vpow2.f32 %v3595_v59  ;;  %v3753_v32 = vsel %vm1107_vm6, %v3748_v26, 0 }
0x25d3   : > { %v7055_v23 = vpop.eup %7054 }
0x25d4   : > { %v3597_v60 = vsel %vm1107_vm6, %v7055_v23, 0.0 }
0x25d5   : > { %3598 = vadd.xlane.f32.xlu0 %v3597_v60 }
0x25eb   : > { %3604 = vrot.lane.b32.xlu0 %v7945_v25, %s8564_s2 }
0x25ef   : > { %v3485_v61 = vpop.xlane.xlu0 %3484  ;;  %3745 = vrot.lane.b32.xlu0 %v7943_v22, %s8565_s22 }
0x25f0   : > { %7056 = vrcp.f32 %v3485_v61 }
0x25fa   : > { %v7057_v62 = vpop.eup %7056 }
0x25fb   : > { %v3487_v63 = vmul.f32 %v7057_v62, %v7053_v53 }
0x25fd   : > { %v3488_v0 = vpack.c.bf16 %v3487_v63, %v3487_v63 }
0x25ff   : > { %6618 = vmatmul.mubr.msk.bf16.vlgmr.msra.gmra.mrb[88].mxu1 %vm1107_vm6, %v3488_v0 }
0x2600   : > { %6629 = vmatprep.mubr.msk.bf16.mxu1 %vm7163_vm5, %v7162_v45 }
0x2662   : > { %v3599_v57 = vpop.xlane.xlu0 %3598 }
0x2663   : > { %7058 = vrcp.f32 %v3599_v57 }
0x2666   : > { %v3605_v6 = vpop.permute.xlu0 %3604 }
0x2667   : > { %v3610_v7 = vsel %vm1172_vm7, %v3605_v6, 0 }
0x2668   : > { %6628 = vmatpush3.bf16.msra.mxu1 %v3610_v7 }
0x2669   : > { %6639 = vmatprep.subr.bf16.mxu1 %v7162_v45 }
0x266a   : > { %v3746_v33 = vpop.permute.xlu0 %3745 }
0x266d   : > { %v7059_v8 = vpop.eup %7058 }
0x266e   : > { %v3601_v10 = vmul.f32 %v7059_v8, %v7055_v23 }
0x2670   : > { %v3602_v11 = vpack.c.bf16 %v3601_v10, %v3601_v10 }
0x2672   : > { %6630 = vmatmul.mubr.msk.bf16.vlgmr.msra.gmra.mrb[92].mxu1 %vm1107_vm6, %v3602_v11 }
0x2673   : > { %6640 = vmatpush3.bf16.msra.mxu1 %v3703_v19  ;;  %6641 = vmatprep.mubr.msk.bf16.mxu1 %vm7163_vm5, %v7162_v45 }
0x2674   : > { %6651 = vmatprep.subr.bf16.mxu1 %v7162_v45 }
0x26d2   : > { %v3530_v13 = vpop.f32.mrb[88].mxu1 }
0x26d3   : > { %v3536_v14 = vpack.c.bf16 %v3530_v13, %v3530_v13  ;;  %v6619_v16 = vpop.f32.mrb[89].mxu1 }
0x26d4   : > { %v3533_v17 = vpop.f32.mrb[90].mxu1 }
0x26d5   : > { %v6620_v21 = vpop.f32.mrb[91].mxu1  ;;  %6642 = vmatmul.mubr.msk.bf16.vlgmr.msra.gmra.mrb[96].mxu1 %vm1107_vm6, %v3536_v14 }
0x26d6   : > { %6653 = vmatprep.mubr.msk.bf16.mxu1 %vm7163_vm5, %v7162_v45  ;;  %v3202_v21 = vld [vmem:[%s8504_s14 + $0x3c] sm:$0xf] }
0x26d7   : > { %v4022_v26 = vsel %vm1172_vm7, %v3202_v21, 0  ;;  %v6007_v21 = vld [vmem:[%s8506_s16 + $0x8] ss:$0 sm:$0xff] }
0x2745   : > { %v3646_v27 = vpop.f32.mrb[92].mxu1 }
0x2746   : > { %v3652_v29 = vpack.c.bf16 %v3646_v27, %v3646_v27  ;;  %v6631_v30 = vpop.f32.mrb[93].mxu1 }
0x2747   : > { %v3649_v31 = vpop.f32.mrb[94].mxu1 }
0x2748   : > { %v6632_v28 = vpop.f32.mrb[95].mxu1  ;;  %6636 = vmatmul.mubr.msk.bf16.vlgmr.msra.gmra.mrb[80].mxu0 %vm1107_vm6, %v3652_v29 }
0x2749   : > { %6646 = vmatpush3.bf16.xpose.msra.mxu0 %v3753_v32  ;;  %6647 = vmatprep.mubr.msk.bf16.mxu0 %vm7163_vm5, %v7162_v45 }
0x274a   : > { %6657 = vmatprep.subr.bf16.mxu0 %v7162_v45 }
0x2750   : > { %6648 = vmatmul.mubr.msk.bf16.vlgmr.msra.gmra.mrb[84].mxu0 %vm1107_vm6, %v3746_v33 }
0x2751   : > { %6659 = vmatprep.mubr.msk.bf16.mxu0 %vm7163_vm5, %v7162_v45 }
0x27a8   : > { %v3739_v35 = vpop.f32.mrb[96].mxu1 }
0x27a9   : > { %v6643_v24 = vpop.f32.mrb[97].mxu1 }
0x27aa   : > { %v3742_v56 = vpop.f32.mrb[98].mxu1 }
0x27ab   : > { %v6644_v12 = vpop.f32.mrb[99].mxu1  ;;  %v6968_v56 = vld [vmem:[%s8505_s15] sm:$0xff]  }
0x281b   : > { %v3693_v37 = vpop.f32.mrb[80].mxu0 }
0x281c   : > { %v8012_v38 = vadd.f32 %v3739_v35, %v3693_v37  ;;  %v6637_v39 = vpop.f32.mrb[81].mxu0  ;;  %v3042_v37 = vld [vmem:[%s8501_s11 + $0x20] sm:$0x1] }
0x281d   : > { %v3696_v40 = vpop.f32.mrb[82].mxu0  ;;  %v3084_v39 = vadd.f32 %v7887_v2, %v3042_v37 }
0x281e   : > { %v6638_v5 = vpop.f32.mrb[83].mxu0 }
0x281f   : > { %v8068_v40 = vpack.c.bf16 %v3084_v39, %v3084_v39 }
0x2823   : > { %v3789_v41 = vpop.f32.mrb[84].mxu0 }
0x2824   : > { %v3795_v42 = vmul.f32 0.35355338, %v3789_v41  ;;  %v6649_v43 = vpop.f32.mrb[85].mxu0  ;;  %v6970_v41 = vld [vmem:[%s8505_s15 + $0x10] sm:$0xff]  }
0x2825   : > { %v3792_v44 = vpop.f32.mrb[86].mxu0 }
0x2826   : > { %v6650_v47 = vpop.f32.mrb[87].mxu0  ;;  %v3796_v4 = vadd.f32 %v3795_v42, %v7371_v20 }
0x2827   : > { %v6971_v47 = vld [vmem:[%s8505_s15 + $0x18] sm:$0xff]  }
0x2828   : > { %v3797_v36 = vsel %vm1107_vm6, %v3796_v4, -inf }
0x2829   : > { %3798 = vmax.xlane.f32.xlu0 %v3797_v36 }
0x283f   : > { %3809 = vrot.lane.b32.xlu0 %v7945_v25, %s8565_s22 }
0x2843   : > { %3905 = vrot.lane.b32.xlu0 %v7943_v22, %s8566_s7 }
0x28b6   : > { %v3799_v18 = vpop.xlane.xlu0 %3798 }
0x28b7   : > { %v3800_v48 = vsub.f32 %v3796_v4, %v3799_v18  ;;  %v3217_v4 = vld [vmem:[%s8506_s16 + $0x6] sm:$0x1] }
0x28b9   : > { %v3801_v49 = vmul.f32 1.442695, %v3800_v48 }
0x28ba   : > { %v3810_v50 = vpop.permute.xlu0 %3809 }
0x28bb   : > { %7060 = vpow2.f32 %v3801_v49  ;;  %v3815_v51 = vsel %vm1172_vm7, %v3810_v50, 0 }
0x28bc   : > { %6652 = vmatpush3.bf16.msra.mxu1 %v3815_v51 }
0x28bd   : > { %6663 = vmatprep.subr.bf16.mxu1 %v7162_v45 }
0x28be   : > { %v3906_v60 = vpop.permute.xlu0 %3905 }
0x28c5   : > { %v7061_v52 = vpop.eup %7060 }
0x28c6   : > { %v3803_v53 = vsel %vm1107_vm6, %v7061_v52, 0.0 }
0x28c7   : > { %3804 = vadd.xlane.f32.xlu1 %v3803_v53 }
0x28d8   : > { %3907 = vrot.lane.b32.xlu1 %v7955_v34, %s8566_s7  ;;  %v3201_v34 = vld [vmem:[%s8504_s14 + $0x38] sm:$0xf] }
0x28d9   : > { %v3862_v61 = vsel %vm1172_vm7, %v3201_v34, 0 }
0x28da   : > { %6658 = vmatpush3.bf16.msra.mxu0 %v3862_v61 }
0x28db   : > { %6669 = vmatprep.subr.bf16.mxu0 %v7162_v45 }
0x2954   : > { %v3805_v54 = vpop.xlane.xlu1 %3804 }
0x2955   : > { %7062 = vrcp.f32 %v3805_v54 }
0x2958   : > { %v3908_v58 = vpop.permute.xlu1 %3907 }
0x2959   : > { %v3913_v23 = vsel %vm1107_vm6, %v3908_v58, 0  ;;  %v5999_v58 = vld [vmem:[%s8506_s16 + $0x5] ss:$0 sm:$0xff] }
0x295f   : > { %v7063_v22 = vpop.eup %7062 }
0x2960   : > { %v3807_v55 = vmul.f32 %v7063_v22, %v7061_v52 }
0x2962   : > { %v3808_v59 = vpack.c.bf16 %v3807_v55, %v3807_v55 }
0x2964   : > { %6654 = vmatmul.mubr.msk.bf16.vlgmr.msra.gmra.mrb[100].mxu1 %vm1107_vm6, %v3808_v59 }
0x2965   : > { %6664 = vmatpush3.bf16.xpose.msra.mxu1 %v3913_v23  ;;  %6665 = vmatprep.mubr.msk.bf16.mxu1 %vm7163_vm5, %v7162_v45 }
0x2966   : > { %6675 = vmatprep.subr.bf16.mxu1 %v7162_v45 }
0x296c   : > { %6666 = vmatmul.mubr.msk.bf16.vlgmr.msra.gmra.mrb[104].mxu1 %vm1107_vm6, %v3906_v60 }
0x296d   : > { %6677 = vmatprep.mubr.msk.bf16.mxu1 %vm7163_vm5, %v7162_v45  ;;  %6676 = vmatpush3.bf16.msra.mxu1 %v4022_v26 }
0x296e   : > { %6689 = vmatprep.subr.bf16.mxu1 %v7162_v45 }
0x2a37   : > { %v3851_v62 = vpop.f32.mrb[100].mxu1 }
0x2a38   : > { %v3857_v63 = vpack.c.bf16 %v3851_v62, %v3851_v62  ;;  %v6655_v0 = vpop.f32.mrb[101].mxu1  ;;  %v6006_v62 = vld [vmem:[%s8506_s16 + $0x7] ss:$0 sm:$0xff] }
0x2a39   : > { %v3854_v1 = vpop.f32.mrb[102].mxu1 }
0x2a3a   : > { %v6656_v3 = vpop.f32.mrb[103].mxu1  ;;  %6660 = vmatmul.mubr.msk.bf16.vlgmr.msra.gmra.mrb[88].mxu0 %vm1107_vm6, %v3857_v63 }
0x2a3b   : > { %6671 = vmatprep.mubr.msk.bf16.mxu0 %vm7163_vm5, %v7162_v45 }
0x2a3f   : > { %v3949_v57 = vpop.f32.mrb[104].mxu1 }
0x2a40   : > { %v3955_v6 = vmul.f32 0.35355338, %v3949_v57  ;;  %v6667_v7 = vpop.f32.mrb[105].mxu1 }
0x2a41   : > { %v3952_v8 = vpop.f32.mrb[106].mxu1 }
0x2a42   : > { %v6668_v9 = vpop.f32.mrb[107].mxu1  ;;  %v3956_v10 = vadd.f32 %v3955_v6, %v7371_v20 }
0x2a44   : > { %v3957_v11 = vsel %vm1107_vm6, %v3956_v10, -inf }
0x2a45   : > { %3958 = vmax.xlane.f32.xlu1 %v3957_v11  ;;  %v6973_v11 = vld [vmem:[%s8507_s17 + $0x8] sm:$0xff]  }
0x2ad2   : > { %v3959_v19 = vpop.xlane.xlu1 %3958 }
0x2ad3   : > { %v3960_v13 = vsub.f32 %v3956_v10, %v3959_v19  ;;  %v6972_v10 = vld [vmem:[%s8507_s17] sm:$0xff]  }
0x2ad4   : > { %v6974_v19 = vld [vmem:[%s8509_s19] sm:$0xff]  }
0x2ad5   : > { %v3961_v14 = vmul.f32 1.442695, %v3960_v13 }
0x2ad7   : > { %7064 = vpow2.f32 %v3961_v14 }
0x2ae1   : > { %v7065_v16 = vpop.eup %7064 }
0x2ae2   : > { %v3963_v17 = vsel %vm1107_vm6, %v7065_v16, 0.0 }
0x2ae3   : > { %3964 = vadd.xlane.f32.xlu0 %v3963_v17 }
0x2af9   : > { %3969 = vrot.lane.b32.xlu0 %v7945_v25, %s8566_s7 }
0x2b0d   : > { %v3898_v27 = vpop.f32.mrb[88].mxu0 }
0x2b0e   : > { %v3904_v29 = vadd.f32 %v3898_v27, %v8012_v38  ;;  %v6661_v30 = vpop.f32.mrb[89].mxu0  ;;  %v6969_v38 = vld [vmem:[%s8505_s15 + $0x8] sm:$0xff]  }
0x2b0f   : > { %v3901_v31 = vpop.f32.mrb[90].mxu0  ;;  %v6008_v27 = vld [vmem:[%s8506_s16 + $0x9] ss:$0 sm:$0xff] }
0x2b10   : > { %v6662_v32 = vpop.f32.mrb[91].mxu0 }
0x2b11   : > { %v6975_v32 = vld [vmem:[%s8509_s19 + $0x8] sm:$0xff]  }
0x2b70   : > { %v3965_v28 = vpop.xlane.xlu0 %3964 }
0x2b71   : > { %7066 = vrcp.f32 %v3965_v28  ;;  %v6976_v28 = vld [vmem:[%s8509_s19 + $0x10] sm:$0xff]  }
0x2b74   : > { %v3970_v33 = vpop.permute.xlu0 %3969 }
0x2b75   : > { %v3975_v25 = vsel %vm1172_vm7, %v3970_v33, 0  ;;  %v6977_v33 = vld [vmem:[%s8509_s19 + $0x18] sm:$0xff]  }
0x2b76   : > { %6670 = vmatpush3.bf16.msra.mxu0 %v3975_v25  ;;  %v6978_v25 = vld [vmem:[%s8509_s19 + $0x20] sm:$0xff]  }
0x2b77   : > { %6681 = vmatprep.subr.bf16.mxu0 %v7162_v45 }
0x2b7b   : > { %v7067_v35 = vpop.eup %7066 }
0x2b7c   : > { %v3967_v24 = vmul.f32 %v7067_v35, %v7065_v16  ;;  %v6979_v35 = vld [vmem:[%s8509_s19 + $0x28] sm:$0xff]  }
0x2b7e   : > { %v3968_v12 = vpack.c.bf16 %v3967_v24, %v3967_v24  ;;  %v6980_v24 = vld [vmem:[%s8509_s19 + $0x30] sm:$0xff]  }
0x2b80   : > { %6672 = vmatmul.mubr.msk.bf16.vlgmr.msra.gmra.mrb[92].mxu0 %vm1107_vm6, %v3968_v12  ;;  %v6009_v12 = vld [vmem:[%s8508_s18] ss:$0 sm:$0xff] }
0x2b81   : > { %6682 = vmatpush3.bf16.msra.mxu0 %v6968_v56  ;;  %6685 = vmatprep.mubr.msk.bf16.mxu0 %vm7163_vm5, %v7162_v45  ;;  %v6981_v56 = vld [vmem:[%s8509_s19 + $0x38] sm:$0xff]  }
0x2b82   : > { %6683 = vmatprep.subr.bf16.mxu0 %v7162_v45 }
0x2b85   : > { %6684 = vmatpush3.bf16.msra.mxu0 %v6969_v38 }
0x2b86   : > { %6697 = vmatprep.subr.bf16.mxu0 %v7162_v45 }
0x2b88   : > { %6686 = vmatmul.mubr.msk.bf16.vlgmr.msra.gmra.mrb[96].mxu0 %vm898_vm4, %v8068_v40 }
0x2b89   : > { %6701 = vmatprep.mubr.msk.bf16.mxu0 %vm7163_vm5, %v7162_v45  ;;  %6698 = vmatpush3.bf16.msra.mxu0 %v6972_v10  ;;  %v6984_v10 = vld [vmem:[%s8504_s14 + $0x50] sm:$0xff]  }
0x2b8a   : > { %6699 = vmatprep.subr.bf16.mxu0 %v7162_v45 }
0x2b8d   : > { %6700 = vmatpush3.bf16.msra.mxu0 %v6973_v11 }
0x2b8e   : > { %6725 = vmatprep.subr.bf16.mxu0 %v7162_v45 }
0x2c53   : > { %v4011_v5 = vpop.f32.mrb[92].mxu0 }
0x2c54   : > { %v4017_v42 = vpack.c.bf16 %v4011_v5, %v4011_v5  ;;  %v6673_v2 = vpop.f32.mrb[93].mxu0 }
0x2c55   : > { %v4014_v43 = vpop.f32.mrb[94].mxu0 }
0x2c56   : > { %v6674_v44 = vpop.f32.mrb[95].mxu0  ;;  %6678 = vmatmul.mubr.msk.bf16.vlgmr.msra.gmra.mrb[108].mxu1 %vm1107_vm6, %v4017_v42 }
0x2c57   : > { %6690 = vmatpush3.bf16.msra.mxu1 %v6970_v41  ;;  %6693 = vmatprep.mubr.msk.bf16.mxu1 %vm7163_vm5, %v7162_v45 }
0x2c58   : > { %6691 = vmatprep.subr.bf16.mxu1 %v7162_v45 }
0x2c5b   : > { %v4123_v36 = vpop.f32.mrb[96].mxu0  ;;  %6692 = vmatpush3.bf16.msra.mxu1 %v6971_v47 }
0x2c5c   : > { %v4124_v18 = vadd.f32 %v4123_v36, %v3217_v4  ;;  %v6687_v48 = vpop.f32.mrb[97].mxu0  ;;  %6705 = vmatprep.subr.bf16.mxu1 %v7162_v45 }
0x2c5d   : > { %v4126_v49 = vpop.f32.mrb[98].mxu0 }
0x2c5e   : > { %v4129_v50 = vpack.c.bf16 %v4124_v18, %v4124_v18  ;;  %v6688_v51 = vpop.f32.mrb[99].mxu0 }
0x2c60   : > { %6694 = vmatmul.mubr.msk.bf16.vlgmr.msra.gmra.mrb[112].mxu1 %vm898_vm4, %v4129_v50  ;;  %v6021_v50 = vld [vmem:[%s8506_s16 + $0xa] ss:$0 sm:$0xff] }
0x2c61   : > { %6721 = vmatprep.mubr.msk.bf16.mxu1 %vm7163_vm5, %v7162_v45  ;;  %6706 = vmatpush3.bf16.msra.mxu1 %v6974_v19  ;;  %v6985_v19 = vld [vmem:[%s8504_s14 + $0x58] sm:$0xff]  }
0x2c62   : > { %6707 = vmatprep.subr.bf16.mxu1 %v7162_v45 }
0x2c65   : > { %6708 = vmatpush3.bf16.msra.mxu1 %v6975_v32 }
0x2c66   : > { %6709 = vmatprep.subr.bf16.mxu1 %v7162_v45 }
0x2c69   : > { %6710 = vmatpush3.bf16.msra.mxu1 %v6976_v28 }
0x2c6a   : > { %6711 = vmatprep.subr.bf16.mxu1 %v7162_v45 }
0x2c6d   : > { %6712 = vmatpush3.bf16.msra.mxu1 %v6977_v33 }
0x2c6e   : > { %6713 = vmatprep.subr.bf16.mxu1 %v7162_v45 }
0x2c71   : > { %6714 = vmatpush3.bf16.msra.mxu1 %v6978_v25 }
0x2c72   : > { %6715 = vmatprep.subr.bf16.mxu1 %v7162_v45 }
0x2c75   : > { %6716 = vmatpush3.bf16.msra.mxu1 %v6979_v35 }
0x2c76   : > { %6717 = vmatprep.subr.bf16.mxu1 %v7162_v45 }
0x2c79   : > { %6718 = vmatpush3.bf16.msra.mxu1 %v6980_v24 }
0x2c7a   : > { %6719 = vmatprep.subr.bf16.mxu1 %v7162_v45 }
0x2c7d   : > { %6720 = vmatpush3.bf16.msra.mxu1 %v6981_v56 }
0x2c7e   : > { %6755 = vmatprep.subr.bf16.mxu1 %v7162_v45 }
0x2d29   : > { %v4058_v52 = vpop.f32.mrb[108].mxu1 }
0x2d2a   : > { %v4064_v53 = vadd.f32 %v4058_v52, %v3904_v29  ;;  %v6679_v54 = vpop.f32.mrb[109].mxu1 }
0x2d2b   : > { %v4061_v22 = vpop.f32.mrb[110].mxu1 }
0x2d2c   : > { %v6680_v55 = vpop.f32.mrb[111].mxu1  ;;  %v4071_v59 = vadd.f32 %v5999_v58, %v4064_v53 }
0x2d2e   : > { %v4072_v60 = vadd.f32 %v4071_v59, %v7892_v46 }
0x2d33   : > { %v4179_v23 = vpop.f32.mrb[112].mxu1 }
0x2d34   : > { %v4188_v34 = vrot.slane %v4179_v23, %v7364_v15  ;;  %v6695_v61 = vpop.f32.mrb[113].mxu1 }
0x2d35   : > { %v4182_v63 = vpop.f32.mrb[114].mxu1 }
0x2d36   : > { %v4189_v0 = vadd.f32 %v4188_v34, %v4072_v60  ;;  %v6696_v1 = vpop.f32.mrb[115].mxu1  ;;  %v6983_v63 = vld [vmem:[%s8504_s14 + $0x48] sm:$0xff]  }
0x2d38   : > { %v8100_v3 = vadd.f32 %v6006_v62, %v4189_v0  ;;  %v6982_v62 = vld [vmem:[%s8504_s14 + $0x40] sm:$0xff]  }
0x2d3a   : > { %v4197_v57 = vsel %vm898_vm4, %v8100_v3, 0.0 }
0x2d3b   : > { %4198 = vadd.xlane.f32.xlu1 %v4197_v57 }
0x2dc8   : > { %v4199_v6 = vpop.xlane.xlu1 %4198 }
0x2dc9   : > { %v4200_v7 = vmul.f32 0.03125, %v4199_v6  ;;  %v6057_v6 = vld [vmem:[%s8506_s16 + $0xb] ss:$0 sm:$0xff] }
0x2dcb   : > { %v4201_v46 = vsub.f32 %v8100_v3, %v4200_v7 }
0x2dcd   : > { %v4202_v8 = vmul.f32 %v4201_v46, %v4201_v46 }
0x2dcf   : > { %v4203_v9 = vsel %vm898_vm4, %v4202_v8, 0.0 }
0x2dd0   : > { %4204 = vadd.xlane.f32.xlu1 %v4203_v9 }
0x2e5d   : > { %v4205_v13 = vpop.xlane.xlu1 %4204 }
0x2e5e   : > { %v4206_v14 = vmul.f32 0.03125, %v4205_v13  ;;  %v6986_v13 = vld [vmem:[%s8504_s14 + $0x60] sm:$0xff]  }
0x2e60   : > { %v4207_v16 = vadd.f32 1e-05, %v4206_v14  ;;  %v6987_v14 = vld [vmem:[%s8504_s14 + $0x68] sm:$0xff]  }
0x2e62   : > { %7068 = vrsqrt.f32 %v4207_v16  ;;  %v6059_v16 = vld [vmem:[%s8506_s16 + $0xd] ss:$0 sm:$0xff] }
0x2e6c   : > { %v7069_v17 = vpop.eup %7068 }
0x2e6d   : > { %v4209_v26 = vmul.f32 %v7069_v17, %v4201_v46  ;;  %v6058_v46 = vld [vmem:[%s8506_s16 + $0xc] ss:$0 sm:$0xff] }
0x2e6f   : > { %v4216_v29 = vmul.f32 %v6007_v21, %v4209_v26 }
0x2e71   : > { %v4223_v30 = vadd.f32 %v6008_v27, %v4216_v29 }
0x2e73   : > { %v4228_v31 = vpack.c.bf16 %v4223_v30, %v4223_v30 }
0x2e75   : > { %6702 = vmatmul.mubr.msk.bf16.vlgmr.msra.gmra.mrb[100].mxu0 %vm898_vm4, %v4228_v31  ;;  %v6063_v31 = vld [vmem:[%s8506_s16 + $0xe] ss:$0 sm:$0xff] }
0x2e76   : > { %6729 = vmatprep.mubr.msk.bf16.mxu0 %vm7163_vm5, %v7162_v45  ;;  %6726 = vmatpush3.bf16.msra.mxu0 %v6982_v62 }
0x2e77   : > { %6727 = vmatprep.subr.bf16.mxu0 %v7162_v45 }
0x2e7a   : > { %6728 = vmatpush3.bf16.msra.mxu0 %v6983_v63 }
0x2e7b   : > { %6733 = vmatprep.subr.bf16.mxu0 %v7162_v45 }
0x2f48   : > { %v4285_v37 = vpop.f32.mrb[100].mxu0 }
0x2f49   : > { %v4286_v38 = vadd.f32 %v6009_v12, %v4285_v37  ;;  %v6703_v39 = vpop.f32.mrb[101].mxu0  ;;  %v6067_v12 = vld [vmem:[%s8506_s16 + $0xf] ss:$0 sm:$0xff] }
0x2f4a   : > { %v4288_v5 = vpop.f32.mrb[102].mxu0 }
0x2f4b   : > { %v4292_v41 = vmul.f32 0.044715, %v4286_v38  ;;  %v6704_v42 = vpop.f32.mrb[103].mxu0  ;;  %v4291_v36 = vmul.f32 0.5, %v4286_v38 }
0x2f4d   : > { %v4293_v2 = vmul.f32 %v4292_v41, %v4286_v38 }
0x2f4f   : > { %v4294_v43 = vmul.f32 %v4293_v2, %v4286_v38 }
0x2f51   : > { %v4295_v44 = vadd.f32 %v4294_v43, %v4286_v38 }
0x2f53   : > { %v4296_v47 = vmul.f32 0.7978846, %v4295_v44 }
0x2f55   : > { %7070 = vtanh.f32 %v4296_v47 }
0x2f5f   : > { %v7071_v4 = vpop.eup %7070 }
0x2f60   : > { %v4298_v18 = vadd.f32 1.0, %v7071_v4 }
0x2f62   : > { %v4299_v48 = vmul.f32 %v4298_v18, %v4291_v36 }
0x2f64   : > { %v4316_v49 = vpack.c.bf16 %v4299_v48, %v4299_v48 }
0x2f66   : > { %6722 = vmatmul.mubr.bf16.vlgmr.msra.gmra.mrb[116].mxu1 %v4316_v49 }
0x2f67   : > { %6757 = vmatprep.mubr.msk.bf16.mxu1 %vm7163_vm5, %v7162_v45 }
0x3039   : > { %v4399_v51 = vpop.f32.mrb[116].mxu1 }
0x303a   : > { %v4405_v52 = vadd.f32 %v4399_v51, %v8100_v3  ;;  %v6723_v53 = vpop.f32.mrb[117].mxu1 }
0x303b   : > { %v4402_v54 = vpop.f32.mrb[118].mxu1 }
0x303c   : > { %v8164_v22 = vadd.f32 %v6021_v50, %v4405_v52  ;;  %v6724_v55 = vpop.f32.mrb[119].mxu1 }
0x303e   : > { %v4451_v58 = vsel %vm898_vm4, %v8164_v22, 0.0 }
0x303f   : > { %4452 = vadd.xlane.f32.xlu1 %v4451_v58 }
0x30cc   : > { %v4453_v59 = vpop.xlane.xlu1 %4452 }
0x30cd   : > { %v4454_v23 = vmul.f32 0.03125, %v4453_v59 }
0x30cf   : > { %v4455_v60 = vsub.f32 %v8164_v22, %v4454_v23 }
0x30d1   : > { %v4456_v34 = vmul.f32 %v4455_v60, %v4455_v60 }
0x30d3   : > { %v4457_v61 = vsel %vm898_vm4, %v4456_v34, 0.0 }
0x30d4   : > { %4458 = vadd.xlane.f32.xlu1 %v4457_v61 }
0x3161   : > { %v4459_v0 = vpop.xlane.xlu1 %4458 }
0x3162   : > { %v4460_v1 = vmul.f32 0.03125, %v4459_v0 }
0x3164   : > { %v4461_v3 = vadd.f32 1e-05, %v4460_v1 }
0x3166   : > { %7072 = vrsqrt.f32 %v4461_v3 }
0x3170   : > { %v7073_v57 = vpop.eup %7072 }
0x3171   : > { %v4463_v7 = vmul.f32 %v7073_v57, %v4455_v60 }
0x3173   : > { %v4470_v8 = vmul.f32 %v6057_v6, %v4463_v7 }
0x3175   : > { %v4477_v9 = vadd.f32 %v6058_v46, %v4470_v8 }
0x3177   : > { %v4478_v11 = vpack.c.bf16 %v4477_v9, %v4477_v9 }
0x3179   : > { %6730 = vmatmul.mubr.msk.bf16.vlgmr.msra.gmra.mrb[104].mxu0 %vm898_vm4, %v4478_v11 }
0x317a   : > { %6734 = vmatpush3.bf16.msra.mxu0 %v6984_v10  ;;  %6737 = vmatprep.mubr.msk.bf16.mxu0 %vm7163_vm5, %v7162_v45  ;;  %v6035_v10 = vld [vmem:[%s8504_s14 + $0x74] sm:$0xf] }
0x317b   : > { %6735 = vmatprep.subr.bf16.mxu0 %v7162_v45 }
0x317e   : > { %6736 = vmatpush3.bf16.msra.mxu0 %v6985_v19 }
0x317f   : > { %6741 = vmatprep.subr.bf16.mxu0 %v7162_v45 }
0x3181   : > { %6738 = vmatmul.mubr.msk.bf16.vlgmr.msra.gmra.mrb[108].mxu0 %vm898_vm4, %v4478_v11 }
0x3182   : > { %6742 = vmatpush3.bf16.msra.mxu0 %v6986_v13  ;;  %6745 = vmatprep.mubr.msk.bf16.mxu0 %vm7163_vm5, %v7162_v45 }
0x3183   : > { %6743 = vmatprep.subr.bf16.mxu0 %v7162_v45 }
0x3186   : > { %6744 = vmatpush3.bf16.msra.mxu0 %v6987_v14 }
0x3187   : > { %6749 = vmatprep.subr.bf16.mxu0 %v7162_v45 }
0x3189   : > { %6746 = vmatmul.mubr.msk.bf16.vlgmr.msra.gmra.mrb[112].mxu0 %vm898_vm4, %v4478_v11  ;;  %v4886_v11 = vsel %vm1172_vm7, %v6035_v10, 0 }
0x318a   : > { %6751 = vmatprep.mubr.msk.bf16.mxu0 %vm7163_vm5, %v7162_v45 }
0x324c   : > { %v4534_v17 = vpop.f32.mrb[104].mxu0 }
0x324d   : > { %v4535_v21 = vadd.f32 %v6059_v16, %v4534_v17  ;;  %v6731_v26 = vpop.f32.mrb[105].mxu0  ;;  %v6034_v17 = vld [vmem:[%s8504_s14 + $0x70] sm:$0xf] }
0x324e   : > { %v4537_v27 = vpop.f32.mrb[106].mxu0 }
0x324f   : > { %v8212_v29 = vpack.c.bf16 %v4535_v21, %v4535_v21  ;;  %v6732_v30 = vpop.f32.mrb[107].mxu0  ;;  %v4932_v27 = vsel %vm1172_vm7, %v6034_v17, 0 }
0x3251   : > { %4767 = vrot.lane.b32.xlu0 %v8212_v29, %s8564_s2 }
0x3254   : > { %v4592_v32 = vpop.f32.mrb[108].mxu0 }
0x3255   : > { %v4593_v28 = vadd.f32 %v6063_v31, %v4592_v32  ;;  %v6739_v33 = vpop.f32.mrb[109].mxu0 }
0x3256   : > { %v4595_v25 = vpop.f32.mrb[110].mxu0 }
0x3257   : > { %v8219_v35 = vpack.c.bf16 %v4593_v28, %v4593_v28  ;;  %v6740_v24 = vpop.f32.mrb[111].mxu0 }
0x3259   : > { %4770 = vrot.lane.b32.xlu1 %v8219_v35, %s8564_s2  ;;  %v4662_v56 = vsel %vm1107_vm6, %v8219_v35, 0 }
0x325a   : > { %6750 = vmatpush3.bf16.xpose.msra.mxu0 %v4662_v56 }
0x325b   : > { %6761 = vmatprep.subr.bf16.mxu0 %v7162_v45 }
0x325c   : > { %v4650_v37 = vpop.f32.mrb[112].mxu0 }
0x325d   : > { %v4651_v38 = vadd.f32 %v6067_v12, %v4650_v37  ;;  %v6747_v39 = vpop.f32.mrb[113].mxu0 }
0x325e   : > { %v4653_v5 = vpop.f32.mrb[114].mxu0 }
0x325f   : > { %v8229_v41 = vpack.c.bf16 %v4651_v38, %v4651_v38  ;;  %v6748_v42 = vpop.f32.mrb[115].mxu0 }
0x3261   : > { %6752 = vmatmul.mubr.msk.bf16.vlgmr.msra.gmra.mrb[116].mxu0 %vm1107_vm6, %v8212_v29  ;;  %v4723_v2 = vsel %vm1172_vm7, %v8229_v41, 0 }
0x3262   : > { %6756 = vmatpush3.bf16.msra.mxu1 %v4723_v2  ;;  %6763 = vmatprep.mubr.msk.bf16.mxu0 %vm7163_vm5, %v7162_v45 }
0x3263   : > { %6767 = vmatprep.subr.bf16.mxu1 %v7162_v45 }
0x32c3   : > { %v4768_v47 = vpop.permute.xlu0 %4767 }
0x32cb   : > { %v4771_v43 = vpop.permute.xlu1 %4770 }
0x32cc   : > { %v4776_v44 = vsel %vm1107_vm6, %v4771_v43, 0 }
0x32cd   : > { %6762 = vmatpush3.bf16.xpose.msra.mxu0 %v4776_v44 }
0x32ce   : > { %6773 = vmatprep.subr.bf16.mxu0 %v7162_v45 }
0x32d4   : > { %6764 = vmatmul.mubr.msk.bf16.vlgmr.msra.gmra.mrb[120].mxu0 %vm1107_vm6, %v4768_v47 }
0x32d5   : > { %6775 = vmatprep.mubr.msk.bf16.mxu0 %vm7163_vm5, %v7162_v45  ;;  %6774 = vmatpush3.bf16.msra.mxu0 %v4886_v11 }
0x32d6   : > { %6785 = vmatprep.subr.bf16.mxu0 %v7162_v45 }
0x3334   : > { %v4698_v4 = vpop.f32.mrb[116].mxu0 }
0x3335   : > { %v4704_v36 = vmul.f32 0.35355338, %v4698_v4  ;;  %v6753_v18 = vpop.f32.mrb[117].mxu0 }
0x3336   : > { %v4701_v48 = vpop.f32.mrb[118].mxu0 }
0x3337   : > { %v6754_v49 = vpop.f32.mrb[119].mxu0  ;;  %v4705_v50 = vadd.f32 %v4704_v36, %v7371_v20 }
0x3339   : > { %v4706_v51 = vsel %vm1107_vm6, %v4705_v50, -inf }
0x333a   : > { %4707 = vmax.xlane.f32.xlu0 %v4706_v51 }
0x33a7   : > { %v4812_v52 = vpop.f32.mrb[120].mxu0 }
0x33a8   : > { %v4818_v53 = vmul.f32 0.35355338, %v4812_v52  ;;  %v6765_v54 = vpop.f32.mrb[121].mxu0 }
0x33a9   : > { %v4815_v55 = vpop.f32.mrb[122].mxu0 }
0x33aa   : > { %v6766_v58 = vpop.f32.mrb[123].mxu0  ;;  %v4819_v59 = vadd.f32 %v4818_v53, %v7371_v20 }
0x33ac   : > { %v4820_v23 = vsel %vm1107_vm6, %v4819_v59, -inf }
0x33ad   : > { %4821 = vmax.xlane.f32.xlu1 %v4820_v23 }
0x33be   : > { %4976 = vrot.lane.b32.xlu1 %v8219_v35, %s8565_s22 }
0x33c7   : > { %v4708_v60 = vpop.xlane.xlu0 %4707 }
0x33c8   : > { %v4709_v34 = vsub.f32 %v4705_v50, %v4708_v60 }
0x33ca   : > { %v4710_v61 = vmul.f32 1.442695, %v4709_v34 }
0x33cc   : > { %7074 = vpow2.f32 %v4710_v61 }
0x33d6   : > { %v7075_v62 = vpop.eup %7074 }
0x33d7   : > { %v4712_v63 = vsel %vm1107_vm6, %v7075_v62, 0.0 }
0x33d8   : > { %4713 = vadd.xlane.f32.xlu0 %v4712_v63 }
0x343a   : > { %v4822_v0 = vpop.xlane.xlu1 %4821 }
0x343b   : > { %v4823_v1 = vsub.f32 %v4819_v59, %v4822_v0 }
0x343d   : > { %v4824_v3 = vmul.f32 1.442695, %v4823_v1 }
0x343e   : > { %v4977_v25 = vpop.permute.xlu1 %4976 }
0x343f   : > { %7076 = vpow2.f32 %v4824_v3  ;;  %v4982_v38 = vsel %vm1107_vm6, %v4977_v25, 0 }
0x3449   : > { %v7077_v57 = vpop.eup %7076 }
0x344a   : > { %v4826_v6 = vsel %vm1107_vm6, %v7077_v57, 0.0 }
0x344b   : > { %4827 = vadd.xlane.f32.xlu0 %v4826_v6  ;;  %v6036_v6 = vld [vmem:[%s8504_s14 + $0x78] sm:$0xf] }
0x3461   : > { %4833 = vrot.lane.b32.xlu0 %v8229_v41, %s8564_s2  ;;  %s8569_s2 = sld [smem:[#allocation22_spill]] }
0x3465   : > { %v4714_v7 = vpop.xlane.xlu0 %4713  ;;  %4974 = vrot.lane.b32.xlu0 %v8212_v29, %s8565_s22 }
0x3466   : > { %7078 = vrcp.f32 %v4714_v7  ;;  %v5091_v7 = vsel %vm1172_vm7, %v6036_v6, 0 }
0x3467   : > { %s8450_s24 = scalar_lea.hbm %s8569_s2, %s6134_s6 }
0x3470   : > { %v7079_v46 = vpop.eup %7078 }
0x3471   : > { %v4716_v8 = vmul.f32 %v7079_v46, %v7075_v62 }
0x3473   : > { %v4717_v9 = vpack.c.bf16 %v4716_v8, %v4716_v8 }
0x3475   : > { %6758 = vmatmul.mubr.msk.bf16.vlgmr.msra.gmra.mrb[120].mxu1 %vm1107_vm6, %v4717_v9 }
0x3476   : > { %6769 = vmatprep.mubr.msk.bf16.mxu1 %vm7163_vm5, %v7162_v45 }
0x34d8   : > { %v4828_v19 = vpop.xlane.xlu0 %4827 }
0x34d9   : > { %7080 = vrcp.f32 %v4828_v19 }
0x34dc   : > { %v4834_v13 = vpop.permute.xlu0 %4833 }
0x34dd   : > { %v4839_v14 = vsel %vm1172_vm7, %v4834_v13, 0 }
0x34de   : > { %6768 = vmatpush3.bf16.msra.mxu1 %v4839_v14 }
0x34df   : > { %6779 = vmatprep.subr.bf16.mxu1 %v7162_v45 }
0x34e0   : > { %v4975_v5 = vpop.permute.xlu0 %4974 }
0x34e3   : > { %v7081_v16 = vpop.eup %7080 }
0x34e4   : > { %v4830_v21 = vmul.f32 %v7081_v16, %v7077_v57 }
0x34e6   : > { %v4831_v26 = vpack.c.bf16 %v4830_v21, %v4830_v21 }
0x34e8   : > { %6770 = vmatmul.mubr.msk.bf16.vlgmr.msra.gmra.mrb[124].mxu1 %vm1107_vm6, %v4831_v26 }
0x34e9   : > { %6780 = vmatpush3.bf16.msra.mxu1 %v4932_v27  ;;  %6781 = vmatprep.mubr.msk.bf16.mxu1 %vm7163_vm5, %v7162_v45 }
0x34ea   : > { %6791 = vmatprep.subr.bf16.mxu1 %v7162_v45 }
0x3548   : > { %v4759_v30 = vpop.f32.mrb[120].mxu1 }
0x3549   : > { %v4765_v31 = vpack.c.bf16 %v4759_v30, %v4759_v30  ;;  %v6759_v32 = vpop.f32.mrb[121].mxu1 }
0x354a   : > { %v4762_v28 = vpop.f32.mrb[122].mxu1 }
0x354b   : > { %v6760_v33 = vpop.f32.mrb[123].mxu1  ;;  %6782 = vmatmul.mubr.msk.bf16.vlgmr.msra.gmra.mrb[128].mxu1 %vm1107_vm6, %v4765_v31 }
0x354c   : > { %6793 = vmatprep.mubr.msk.bf16.mxu1 %vm7163_vm5, %v7162_v45 }
0x35bb   : > { %v4875_v24 = vpop.f32.mrb[124].mxu1 }
0x35bc   : > { %v4881_v56 = vpack.c.bf16 %v4875_v24, %v4875_v24  ;;  %v6771_v12 = vpop.f32.mrb[125].mxu1 }
0x35bd   : > { %v4878_v37 = vpop.f32.mrb[126].mxu1 }
0x35be   : > { %v6772_v39 = vpop.f32.mrb[127].mxu1  ;;  %6776 = vmatmul.mubr.msk.bf16.vlgmr.msra.gmra.mrb[124].mxu0 %vm1107_vm6, %v4881_v56 }
0x35bf   : > { %6786 = vmatpush3.bf16.xpose.msra.mxu0 %v4982_v38  ;;  %6787 = vmatprep.mubr.msk.bf16.mxu0 %vm7163_vm5, %v7162_v45 }
0x35c0   : > { %6797 = vmatprep.subr.bf16.mxu0 %v7162_v45 }
0x35c6   : > { %6788 = vmatmul.mubr.msk.bf16.vlgmr.msra.gmra.mrb[128].mxu0 %vm1107_vm6, %v4975_v5 }
0x35c7   : > { %6799 = vmatprep.mubr.msk.bf16.mxu0 %vm7163_vm5, %v7162_v45  ;;  %6798 = vmatpush3.bf16.msra.mxu0 %v5091_v7 }
0x35c8   : > { %6809 = vmatprep.subr.bf16.mxu0 %v7162_v45 }
0x361e   : > { %v4968_v42 = vpop.f32.mrb[128].mxu1 }
0x361f   : > { %v6783_v2 = vpop.f32.mrb[129].mxu1 }
0x3620   : > { %v4971_v43 = vpop.f32.mrb[130].mxu1  ;;  %v6988_v2 = vld [vmem:[%s8505_s15 + $0x20] sm:$0xff]  }
0x3621   : > { %v6784_v44 = vpop.f32.mrb[131].mxu1 }
0x3622   : > { %v6989_v44 = vld [vmem:[%s8505_s15 + $0x28] sm:$0xff]  }
0x3691   : > { %v4922_v47 = vpop.f32.mrb[124].mxu0 }
0x3692   : > { %v8284_v4 = vadd.f32 %v4968_v42, %v4922_v47  ;;  %v6777_v36 = vpop.f32.mrb[125].mxu0 }
0x3693   : > { %v4925_v18 = vpop.f32.mrb[126].mxu0 }
0x3694   : > { %v6778_v48 = vpop.f32.mrb[127].mxu0 }
0x3699   : > { %v5018_v49 = vpop.f32.mrb[128].mxu0 }
0x369a   : > { %v5024_v50 = vmul.f32 0.35355338, %v5018_v49  ;;  %v6789_v51 = vpop.f32.mrb[129].mxu0 }
0x369b   : > { %v5021_v52 = vpop.f32.mrb[130].mxu0 }
0x369c   : > { %v6790_v53 = vpop.f32.mrb[131].mxu0  ;;  %v5025_v54 = vadd.f32 %v5024_v50, %v7371_v20  ;;  %v6991_v50 = vld [vmem:[%s8505_s15 + $0x38] sm:$0xff]  }
0x369e   : > { %v5026_v55 = vsel %vm1107_vm6, %v5025_v54, -inf }
0x369f   : > { %5027 = vmax.xlane.f32.xlu1 %v5026_v55 }
0x36b0   : > { %5136 = vrot.lane.b32.xlu1 %v8219_v35, %s8566_s7 }
0x36b4   : > { %5134 = vrot.lane.b32.xlu1 %v8212_v29, %s8566_s7 }
0x372c   : > { %v5028_v58 = vpop.xlane.xlu1 %5027 }
0x372d   : > { %v5029_v59 = vsub.f32 %v5025_v54, %v5028_v58 }
0x372f   : > { %v5030_v23 = vmul.f32 1.442695, %v5029_v59 }
0x3730   : > { %v5137_v0 = vpop.permute.xlu1 %5136 }
0x3731   : > { %7082 = vpow2.f32 %v5030_v23  ;;  %v5142_v3 = vsel %vm1107_vm6, %v5137_v0, 0 }
0x3734   : > { %v5135_v57 = vpop.permute.xlu1 %5134 }
0x373b   : > { %v7083_v60 = vpop.eup %7082 }
0x373c   : > { %v5032_v34 = vsel %vm1107_vm6, %v7083_v60, 0.0 }
0x373d   : > { %5033 = vadd.xlane.f32.xlu0 %v5032_v34 }
0x3753   : > { %5038 = vrot.lane.b32.xlu0 %v8229_v41, %s8565_s22  ;;  %s8567_s22 = sld [smem:[#allocation21_spill]] }
0x37ca   : > { %v5034_v61 = vpop.xlane.xlu0 %5033 }
0x37cb   : > { %7084 = vrcp.f32 %v5034_v61 }
0x37ce   : > { %v5039_v62 = vpop.permute.xlu0 %5038 }
0x37cf   : > { %v5044_v63 = vsel %vm1172_vm7, %v5039_v62, 0  ;;  %v6083_v62 = vld [vmem:[%s8506_s16 + $0x10] ss:$0 sm:$0xff] }
0x37d0   : > { %6792 = vmatpush3.bf16.msra.mxu1 %v5044_v63 }
0x37d1   : > { %6803 = vmatprep.subr.bf16.mxu1 %v7162_v45 }
0x37d5   : > { %v7085_v29 = vpop.eup %7084 }
0x37d6   : > { %v5036_v35 = vmul.f32 %v7085_v29, %v7083_v60 }
0x37d8   : > { %v5037_v1 = vpack.c.bf16 %v5036_v35, %v5036_v35 }
0x37da   : > { %6794 = vmatmul.mubr.msk.bf16.vlgmr.msra.gmra.mrb[132].mxu1 %vm1107_vm6, %v5037_v1 }
0x37db   : > { %6804 = vmatpush3.bf16.xpose.msra.mxu1 %v5142_v3  ;;  %6805 = vmatprep.mubr.msk.bf16.mxu1 %vm7163_vm5, %v7162_v45  ;;  %v6090_v3 = vld [vmem:[%s8506_s16 + $0x12] ss:$0 sm:$0xff] }
0x37dc   : > { %6815 = vmatprep.subr.bf16.mxu1 %v7162_v45 }
0x37e2   : > { %6806 = vmatmul.mubr.msk.bf16.vlgmr.msra.gmra.mrb[136].mxu1 %vm1107_vm6, %v5135_v57 }
0x37e3   : > { %6817 = vmatprep.mubr.msk.bf16.mxu1 %vm7163_vm5, %v7162_v45 }
0x38ad   : > { %v5080_v46 = vpop.f32.mrb[132].mxu1 }
0x38ae   : > { %v5086_v8 = vpack.c.bf16 %v5080_v46, %v5080_v46  ;;  %v6795_v9 = vpop.f32.mrb[133].mxu1 }
0x38af   : > { %v5083_v10 = vpop.f32.mrb[134].mxu1 }
0x38b0   : > { %v6796_v11 = vpop.f32.mrb[135].mxu1  ;;  %6800 = vmatmul.mubr.msk.bf16.vlgmr.msra.gmra.mrb[132].mxu0 %vm1107_vm6, %v5086_v8 }
0x38b1   : > { %6811 = vmatprep.mubr.msk.bf16.mxu0 %vm7163_vm5, %v7162_v45 }
0x38b5   : > { %v5178_v19 = vpop.f32.mrb[136].mxu1 }
0x38b6   : > { %v5184_v13 = vmul.f32 0.35355338, %v5178_v19  ;;  %v6807_v14 = vpop.f32.mrb[137].mxu1  ;;  %v6992_v19 = vld [vmem:[%s8507_s17 + $0x10] sm:$0xff]  }
0x38b7   : > { %v5181_v16 = vpop.f32.mrb[138].mxu1  ;;  %v6994_v14 = vld [vmem:[%s8509_s19 + $0x40] sm:$0xff]  }
0x38b8   : > { %v6808_v17 = vpop.f32.mrb[139].mxu1  ;;  %v5185_v21 = vadd.f32 %v5184_v13, %v7371_v20  ;;  %v6037_v20 = vld [vmem:[%s8504_s14 + $0x7c] sm:$0xf] }
0x38b9   : > { %v6993_v13 = vld [vmem:[%s8507_s17 + $0x18] sm:$0xff]  }
0x38ba   : > { %v5186_v26 = vsel %vm1107_vm6, %v5185_v21, -inf }
0x38bb   : > { %5187 = vmax.xlane.f32.xlu0 %v5186_v26 }
0x38d1   : > { %5198 = vrot.lane.b32.xlu0 %v8229_v41, %s8566_s7  ;;  %v5251_v41 = vsel %vm1172_vm7, %v6037_v20, 0  ;;  %v6996_v20 = vld [vmem:[%s8509_s19 + $0x50] sm:$0xff]   ;;  %s698_s7 = sand.u32 1, %s7150_s28  }
0x38d2   : > { %6816 = vmatpush3.bf16.msra.mxu1 %v5251_v41  ;;  %v6997_v41 = vld [vmem:[%s8509_s19 + $0x58] sm:$0xff]   ;;  %s5830_s5 = sshll.u32 %s698_s7, 3  ;;  %s5733_s1 = scalar_lea.sflag [#allocation3], %s698_s7 }
0x38d3   : > { %6829 = vmatprep.subr.bf16.mxu1 %v7162_v45  ;;  %s700_s29 = scalar_lea.vmem [#allocation2], %s5830_s5  ;;  %s7100_s5 = sshll.u32 %s7167_s4, 4  ;;  %s7101_s5 = int_to_ptr.vmem [resolvable:$false] %s7100_s5 }
0x38d4   : > { %s5746_s30 = sshll.u32 %s700_s29, 4  ;;  %s7102_s8 = scalar_lea.vmem %s7101_s5, 256  ;;  %s8445_s30 = int_to_ptr.vmem [resolvable:$true] %s5746_s30 }
0x38d5   : > { %s7096_s20 = scalar_lea.vmem %s8445_s30, 128  ;;  %p7103_p0 = scmp.lt.s32.totalorder %s8445_s30, %s7101_s5 }
0x38d6   : > { %p7097_p11 = scmp.ne.s32.totalorder %s8445_s30, %s7096_s20  ;;  %p7104_p1 = scmp.lt.s32.totalorder %s7102_s8, %s7096_s20 }
0x38d8   : > { %p7098_p12 = pnand %p7097_p11, %p7321_p5  ;;  %p7105_p2 = por %p7104_p1, %p7103_p0 }
0x38da   : > { %p7099_p13 = pneg %p7098_p12 }
0x38dc   : > { %p7106_p3 = pnand %p7105_p2, %p7099_p13 }
0x3948   : > { %v5188_v27 = vpop.xlane.xlu0 %5187 }
0x3949   : > { %v5189_v30 = vsub.f32 %v5185_v21, %v5188_v27  ;;  %v6091_v27 = vld [vmem:[%s8506_s16 + $0x13] ss:$0 sm:$0xff] }
0x394b   : > { %v5190_v31 = vmul.f32 1.442695, %v5189_v30 }
0x394c   : > { %v5199_v32 = vpop.permute.xlu0 %5198 }
0x394d   : > { %7086 = vpow2.f32 %v5190_v31  ;;  %v5204_v28 = vsel %vm1172_vm7, %v5199_v32, 0  ;;  %v6092_v31 = vld [vmem:[%s8506_s16 + $0x14] ss:$0 sm:$0xff] }
0x394e   : > { %6810 = vmatpush3.bf16.msra.mxu0 %v5204_v28 }
0x394f   : > { %6821 = vmatprep.subr.bf16.mxu0 %v7162_v45 }
0x3957   : > { %v7087_v33 = vpop.eup %7086 }
0x3958   : > { %v5192_v25 = vsel %vm1107_vm6, %v7087_v33, 0.0 }
0x3959   : > { %5193 = vadd.xlane.f32.xlu1 %v5192_v25  ;;  %v6995_v25 = vld [vmem:[%s8509_s19 + $0x48] sm:$0xff]  }
0x3983   : > { %v5127_v24 = vpop.f32.mrb[132].mxu0 }
0x3984   : > { %v5133_v56 = vadd.f32 %v5127_v24, %v8284_v4  ;;  %v6801_v12 = vpop.f32.mrb[133].mxu0  ;;  %v6990_v4 = vld [vmem:[%s8505_s15 + $0x30] sm:$0xff]   ;;  %v6998_v24 = vld [vmem:[%s8509_s19 + $0x60] sm:$0xff]  }
0x3985   : > { %v5130_v37 = vpop.f32.mrb[134].mxu0  ;;  %v7000_v12 = vld [vmem:[%s8509_s19 + $0x70] sm:$0xff]  }
0x3986   : > { %v6802_v38 = vpop.f32.mrb[135].mxu0  ;;  %v7001_v37 = vld [vmem:[%s8509_s19 + $0x78] sm:$0xff]  }
0x3987   : > { %v6098_v38 = vld [vmem:[%s8508_s18 + $0x1] ss:$0 sm:$0xff] }
0x39e6   : > { %v5194_v39 = vpop.xlane.xlu1 %5193 }
0x39e7   : > { %7088 = vrcp.f32 %v5194_v39 }
0x39f1   : > { %v7089_v5 = vpop.eup %7088 }
0x39f2   : > { %v5196_v42 = vmul.f32 %v7089_v5, %v7087_v33 }
0x39f4   : > { %v5197_v43 = vpack.c.bf16 %v5196_v42, %v5196_v42 }
0x39f6   : > { %6812 = vmatmul.mubr.msk.bf16.vlgmr.msra.gmra.mrb[136].mxu0 %vm1107_vm6, %v5197_v43 }
0x39f7   : > { %6822 = vmatpush3.bf16.msra.mxu0 %v6988_v2  ;;  %6825 = vmatprep.mubr.msk.bf16.mxu0 %vm7163_vm5, %v7162_v45 }
0x39f8   : > { %6823 = vmatprep.subr.bf16.mxu0 %v7162_v45 }
0x39fb   : > { %6824 = vmatpush3.bf16.msra.mxu0 %v6989_v44 }
0x39fc   : > { %6837 = vmatprep.subr.bf16.mxu0 %v7162_v45 }
0x39fe   : > { %6826 = vmatmul.mubr.msk.bf16.vlgmr.msra.gmra.mrb[140].mxu0 %vm898_vm4, %v8068_v40  ;;  %v6052_v40 = vld [vmem:[%s8506_s16 + $0x11] sm:$0x1] }
0x39ff   : > { %6841 = vmatprep.mubr.msk.bf16.mxu0 %vm7163_vm5, %v7162_v45  ;;  %6838 = vmatpush3.bf16.msra.mxu0 %v6992_v19 }
0x3a00   : > { %6839 = vmatprep.subr.bf16.mxu0 %v7162_v45 }
0x3a03   : > { %6840 = vmatpush3.bf16.msra.mxu0 %v6993_v13 }
0x3a04   : > { %6865 = vmatprep.subr.bf16.mxu0 %v7162_v45 }
0x3ac9   : > { %v5240_v47 = vpop.f32.mrb[136].mxu0 }
0x3aca   : > { %v5246_v36 = vpack.c.bf16 %v5240_v47, %v5240_v47  ;;  %v6813_v18 = vpop.f32.mrb[137].mxu0 }
0x3acb   : > { %v5243_v48 = vpop.f32.mrb[138].mxu0 }
0x3acc   : > { %v6814_v49 = vpop.f32.mrb[139].mxu0  ;;  %6818 = vmatmul.mubr.msk.bf16.vlgmr.msra.gmra.mrb[140].mxu1 %vm1107_vm6, %v5246_v36 }
0x3acd   : > { %6830 = vmatpush3.bf16.msra.mxu1 %v6990_v4  ;;  %6833 = vmatprep.mubr.msk.bf16.mxu1 %vm7163_vm5, %v7162_v45 }
0x3ace   : > { %6831 = vmatprep.subr.bf16.mxu1 %v7162_v45 }
0x3ad1   : > { %v5348_v51 = vpop.f32.mrb[140].mxu0  ;;  %6832 = vmatpush3.bf16.msra.mxu1 %v6991_v50 }
0x3ad2   : > { %v5349_v52 = vadd.f32 %v6052_v40, %v5348_v51  ;;  %v6827_v53 = vpop.f32.mrb[141].mxu0  ;;  %6845 = vmatprep.subr.bf16.mxu1 %v7162_v45 }
0x3ad3   : > { %v5351_v54 = vpop.f32.mrb[142].mxu0  ;;  %v6126_v53 = vld [vmem:[%s8506_s16 + $0x15] ss:$0 sm:$0xff] }
0x3ad4   : > { %v5354_v55 = vpack.c.bf16 %v5349_v52, %v5349_v52  ;;  %v6828_v58 = vpop.f32.mrb[143].mxu0 }
0x3ad6   : > { %6834 = vmatmul.mubr.msk.bf16.vlgmr.msra.gmra.mrb[144].mxu1 %vm898_vm4, %v5354_v55 }
0x3ad7   : > { %6861 = vmatprep.mubr.msk.bf16.mxu1 %vm7163_vm5, %v7162_v45  ;;  %6846 = vmatpush3.bf16.msra.mxu1 %v6994_v14 }
0x3ad8   : > { %6847 = vmatprep.subr.bf16.mxu1 %v7162_v45 }
0x3adb   : > { %6848 = vmatpush3.bf16.msra.mxu1 %v6995_v25 }
0x3adc   : > { %6849 = vmatprep.subr.bf16.mxu1 %v7162_v45 }
0x3adf   : > { %6850 = vmatpush3.bf16.msra.mxu1 %v6996_v20 }
0x3ae0   : > { %6851 = vmatprep.subr.bf16.mxu1 %v7162_v45 }
0x3ae3   : > { %6852 = vmatpush3.bf16.msra.mxu1 %v6997_v41 }
0x3ae4   : > { %6853 = vmatprep.subr.bf16.mxu1 %v7162_v45 }
0x3ae7   : > { %6854 = vmatpush3.bf16.msra.mxu1 %v6998_v24 }
0x3ae8   : > { %6855 = vmatprep.subr.bf16.mxu1 %v7162_v45 }
0x3b9f   : > { %v5287_v59 = vpop.f32.mrb[140].mxu1 }
0x3ba0   : > { %v5293_v23 = vadd.f32 %v5287_v59, %v5133_v56  ;;  %v6819_v60 = vpop.f32.mrb[141].mxu1  ;;  %v6999_v56 = vld [vmem:[%s8509_s19 + $0x68] sm:$0xff]  }
0x3ba1   : > { %v5290_v34 = vpop.f32.mrb[142].mxu1  ;;  %6856 = vmatpush3.bf16.msra.mxu1 %v6999_v56 }
0x3ba2   : > { %v6820_v61 = vpop.f32.mrb[143].mxu1  ;;  %v5300_v63 = vadd.f32 %v6083_v62, %v5293_v23  ;;  %6857 = vmatprep.subr.bf16.mxu1 %v7162_v45 }
0x3ba4   : > { %v5301_v35 = vadd.f32 %v5300_v63, %v8164_v22 }
0x3ba5   : > { %6858 = vmatpush3.bf16.msra.mxu1 %v7000_v12 }
0x3ba6   : > { %6859 = vmatprep.subr.bf16.mxu1 %v7162_v45 }
0x3ba9   : > { %v5404_v29 = vpop.f32.mrb[144].mxu1  ;;  %6860 = vmatpush3.bf16.msra.mxu1 %v7001_v37 }
0x3baa   : > { %v5413_v0 = vrot.slane %v5404_v29, %v7364_v15  ;;  %v6835_v1 = vpop.f32.mrb[145].mxu1 }
0x3bab   : > { %v5407_v57 = vpop.f32.mrb[146].mxu1 }
0x3bac   : > { %v5414_v6 = vadd.f32 %v5413_v0, %v5301_v35  ;;  %v6836_v7 = vpop.f32.mrb[147].mxu1  ;;  %v7002_v35 = vld [vmem:[%s8511_s21] sm:$0xff]   ;;  %v7003_v0 = vld [vmem:[%s8511_s21 + $0x8] sm:$0xff]  }
0x3bad   : > { %v6128_v7 = vld [vmem:[%s8567_s22] ss:$0 sm:$0xff] }
0x3bae   : > { %v8366_v46 = vadd.f32 %v6090_v3, %v5414_v6 }
0x3bb0   : > { %v5422_v8 = vsel %vm898_vm4, %v8366_v46, 0.0 }
0x3bb1   : > { %5423 = vadd.xlane.f32.xlu1 %v5422_v8  ;;  %v6129_v8 = vld [vmem:[%s8567_s22 + $0x1] ss:$0 sm:$0xff] }
0x3c3e   : > { %v5424_v9 = vpop.xlane.xlu1 %5423 }
0x3c3f   : > { %v5425_v10 = vmul.f32 0.03125, %v5424_v9 }
0x3c41   : > { %v5426_v22 = vsub.f32 %v8366_v46, %v5425_v10 }
0x3c43   : > { %v5427_v11 = vmul.f32 %v5426_v22, %v5426_v22 }
0x3c45   : > { %v5428_v15 = vsel %vm898_vm4, %v5427_v11, 0.0 }
0x3c46   : > { %5429 = vadd.xlane.f32.xlu1 %v5428_v15 }
0x3cd3   : > { %v5430_v16 = vpop.xlane.xlu1 %5429 }
0x3cd4   : > { %v5431_v17 = vmul.f32 0.03125, %v5430_v16 }
0x3cd6   : > { %v5432_v21 = vadd.f32 1e-05, %v5431_v17 }
0x3cd8   : > { %7090 = vrsqrt.f32 %v5432_v21 }
0x3ce2   : > { %v7091_v26 = vpop.eup %7090 }
0x3ce3   : > { %v5434_v30 = vmul.f32 %v7091_v26, %v5426_v22 }
0x3ce5   : > { %v5441_v32 = vmul.f32 %v6091_v27, %v5434_v30 }
0x3ce7   : > { %v5448_v28 = vadd.f32 %v6092_v31, %v5441_v32 }
0x3ce9   : > { %v5454_v33 = vpack.c.bf16 %v5448_v28, %v5448_v28 }
0x3ceb   : > { %6842 = vmatmul.mubr.msk.bf16.vlgmr.msra.gmra.mrb[144].mxu0 %vm898_vm4, %v5454_v33 }
0x3cec   : > { %6869 = vmatprep.mubr.msk.bf16.mxu0 %vm7163_vm5, %v7162_v45  ;;  %6866 = vmatpush3.bf16.msra.mxu0 %v7002_v35 }
0x3ced   : > { %6867 = vmatprep.subr.bf16.mxu0 %v7162_v45 }
0x3cf0   : > { %6868 = vmatpush3.bf16.msra.mxu0 %v7003_v0 }
0x3dbe   : > { %v5512_v39 = vpop.f32.mrb[144].mxu0 }
0x3dbf   : > { %v5513_v5 = vadd.f32 %v6098_v38, %v5512_v39  ;;  %v6843_v42 = vpop.f32.mrb[145].mxu0 }
0x3dc0   : > { %v5515_v2 = vpop.f32.mrb[146].mxu0 }
0x3dc1   : > { %v5519_v43 = vmul.f32 0.044715, %v5513_v5  ;;  %v6844_v44 = vpop.f32.mrb[147].mxu0  ;;  %v5518_v49 = vmul.f32 0.5, %v5513_v5 }
0x3dc3   : > { %v5520_v47 = vmul.f32 %v5519_v43, %v5513_v5 }
0x3dc5   : > { %v5521_v4 = vmul.f32 %v5520_v47, %v5513_v5 }
0x3dc7   : > { %v5522_v36 = vadd.f32 %v5521_v4, %v5513_v5 }
0x3dc9   : > { %v5523_v18 = vmul.f32 0.7978846, %v5522_v36 }
0x3dcb   : > { %7092 = vtanh.f32 %v5523_v18 }
0x3dd5   : > { %v7093_v48 = vpop.eup %7092 }
0x3dd6   : > { %v5525_v50 = vadd.f32 1.0, %v7093_v48 }
0x3dd8   : > { %v5526_v40 = vmul.f32 %v5525_v50, %v5518_v49 }
0x3dda   : > { %v5544_v51 = vpack.c.bf16 %v5526_v40, %v5526_v40 }
0x3ddc   : > { %6862 = vmatmul.mubr.bf16.vlgmr.msra.gmra.mrb[148].mxu1 %v5544_v51 }
0x3eaf   : > { %v5627_v52 = vpop.f32.mrb[148].mxu1 }
0x3eb0   : > { %v5633_v54 = vadd.f32 %v5627_v52, %v8366_v46  ;;  %v6863_v55 = vpop.f32.mrb[149].mxu1 }
0x3eb1   : > { %v5630_v58 = vpop.f32.mrb[150].mxu1 }
0x3eb2   : > { %v6864_v59 = vpop.f32.mrb[151].mxu1  ;;  %v5640_v23 = vadd.f32 %v6126_v53, %v5633_v54 }
0x3eb4   : > { %v5644_v60 = vsel %vm898_vm4, %v5640_v23, 0.0 }
0x3eb5   : > { %5645 = vadd.xlane.f32.xlu1 %v5644_v60 }
0x3f42   : > { %v5646_v34 = vpop.xlane.xlu1 %5645 }
0x3f43   : > { %v5647_v61 = vmul.f32 0.03125, %v5646_v34 }
0x3f45   : > { %v5648_v62 = vsub.f32 %v5640_v23, %v5647_v61 }
0x3f47   : > { %v5649_v63 = vmul.f32 %v5648_v62, %v5648_v62 }
0x3f49   : > { %v5650_v29 = vsel %vm898_vm4, %v5649_v63, 0.0 }
0x3f4a   : > { %5651 = vadd.xlane.f32.xlu1 %v5650_v29 }
0x3fd7   : > { %v5652_v1 = vpop.xlane.xlu1 %5651 }
0x3fd8   : > { %v5653_v3 = vmul.f32 0.03125, %v5652_v1 }
0x3fda   : > { %v5654_v57 = vadd.f32 1e-05, %v5653_v3 }
0x3fdc   : > { %7094 = vrsqrt.f32 %v5654_v57 }
0x3fe6   : > { %v7095_v6 = vpop.eup %7094 }
0x3fe7   : > { %v5656_v46 = vmul.f32 %v7095_v6, %v5648_v62 }
0x3fe9   : > { %v5663_v9 = vmul.f32 %v6128_v7, %v5656_v46 }
0x3feb   : > { %v5670_v10 = vadd.f32 %v6129_v8, %v5663_v9 }
0x3fed   : > { %v5671_v22 = vpack.c.bf16 %v5670_v10, %v5670_v10 }
0x3fef   : > { %6870 = vmatmul.mubr.msk.bf16.vlgmr.msra.gmra.mrb[148].mxu0 %vm898_vm4, %v5671_v22 }
0x40c2   : > { %v5725_v45 = vpop.f32.mrb[148].mxu0 }
0x40c3   : > { %5731 = vst [vmem:[%s700_s29] sm:$0xff] %v5725_v45  ;;  %v6871_v11 = vpop.f32.mrb[149].mxu0 }
0x40c4   : > { %v5728_v15 = vpop.f32.mrb[150].mxu0 }
0x40c5   : > { %7109 = shalt.err (!%p7106_p3)
}
0x40c6   : > { %s7110_s7 = scalar_lea.hbm %s8450_s24, 128  ;;  %s7114_s26 = scalar_lea.hbm %s8569_s2, 256 }
0x40c7   : > { %p7111_p4 = scmp.ne.s32.totalorder %s8450_s24, %s7110_s7  ;;  %p7115_p9 = scmp.lt.u32.totalorder %s8450_s24, %s8569_s2 }
0x40c8   : > { %p7116_p10 = scmp.lt.u32.totalorder %s7114_s26, %s7110_s7  ;;  %p7118_p12 = scmp.lt.u32.totalorder %s7110_s7, %s8450_s24 }
0x40c9   : > { %p7112_p7 = pnand %p7111_p4, %p7321_p5 }
0x40ca   : > { %p7117_p11 = por %p7116_p10, %p7115_p9 }
0x40cb   : > { %p7113_p8 = pneg %p7112_p7 }
0x40cc   : > { %p7119_p13 = por %p7118_p12, %p7117_p11 }
0x40ce   : > { %p7120_p0 = pnand %p7119_p13, %p7113_p8 }
0x40d0   : > { %7123 = shalt.err (!%p7120_p0)
}
0x40d1   : > { %6873 = dma.vmem_to_hbm [thread:$0]  (%p7321_p5), %s8445_s30, 128, %s8450_s24, %s5733_s1   ;;  %v6872_v19 = vpop.f32.mrb[151].mxu0 }
0x40d2 PF: > { %s8570_s8 = sld [smem:[#allocation7_spill]]  ;;  %s8571_s20 = sld [smem:[#allocation5_spill]] }
0x40d8   : > { %p6879_p1 = scmp.ge.s32.totalorder %s8570_s8, 2  ;;  %s5758_s29 = sand.u32 1, %s8571_s20  }
0x40d9   : > { %s5759_s6 = scalar_lea.sflag [#allocation3], %s5758_s29 }
0x40da   : > { %p6876_p2 = pnand %p6879_p1, %p7325_p6 }
0x40dc   : > { %7141 = dma.done.wait (!%p6876_p2), %s5759_s6, 128  }
0x40dd   : > { %7143 = vsyncadd (!%p6876_p2), %s5759_s6, 4294967168  ;;  %s8573_s30 = sld [smem:[#allocation8_spill]]  ;;  %s8574_s7 = sld [smem:[#allocation6_spill]] }
0x40de   : > { %s8575_s29 = sld [smem:[#allocation9_spill]]  ;;  %s8576_s3 = smov %s7150_s28 }
0x40e3   : > { %p32_p3 = scmp.ge.s32.totalorder %s8573_s30, 4   ;;  %s8577_s28 = smov %s8574_s7 }
0x40e5   :  { %34 = sbr.rel (!%p32_p3) target bundleno = 15 (0xf), region = 162 }
0x40ec   :  { %5764 = vsyncpa [#allocation3], 1 }
0x40ed   :  { %5766 = vsyncpa [#allocation3 + $0x1], 1 }

</bundles_post_ra>
